<compile_context>
chip_gen: v7x
topology: tpu7x:2x2x1
jax: 0.10.0
libtpu: 0.0.40
codegen_flags: <defaults>
</compile_context>

<pallas_src>
import functools

import jax
import jax.numpy as jnp
from jax.experimental import pallas as pl
from jax.experimental.pallas import tpu as pltpu


# ---------------------------------------------------------------------------
# Kernel A: fused  [2x2 avg-pool] + [3x3 conv h2h] + [3x3 conv h2l]
#           + [BN sum / sum-of-squares statistics]              (grid = (N,))
# ---------------------------------------------------------------------------
def _octave_conv_stats_kernel(x_ref, wh_ref, wl_ref,            # inputs
                              yh_ref, yl_ref, sh_ref, sl_ref,   # outputs
                              xpad_h, xpad_l, col_h, col_l):    # VMEM scratch
    n = pl.program_id(0)
    _, H, W, Cin = x_ref.shape
    Ho, Wo = H // 2, W // 2

    # --- high-res padded tile: halo handled in VMEM (no host-side jnp.pad) ---
    xpad_h[...] = jnp.zeros_like(xpad_h)
    xpad_h[pl.ds(1, H), pl.ds(1, W), :] = x_ref[0].astype(jnp.float32)

    # --- fused 2x2 / stride-2 average pool -> low-res padded tile -----------
    pooled = (x_ref[:, pl.ds(0, Ho, 2), pl.ds(0, Wo, 2), :].astype(jnp.float32)
              + x_ref[:, pl.ds(0, Ho, 2), pl.ds(1, Wo, 2), :].astype(jnp.float32)
              + x_ref[:, pl.ds(1, Ho, 2), pl.ds(0, Wo, 2), :].astype(jnp.float32)
              + x_ref[:, pl.ds(1, Ho, 2), pl.ds(1, Wo, 2), :].astype(jnp.float32)
              ) * 0.25
    xpad_l[...] = jnp.zeros_like(xpad_l)
    xpad_l[pl.ds(1, Ho), pl.ds(1, Wo), :] = pooled[0]

    # --- im2col: one (spatial, 9*Cin) matrix per branch -> single MXU dot ---
    for dy in range(3):
        for dx in range(3):
            t = dy * 3 + dx
            col_h[:, pl.ds(t * Cin, Cin)] = (
                xpad_h[pl.ds(dy, H), pl.ds(dx, W), :].reshape(H * W, Cin))
            col_l[:, pl.ds(t * Cin, Cin)] = (
                xpad_l[pl.ds(dy, Ho), pl.ds(dx, Wo), :].reshape(Ho * Wo, Cin))

    # (Cout, 9*Cin) x (S, 9*Cin)^T -> (Cout, S): channel-major so the big
    # spatial dim lands on lanes (lane-dense stores, output already "NCHW").
    dn = (((1,), (1,)), ((), ()))
    yh = jax.lax.dot_general(wh_ref[...], col_h[...], dn,
                             preferred_element_type=jnp.float32)
    yl = jax.lax.dot_general(wl_ref[...], col_l[...], dn,
                             preferred_element_type=jnp.float32)

    yh_ref[0] = yh.astype(yh_ref.dtype)
    yl_ref[0] = yl.astype(yl_ref.dtype)

    # --- BN batch statistics fused into the conv (single pass) --------------
    @pl.when(n == 0)
    def _():
        sh_ref[...] = jnp.zeros_like(sh_ref)
        sl_ref[...] = jnp.zeros_like(sl_ref)

    sh_ref[:, 0:1] += jnp.sum(yh, axis=1, keepdims=True)
    sh_ref[:, 1:2] += jnp.sum(yh * yh, axis=1, keepdims=True)
    sl_ref[:, 0:1] += jnp.sum(yl, axis=1, keepdims=True)
    sl_ref[:, 1:2] += jnp.sum(yl * yl, axis=1, keepdims=True)


# ---------------------------------------------------------------------------
# Kernel B: BN affine (from fused batch statistics) + ReLU epilogue
# ---------------------------------------------------------------------------
def _bn_relu_kernel(xh_ref, xl_ref, sh_ref, sl_ref,
                    gh_ref, bh_ref, gl_ref, bl_ref,
                    oh_ref, ol_ref, *, count_h, count_l, eps):
    def _apply(x_ref, s_ref, g_ref, b_ref, o_ref, count):
        x = x_ref[0].astype(jnp.float32)               # (C, S)
        inv_n = 1.0 / count
        mean = s_ref[:, 0:1] * inv_n                   # (C, 1)
        var = s_ref[:, 1:2] * inv_n - mean * mean      # biased variance
        scale = g_ref[...] * jax.lax.rsqrt(var + eps)
        shift = b_ref[...] - mean * scale
        o_ref[0] = jnp.maximum(x * scale + shift, 0.0).astype(o_ref.dtype)

    _apply(xh_ref, sh_ref, gh_ref, bh_ref, oh_ref, count_h)
    _apply(xl_ref, sl_ref, gl_ref, bl_ref, ol_ref, count_l)


# ---------------------------------------------------------------------------
# FirstOctaveCBR forward
# ---------------------------------------------------------------------------
def first_octave_cbr(x_nchw, w_h2h, w_h2l, gamma_h, beta_h, gamma_l, beta_l,
                     eps=1e-5):
    """FirstOctaveCBR forward (k=3, stride=1, pad=1, bias=False, training BN).

    x_nchw : (N, Cin, H, W)        -- PyTorch layout
    w_h2h  : (c_h, Cin, 3, 3)      -- PyTorch Conv2d weight layout
    w_h2l  : (c_l, Cin, 3, 3)
    gamma_*, beta_* : (C,)
    Returns (x_h, x_l) in NCHW: (N, c_h, H, W), (N, c_l, H//2, W//2).
    """
    N, Cin, H, W = x_nchw.shape
    c_h = w_h2h.shape[0]
    c_l = w_h2l.shape[0]
    Ho, Wo = H // 2, W // 2

    # glue: channels-last input (channels ride the im2col K dim).  If the
    # surrounding network keeps NHWC activations this transpose disappears;
    # outputs already come back channel-major, so no output transpose.
    x_nhwc = jnp.transpose(x_nchw, (0, 2, 3, 1))
    # glue: (Cout, Cin, kh, kw) -> (Cout, kh, kw, Cin) -> (Cout, 9*Cin),
    # matching the im2col column order (tap-major, Cin-minor).
    wh2 = jnp.transpose(w_h2h, (0, 2, 3, 1)).reshape(c_h, 9 * Cin)
    wl2 = jnp.transpose(w_h2l, (0, 2, 3, 1)).reshape(c_l, 9 * Cin)

    yh, yl, sh, sl = pl.pallas_call(
        _octave_conv_stats_kernel,
        out_shape=(
            jax.ShapeDtypeStruct((N, c_h, H * W), jnp.float32),
            jax.ShapeDtypeStruct((N, c_l, Ho * Wo), jnp.float32),
            jax.ShapeDtypeStruct((c_h, 2), jnp.float32),
            jax.ShapeDtypeStruct((c_l, 2), jnp.float32),
        ),
        grid=(N,),
        in_specs=[
            pl.BlockSpec((1, H, W, Cin), lambda n: (n, 0, 0, 0)),
            pl.BlockSpec((c_h, 9 * Cin), lambda n: (0, 0)),
            pl.BlockSpec((c_l, 9 * Cin), lambda n: (0, 0)),
        ],
        out_specs=(
            pl.BlockSpec((1, c_h, H * W), lambda n: (n, 0, 0)),
            pl.BlockSpec((1, c_l, Ho * Wo), lambda n: (n, 0, 0)),
            pl.BlockSpec((c_h, 2), lambda n: (0, 0)),   # resident accumulator
            pl.BlockSpec((c_l, 2), lambda n: (0, 0)),   # resident accumulator
        ),
        scratch_shapes=[
            pltpu.VMEM((H + 2, W + 2, Cin), jnp.float32),
            pltpu.VMEM((Ho + 2, Wo + 2, Cin), jnp.float32),
            pltpu.VMEM((H * W, 9 * Cin), jnp.float32),
            pltpu.VMEM((Ho * Wo, 9 * Cin), jnp.float32),
        ],
        # N is a reduction axis for the BN statistics -> "arbitrary".
        compiler_params=pltpu.CompilerParams(
            dimension_semantics=("arbitrary",)),
    )(x_nhwc, wh2, wl2)

    bn_kernel = functools.partial(
        _bn_relu_kernel,
        count_h=float(N * H * W), count_l=float(N * Ho * Wo), eps=eps)

    oh, ol = pl.pallas_call(
        bn_kernel,
        out_shape=(
            jax.ShapeDtypeStruct((N, c_h, H * W), jnp.float32),
            jax.ShapeDtypeStruct((N, c_l, Ho * Wo), jnp.float32),
        ),
        grid=(N,),
        in_specs=[
            pl.BlockSpec((1, c_h, H * W), lambda n: (n, 0, 0)),
            pl.BlockSpec((1, c_l, Ho * Wo), lambda n: (n, 0, 0)),
            pl.BlockSpec((c_h, 2), lambda n: (0, 0)),
            pl.BlockSpec((c_l, 2), lambda n: (0, 0)),
            pl.BlockSpec((c_h, 1), lambda n: (0, 0)),
            pl.BlockSpec((c_h, 1), lambda n: (0, 0)),
            pl.BlockSpec((c_l, 1), lambda n: (0, 0)),
            pl.BlockSpec((c_l, 1), lambda n: (0, 0)),
        ],
        out_specs=(
            pl.BlockSpec((1, c_h, H * W), lambda n: (n, 0, 0)),
            pl.BlockSpec((1, c_l, Ho * Wo), lambda n: (n, 0, 0)),
        ),
        compiler_params=pltpu.CompilerParams(
            dimension_semantics=("parallel",)),
    )(yh, yl, sh, sl,
      gamma_h.reshape(c_h, 1), beta_h.reshape(c_h, 1),
      gamma_l.reshape(c_l, 1), beta_l.reshape(c_l, 1))

    # glue: split the flattened spatial dim back out -> NCHW (row-major
    # compatible reshape; no transpose on the output path).
    return oh.reshape(N, c_h, H, W), ol.reshape(N, c_l, Ho, Wo)


# ---------------------------------------------------------------------------
# Pure-JAX reference (for correctness check)
# ---------------------------------------------------------------------------
def _reference(x, w_h, w_l, g_h, b_h, g_l, b_l, eps=1e-5):
    def conv(v, w):
        return jax.lax.conv_general_dilated(
            v, w, window_strides=(1, 1), padding=((1, 1), (1, 1)),
            dimension_numbers=("NCHW", "OIHW", "NCHW"))

    def bn_relu(v, g, b):
        mean = v.mean(axis=(0, 2, 3), keepdims=True)
        var = jnp.square(v - mean).mean(axis=(0, 2, 3), keepdims=True)
        vn = (v - mean) * jax.lax.rsqrt(var + eps)
        vn = vn * g.reshape(1, -1, 1, 1) + b.reshape(1, -1, 1, 1)
        return jnp.maximum(vn, 0.0)

    N, C, H, W = x.shape
    pooled = x.reshape(N, C, H // 2, 2, W // 2, 2).mean(axis=(3, 5))
    return bn_relu(conv(x, w_h), g_h, b_h), bn_relu(conv(pooled, w_l), g_l, b_l)


if __name__ == "__main__":
    key = jax.random.PRNGKey(0)
    kx, kh, kl = jax.random.split(key, 3)

    N, Cin, H, W = 2, 4, 16, 16
    out_channels, alpha = 8, 0.5
    c_l = int(alpha * out_channels)            # h2l output channels = 4
    c_h = out_channels - c_l                   # h2h output channels = 4

    x = jax.random.normal(kx, (N, Cin, H, W), dtype=jnp.float32)
    # synthetic weights in PyTorch Conv2d layout (Cout, Cin, kh, kw)
    w_h2h = 0.1 * jax.random.normal(kh, (c_h, Cin, 3, 3), dtype=jnp.float32)
    w_h2l = 0.1 * jax.random.normal(kl, (c_l, Cin, 3, 3), dtype=jnp.float32)
    gamma_h = jnp.ones((c_h,), jnp.float32)
    beta_h = jnp.zeros((c_h,), jnp.float32)
    gamma_l = jnp.ones((c_l,), jnp.float32)
    beta_l = jnp.zeros((c_l,), jnp.float32)

    x_h, x_l = jax.jit(first_octave_cbr)(
        x, w_h2h, w_h2l, gamma_h, beta_h, gamma_l, beta_l)
    jax.block_until_ready((x_h, x_l))

    assert x_h.shape == (N, c_h, H, W), x_h.shape
    assert x_l.shape == (N, c_l, H // 2, W // 2), x_l.shape
    assert x_h.dtype == jnp.float32 and x_l.dtype == jnp.float32

    r_h, r_l = _reference(x, w_h2h, w_h2l, gamma_h, beta_h, gamma_l, beta_l)
    err_h = float(jnp.max(jnp.abs(x_h - r_h)))
    err_l = float(jnp.max(jnp.abs(x_l - r_l)))
    assert err_h < 1e-4 and err_l < 1e-4, (err_h, err_l)

    print("KERNEL_OK")
</pallas_src>

<mosaic_0001>
module attributes {stable_mosaic.version = 11 : i64} {
  func.func @_octave_conv_stats_kernel(%arg0: i32, %arg1: memref<1x16x16x4xf32, #tpu.memory_space<vmem>>, %arg2: memref<4x36xf32, #tpu.memory_space<vmem>>, %arg3: memref<4x36xf32, #tpu.memory_space<vmem>>, %arg4: memref<1x4x256xf32, #tpu.memory_space<vmem>>, %arg5: memref<1x4x64xf32, #tpu.memory_space<vmem>>, %arg6: memref<4x2xf32, #tpu.memory_space<vmem>>, %arg7: memref<4x2xf32, #tpu.memory_space<vmem>>, %arg8: memref<18x18x4xf32, #tpu.memory_space<vmem>>, %arg9: memref<10x10x4xf32, #tpu.memory_space<vmem>>, %arg10: memref<256x36xf32, #tpu.memory_space<vmem>>, %arg11: memref<64x36xf32, #tpu.memory_space<vmem>>) attributes {dimension_semantics = [#tpu.dimension_semantics<arbitrary>], iteration_bounds = array<i64: 2>, scalar_prefetch = 0 : i64, scratch_operands = 4 : i64, tpu.core_type = #tpu.core_type<tc>, window_params = [{transform_indices = @transform_0, window_bounds = array<i64: 1, 16, 16, 4>}, {pipeline_mode = #tpu.pipeline_mode<synchronous>, transform_indices = @transform_1, window_bounds = array<i64: 4, 36>}, {pipeline_mode = #tpu.pipeline_mode<synchronous>, transform_indices = @transform_2, window_bounds = array<i64: 4, 36>}, {transform_indices = @transform_3, window_bounds = array<i64: 1, 4, 256>}, {transform_indices = @transform_4, window_bounds = array<i64: 1, 4, 64>}, {pipeline_mode = #tpu.pipeline_mode<synchronous>, transform_indices = @transform_5, window_bounds = array<i64: 4, 2>}, {pipeline_mode = #tpu.pipeline_mode<synchronous>, transform_indices = @transform_6, window_bounds = array<i64: 4, 2>}]} {
    %cst = arith.constant 0.000000e+00 : f32
    %0 = vector.broadcast %cst : f32 to vector<18x18x4xf32>
    %c0 = arith.constant 0 : index
    %c0_0 = arith.constant 0 : index
    %c0_1 = arith.constant 0 : index
    %1 = vector.load %arg8[%c0, %c0_0, %c0_1] : memref<18x18x4xf32, #tpu.memory_space<vmem>>, vector<18x18x4xf32>
    tpu.vector_store %arg8[%c0, %c0_0, %c0_1], %0 {strides = array<i32>} : memref<18x18x4xf32, #tpu.memory_space<vmem>>, vector<18x18x4xf32>,
    %c0_2 = arith.constant 0 : index
    %c0_3 = arith.constant 0 : index
    %c0_4 = arith.constant 0 : index
    %c0_5 = arith.constant 0 : index
    %2 = vector.load %arg1[%c0_2, %c0_3, %c0_4, %c0_5] : memref<1x16x16x4xf32, #tpu.memory_space<vmem>>, vector<1x16x16x4xf32>
    %3 = vector.shape_cast %2 : vector<1x16x16x4xf32> to vector<16x16x4xf32>
    %c1 = arith.constant 1 : index
    %c1_6 = arith.constant 1 : index
    %c0_7 = arith.constant 0 : index
    %4 = vector.load %arg8[%c1, %c1_6, %c0_7] : memref<18x18x4xf32, #tpu.memory_space<vmem>>, vector<16x16x4xf32>
    tpu.vector_store %arg8[%c1, %c1_6, %c0_7], %3 {strides = array<i32>} : memref<18x18x4xf32, #tpu.memory_space<vmem>>, vector<16x16x4xf32>,
    %c0_8 = arith.constant 0 : index
    %c0_9 = arith.constant 0 : index
    %c0_10 = arith.constant 0 : index
    %c0_11 = arith.constant 0 : index
    %5 = tpu.strided_load %arg1[%c0_8, %c0_9, %c0_10, %c0_11] {strides = array<i32: 1, 2, 2, 1>} : memref<1x16x16x4xf32, #tpu.memory_space<vmem>>, vector<1x8x8x4xf32>
    %c0_12 = arith.constant 0 : index
    %c0_13 = arith.constant 0 : index
    %c1_14 = arith.constant 1 : index
    %c0_15 = arith.constant 0 : index
    %6 = tpu.strided_load %arg1[%c0_12, %c0_13, %c1_14, %c0_15] {strides = array<i32: 1, 2, 2, 1>} : memref<1x16x16x4xf32, #tpu.memory_space<vmem>>, vector<1x8x8x4xf32>
    %7 = arith.addf %5, %6 : vector<1x8x8x4xf32>
    %c0_16 = arith.constant 0 : index
    %c1_17 = arith.constant 1 : index
    %c0_18 = arith.constant 0 : index
    %c0_19 = arith.constant 0 : index
    %8 = tpu.strided_load %arg1[%c0_16, %c1_17, %c0_18, %c0_19] {strides = array<i32: 1, 2, 2, 1>} : memref<1x16x16x4xf32, #tpu.memory_space<vmem>>, vector<1x8x8x4xf32>
    %9 = arith.addf %7, %8 : vector<1x8x8x4xf32>
    %c0_20 = arith.constant 0 : index
    %c1_21 = arith.constant 1 : index
    %c1_22 = arith.constant 1 : index
    %c0_23 = arith.constant 0 : index
    %10 = tpu.strided_load %arg1[%c0_20, %c1_21, %c1_22, %c0_23] {strides = array<i32: 1, 2, 2, 1>} : memref<1x16x16x4xf32, #tpu.memory_space<vmem>>, vector<1x8x8x4xf32>
    %11 = arith.addf %9, %10 : vector<1x8x8x4xf32>
    %cst_24 = arith.constant 2.500000e-01 : f32
    %12 = vector.broadcast %cst_24 : f32 to vector<1x8x8x4xf32>
    %13 = arith.mulf %11, %12 : vector<1x8x8x4xf32>
    %cst_25 = arith.constant 0.000000e+00 : f32
    %14 = vector.broadcast %cst_25 : f32 to vector<10x10x4xf32>
    %c0_26 = arith.constant 0 : index
    %c0_27 = arith.constant 0 : index
    %c0_28 = arith.constant 0 : index
    %15 = vector.load %arg9[%c0_26, %c0_27, %c0_28] : memref<10x10x4xf32, #tpu.memory_space<vmem>>, vector<10x10x4xf32>
    tpu.vector_store %arg9[%c0_26, %c0_27, %c0_28], %14 {strides = array<i32>} : memref<10x10x4xf32, #tpu.memory_space<vmem>>, vector<10x10x4xf32>,
    %16 = vector.shape_cast %13 : vector<1x8x8x4xf32> to vector<8x8x4xf32>
    %c1_29 = arith.constant 1 : index
    %c1_30 = arith.constant 1 : index
    %c0_31 = arith.constant 0 : index
    %17 = vector.load %arg9[%c1_29, %c1_30, %c0_31] : memref<10x10x4xf32, #tpu.memory_space<vmem>>, vector<8x8x4xf32>
    tpu.vector_store %arg9[%c1_29, %c1_30, %c0_31], %16 {strides = array<i32>} : memref<10x10x4xf32, #tpu.memory_space<vmem>>, vector<8x8x4xf32>,
    %c0_32 = arith.constant 0 : index
    %c0_33 = arith.constant 0 : index
    %c0_34 = arith.constant 0 : index
    %18 = vector.load %arg8[%c0_32, %c0_33, %c0_34] : memref<18x18x4xf32, #tpu.memory_space<vmem>>, vector<16x16x4xf32>
    %19 = vector.shape_cast %18 : vector<16x16x4xf32> to vector<256x4xf32>
    %c0_35 = arith.constant 0 : index
    %c0_36 = arith.constant 0 : index
    %20 = vector.load %arg10[%c0_35, %c0_36] : memref<256x36xf32, #tpu.memory_space<vmem>>, vector<256x4xf32>
    tpu.vector_store %arg10[%c0_35, %c0_36], %19 {strides = array<i32>} : memref<256x36xf32, #tpu.memory_space<vmem>>, vector<256x4xf32>,
    %c0_37 = arith.constant 0 : index
    %c0_38 = arith.constant 0 : index
    %c0_39 = arith.constant 0 : index
    %21 = vector.load %arg9[%c0_37, %c0_38, %c0_39] : memref<10x10x4xf32, #tpu.memory_space<vmem>>, vector<8x8x4xf32>
    %22 = vector.shape_cast %21 : vector<8x8x4xf32> to vector<64x4xf32>
    %c0_40 = arith.constant 0 : index
    %c0_41 = arith.constant 0 : index
    %23 = vector.load %arg11[%c0_40, %c0_41] : memref<64x36xf32, #tpu.memory_space<vmem>>, vector<64x4xf32>
    tpu.vector_store %arg11[%c0_40, %c0_41], %22 {strides = array<i32>} : memref<64x36xf32, #tpu.memory_space<vmem>>, vector<64x4xf32>,
    %c0_42 = arith.constant 0 : index
    %c1_43 = arith.constant 1 : index
    %c0_44 = arith.constant 0 : index
    %24 = vector.load %arg8[%c0_42, %c1_43, %c0_44] : memref<18x18x4xf32, #tpu.memory_space<vmem>>, vector<16x16x4xf32>
    %25 = vector.shape_cast %24 : vector<16x16x4xf32> to vector<256x4xf32>
    %c0_45 = arith.constant 0 : index
    %c4 = arith.constant 4 : index
    %26 = vector.load %arg10[%c0_45, %c4] : memref<256x36xf32, #tpu.memory_space<vmem>>, vector<256x4xf32>
    tpu.vector_store %arg10[%c0_45, %c4], %25 {strides = array<i32>} : memref<256x36xf32, #tpu.memory_space<vmem>>, vector<256x4xf32>,
    %c0_46 = arith.constant 0 : index
    %c1_47 = arith.constant 1 : index
    %c0_48 = arith.constant 0 : index
    %27 = vector.load %arg9[%c0_46, %c1_47, %c0_48] : memref<10x10x4xf32, #tpu.memory_space<vmem>>, vector<8x8x4xf32>
    %28 = vector.shape_cast %27 : vector<8x8x4xf32> to vector<64x4xf32>
    %c0_49 = arith.constant 0 : index
    %c4_50 = arith.constant 4 : index
    %29 = vector.load %arg11[%c0_49, %c4_50] : memref<64x36xf32, #tpu.memory_space<vmem>>, vector<64x4xf32>
    tpu.vector_store %arg11[%c0_49, %c4_50], %28 {strides = array<i32>} : memref<64x36xf32, #tpu.memory_space<vmem>>, vector<64x4xf32>,
    %c0_51 = arith.constant 0 : index
    %c2 = arith.constant 2 : index
    %c0_52 = arith.constant 0 : index
    %30 = vector.load %arg8[%c0_51, %c2, %c0_52] : memref<18x18x4xf32, #tpu.memory_space<vmem>>, vector<16x16x4xf32>
    %31 = vector.shape_cast %30 : vector<16x16x4xf32> to vector<256x4xf32>
    %c0_53 = arith.constant 0 : index
    %c8 = arith.constant 8 : index
    %32 = vector.load %arg10[%c0_53, %c8] : memref<256x36xf32, #tpu.memory_space<vmem>>, vector<256x4xf32>
    tpu.vector_store %arg10[%c0_53, %c8], %31 {strides = array<i32>} : memref<256x36xf32, #tpu.memory_space<vmem>>, vector<256x4xf32>,
    %c0_54 = arith.constant 0 : index
    %c2_55 = arith.constant 2 : index
    %c0_56 = arith.constant 0 : index
    %33 = vector.load %arg9[%c0_54, %c2_55, %c0_56] : memref<10x10x4xf32, #tpu.memory_space<vmem>>, vector<8x8x4xf32>
    %34 = vector.shape_cast %33 : vector<8x8x4xf32> to vector<64x4xf32>
    %c0_57 = arith.constant 0 : index
    %c8_58 = arith.constant 8 : index
    %35 = vector.load %arg11[%c0_57, %c8_58] : memref<64x36xf32, #tpu.memory_space<vmem>>, vector<64x4xf32>
    tpu.vector_store %arg11[%c0_57, %c8_58], %34 {strides = array<i32>} : memref<64x36xf32, #tpu.memory_space<vmem>>, vector<64x4xf32>,
    %c1_59 = arith.constant 1 : index
    %c0_60 = arith.constant 0 : index
    %c0_61 = arith.constant 0 : index
    %36 = vector.load %arg8[%c1_59, %c0_60, %c0_61] : memref<18x18x4xf32, #tpu.memory_space<vmem>>, vector<16x16x4xf32>
    %37 = vector.shape_cast %36 : vector<16x16x4xf32> to vector<256x4xf32>
    %c0_62 = arith.constant 0 : index
    %c12 = arith.constant 12 : index
    %38 = vector.load %arg10[%c0_62, %c12] : memref<256x36xf32, #tpu.memory_space<vmem>>, vector<256x4xf32>
    tpu.vector_store %arg10[%c0_62, %c12], %37 {strides = array<i32>} : memref<256x36xf32, #tpu.memory_space<vmem>>, vector<256x4xf32>,
    %c1_63 = arith.constant 1 : index
    %c0_64 = arith.constant 0 : index
    %c0_65 = arith.constant 0 : index
    %39 = vector.load %arg9[%c1_63, %c0_64, %c0_65] : memref<10x10x4xf32, #tpu.memory_space<vmem>>, vector<8x8x4xf32>
    %40 = vector.shape_cast %39 : vector<8x8x4xf32> to vector<64x4xf32>
    %c0_66 = arith.constant 0 : index
    %c12_67 = arith.constant 12 : index
    %41 = vector.load %arg11[%c0_66, %c12_67] : memref<64x36xf32, #tpu.memory_space<vmem>>, vector<64x4xf32>
    tpu.vector_store %arg11[%c0_66, %c12_67], %40 {strides = array<i32>} : memref<64x36xf32, #tpu.memory_space<vmem>>, vector<64x4xf32>,
    %c1_68 = arith.constant 1 : index
    %c1_69 = arith.constant 1 : index
    %c0_70 = arith.constant 0 : index
    %42 = vector.load %arg8[%c1_68, %c1_69, %c0_70] : memref<18x18x4xf32, #tpu.memory_space<vmem>>, vector<16x16x4xf32>
    %43 = vector.shape_cast %42 : vector<16x16x4xf32> to vector<256x4xf32>
    %c0_71 = arith.constant 0 : index
    %c16 = arith.constant 16 : index
    %44 = vector.load %arg10[%c0_71, %c16] : memref<256x36xf32, #tpu.memory_space<vmem>>, vector<256x4xf32>
    tpu.vector_store %arg10[%c0_71, %c16], %43 {strides = array<i32>} : memref<256x36xf32, #tpu.memory_space<vmem>>, vector<256x4xf32>,
    %c1_72 = arith.constant 1 : index
    %c1_73 = arith.constant 1 : index
    %c0_74 = arith.constant 0 : index
    %45 = vector.load %arg9[%c1_72, %c1_73, %c0_74] : memref<10x10x4xf32, #tpu.memory_space<vmem>>, vector<8x8x4xf32>
    %46 = vector.shape_cast %45 : vector<8x8x4xf32> to vector<64x4xf32>
    %c0_75 = arith.constant 0 : index
    %c16_76 = arith.constant 16 : index
    %47 = vector.load %arg11[%c0_75, %c16_76] : memref<64x36xf32, #tpu.memory_space<vmem>>, vector<64x4xf32>
    tpu.vector_store %arg11[%c0_75, %c16_76], %46 {strides = array<i32>} : memref<64x36xf32, #tpu.memory_space<vmem>>, vector<64x4xf32>,
    %c1_77 = arith.constant 1 : index
    %c2_78 = arith.constant 2 : index
    %c0_79 = arith.constant 0 : index
    %48 = vector.load %arg8[%c1_77, %c2_78, %c0_79] : memref<18x18x4xf32, #tpu.memory_space<vmem>>, vector<16x16x4xf32>
    %49 = vector.shape_cast %48 : vector<16x16x4xf32> to vector<256x4xf32>
    %c0_80 = arith.constant 0 : index
    %c20 = arith.constant 20 : index
    %50 = vector.load %arg10[%c0_80, %c20] : memref<256x36xf32, #tpu.memory_space<vmem>>, vector<256x4xf32>
    tpu.vector_store %arg10[%c0_80, %c20], %49 {strides = array<i32>} : memref<256x36xf32, #tpu.memory_space<vmem>>, vector<256x4xf32>,
    %c1_81 = arith.constant 1 : index
    %c2_82 = arith.constant 2 : index
    %c0_83 = arith.constant 0 : index
    %51 = vector.load %arg9[%c1_81, %c2_82, %c0_83] : memref<10x10x4xf32, #tpu.memory_space<vmem>>, vector<8x8x4xf32>
    %52 = vector.shape_cast %51 : vector<8x8x4xf32> to vector<64x4xf32>
    %c0_84 = arith.constant 0 : index
    %c20_85 = arith.constant 20 : index
    %53 = vector.load %arg11[%c0_84, %c20_85] : memref<64x36xf32, #tpu.memory_space<vmem>>, vector<64x4xf32>
    tpu.vector_store %arg11[%c0_84, %c20_85], %52 {strides = array<i32>} : memref<64x36xf32, #tpu.memory_space<vmem>>, vector<64x4xf32>,
    %c2_86 = arith.constant 2 : index
    %c0_87 = arith.constant 0 : index
    %c0_88 = arith.constant 0 : index
    %54 = vector.load %arg8[%c2_86, %c0_87, %c0_88] : memref<18x18x4xf32, #tpu.memory_space<vmem>>, vector<16x16x4xf32>
    %55 = vector.shape_cast %54 : vector<16x16x4xf32> to vector<256x4xf32>
    %c0_89 = arith.constant 0 : index
    %c24 = arith.constant 24 : index
    %56 = vector.load %arg10[%c0_89, %c24] : memref<256x36xf32, #tpu.memory_space<vmem>>, vector<256x4xf32>
    tpu.vector_store %arg10[%c0_89, %c24], %55 {strides = array<i32>} : memref<256x36xf32, #tpu.memory_space<vmem>>, vector<256x4xf32>,
    %c2_90 = arith.constant 2 : index
    %c0_91 = arith.constant 0 : index
    %c0_92 = arith.constant 0 : index
    %57 = vector.load %arg9[%c2_90, %c0_91, %c0_92] : memref<10x10x4xf32, #tpu.memory_space<vmem>>, vector<8x8x4xf32>
    %58 = vector.shape_cast %57 : vector<8x8x4xf32> to vector<64x4xf32>
    %c0_93 = arith.constant 0 : index
    %c24_94 = arith.constant 24 : index
    %59 = vector.load %arg11[%c0_93, %c24_94] : memref<64x36xf32, #tpu.memory_space<vmem>>, vector<64x4xf32>
    tpu.vector_store %arg11[%c0_93, %c24_94], %58 {strides = array<i32>} : memref<64x36xf32, #tpu.memory_space<vmem>>, vector<64x4xf32>,
    %c2_95 = arith.constant 2 : index
    %c1_96 = arith.constant 1 : index
    %c0_97 = arith.constant 0 : index
    %60 = vector.load %arg8[%c2_95, %c1_96, %c0_97] : memref<18x18x4xf32, #tpu.memory_space<vmem>>, vector<16x16x4xf32>
    %61 = vector.shape_cast %60 : vector<16x16x4xf32> to vector<256x4xf32>
    %c0_98 = arith.constant 0 : index
    %c28 = arith.constant 28 : index
    %62 = vector.load %arg10[%c0_98, %c28] : memref<256x36xf32, #tpu.memory_space<vmem>>, vector<256x4xf32>
    tpu.vector_store %arg10[%c0_98, %c28], %61 {strides = array<i32>} : memref<256x36xf32, #tpu.memory_space<vmem>>, vector<256x4xf32>,
    %c2_99 = arith.constant 2 : index
    %c1_100 = arith.constant 1 : index
    %c0_101 = arith.constant 0 : index
    %63 = vector.load %arg9[%c2_99, %c1_100, %c0_101] : memref<10x10x4xf32, #tpu.memory_space<vmem>>, vector<8x8x4xf32>
    %64 = vector.shape_cast %63 : vector<8x8x4xf32> to vector<64x4xf32>
    %c0_102 = arith.constant 0 : index
    %c28_103 = arith.constant 28 : index
    %65 = vector.load %arg11[%c0_102, %c28_103] : memref<64x36xf32, #tpu.memory_space<vmem>>, vector<64x4xf32>
    tpu.vector_store %arg11[%c0_102, %c28_103], %64 {strides = array<i32>} : memref<64x36xf32, #tpu.memory_space<vmem>>, vector<64x4xf32>,
    %c2_104 = arith.constant 2 : index
    %c2_105 = arith.constant 2 : index
    %c0_106 = arith.constant 0 : index
    %66 = vector.load %arg8[%c2_104, %c2_105, %c0_106] : memref<18x18x4xf32, #tpu.memory_space<vmem>>, vector<16x16x4xf32>
    %67 = vector.shape_cast %66 : vector<16x16x4xf32> to vector<256x4xf32>
    %c0_107 = arith.constant 0 : index
    %c32 = arith.constant 32 : index
    %68 = vector.load %arg10[%c0_107, %c32] : memref<256x36xf32, #tpu.memory_space<vmem>>, vector<256x4xf32>
    tpu.vector_store %arg10[%c0_107, %c32], %67 {strides = array<i32>} : memref<256x36xf32, #tpu.memory_space<vmem>>, vector<256x4xf32>,
    %c2_108 = arith.constant 2 : index
    %c2_109 = arith.constant 2 : index
    %c0_110 = arith.constant 0 : index
    %69 = vector.load %arg9[%c2_108, %c2_109, %c0_110] : memref<10x10x4xf32, #tpu.memory_space<vmem>>, vector<8x8x4xf32>
    %70 = vector.shape_cast %69 : vector<8x8x4xf32> to vector<64x4xf32>
    %c0_111 = arith.constant 0 : index
    %c32_112 = arith.constant 32 : index
    %71 = vector.load %arg11[%c0_111, %c32_112] : memref<64x36xf32, #tpu.memory_space<vmem>>, vector<64x4xf32>
    tpu.vector_store %arg11[%c0_111, %c32_112], %70 {strides = array<i32>} : memref<64x36xf32, #tpu.memory_space<vmem>>, vector<64x4xf32>,
    %c0_113 = arith.constant 0 : index
    %c0_114 = arith.constant 0 : index
    %72 = vector.load %arg2[%c0_113, %c0_114] : memref<4x36xf32, #tpu.memory_space<vmem>>, vector<4x36xf32>
    %c0_115 = arith.constant 0 : index
    %c0_116 = arith.constant 0 : index
    %73 = vector.load %arg10[%c0_115, %c0_116] : memref<256x36xf32, #tpu.memory_space<vmem>>, vector<256x36xf32>
    %cst_117 = arith.constant dense<0.000000e+00> : vector<4x256xf32>
    %74 = tpu.matmul %72, %73, %cst_117 {dimension_numbers = #tpu.dot_dimension_numbers<[1], [1], [0], [0], [0, 0, 1, 0], [], []>} : vector<4x36xf32>, vector<256x36xf32>, vector<4x256xf32> -> vector<4x256xf32>
    %c0_118 = arith.constant 0 : index
    %c0_119 = arith.constant 0 : index
    %75 = vector.load %arg3[%c0_118, %c0_119] : memref<4x36xf32, #tpu.memory_space<vmem>>, vector<4x36xf32>
    %c0_120 = arith.constant 0 : index
    %c0_121 = arith.constant 0 : index
    %76 = vector.load %arg11[%c0_120, %c0_121] : memref<64x36xf32, #tpu.memory_space<vmem>>, vector<64x36xf32>
    %cst_122 = arith.constant dense<0.000000e+00> : vector<4x64xf32>
    %77 = tpu.matmul %75, %76, %cst_122 {dimension_numbers = #tpu.dot_dimension_numbers<[1], [1], [0], [0], [0, 0, 1, 0], [], []>} : vector<4x36xf32>, vector<64x36xf32>, vector<4x64xf32> -> vector<4x64xf32>
    %c0_123 = arith.constant 0 : index
    %c0_124 = arith.constant 0 : index
    %c0_125 = arith.constant 0 : index
    %78 = vector.load %arg4[%c0_123, %c0_124, %c0_125] : memref<1x4x256xf32, #tpu.memory_space<vmem>>, vector<1x4x256xf32>
    %79 = vector.shape_cast %78 : vector<1x4x256xf32> to vector<4x256xf32>
    %80 = vector.shape_cast %74 : vector<4x256xf32> to vector<1x4x256xf32>
    tpu.vector_store %arg4[%c0_123, %c0_124, %c0_125], %80 {strides = array<i32>} : memref<1x4x256xf32, #tpu.memory_space<vmem>>, vector<1x4x256xf32>,
    %c0_126 = arith.constant 0 : index
    %c0_127 = arith.constant 0 : index
    %c0_128 = arith.constant 0 : index
    %81 = vector.load %arg5[%c0_126, %c0_127, %c0_128] : memref<1x4x64xf32, #tpu.memory_space<vmem>>, vector<1x4x64xf32>
    %82 = vector.shape_cast %81 : vector<1x4x64xf32> to vector<4x64xf32>
    %83 = vector.shape_cast %77 : vector<4x64xf32> to vector<1x4x64xf32>
    tpu.vector_store %arg5[%c0_126, %c0_127, %c0_128], %83 {strides = array<i32>} : memref<1x4x64xf32, #tpu.memory_space<vmem>>, vector<1x4x64xf32>,
    %c0_i32 = arith.constant 0 : i32
    %84 = arith.cmpi eq, %arg0, %c0_i32 : i32
    %85 = arith.extui %84 : i1 to i32
    %c0_i32_129 = arith.constant 0 : i32
    %86 = arith.cmpi ne, %85, %c0_i32_129 : i32
    scf.if %86 {
      %cst_150 = arith.constant 0.000000e+00 : f32
      %109 = vector.broadcast %cst_150 : f32 to vector<4x2xf32>
      %c0_151 = arith.constant 0 : index
      %c0_152 = arith.constant 0 : index
      %110 = vector.load %arg6[%c0_151, %c0_152] : memref<4x2xf32, #tpu.memory_space<vmem>>, vector<4x2xf32>
      tpu.vector_store %arg6[%c0_151, %c0_152], %109 {strides = array<i32>} : memref<4x2xf32, #tpu.memory_space<vmem>>, vector<4x2xf32>,
      %cst_153 = arith.constant 0.000000e+00 : f32
      %111 = vector.broadcast %cst_153 : f32 to vector<4x2xf32>
      %c0_154 = arith.constant 0 : index
      %c0_155 = arith.constant 0 : index
      %112 = vector.load %arg7[%c0_154, %c0_155] : memref<4x2xf32, #tpu.memory_space<vmem>>, vector<4x2xf32>
      tpu.vector_store %arg7[%c0_154, %c0_155], %111 {strides = array<i32>} : memref<4x2xf32, #tpu.memory_space<vmem>>, vector<4x2xf32>,
    } else {
    }
    %c0_130 = arith.constant 0 : index
    %c0_131 = arith.constant 0 : index
    %87 = vector.load %arg6[%c0_130, %c0_131] : memref<4x2xf32, #tpu.memory_space<vmem>>, vector<4x1xf32>
    %cst_132 = arith.constant dense<0.000000e+00> : vector<4xf32>
    %88 = vector.multi_reduction <add>, %74, %cst_132 [1] : vector<4x256xf32> to vector<4xf32>
    %89 = vector.shape_cast %88 : vector<4xf32> to vector<4x1xf32>
    %90 = arith.addf %87, %89 : vector<4x1xf32>
    %c0_133 = arith.constant 0 : index
    %c0_134 = arith.constant 0 : index
    %91 = vector.load %arg6[%c0_133, %c0_134] : memref<4x2xf32, #tpu.memory_space<vmem>>, vector<4x1xf32>
    tpu.vector_store %arg6[%c0_133, %c0_134], %90 {strides = array<i32>} : memref<4x2xf32, #tpu.memory_space<vmem>>, vector<4x1xf32>,
    %c0_135 = arith.constant 0 : index
    %c1_136 = arith.constant 1 : index
    %92 = vector.load %arg6[%c0_135, %c1_136] : memref<4x2xf32, #tpu.memory_space<vmem>>, vector<4x1xf32>
    %93 = arith.mulf %74, %74 : vector<4x256xf32>
    %cst_137 = arith.constant dense<0.000000e+00> : vector<4xf32>
    %94 = vector.multi_reduction <add>, %93, %cst_137 [1] : vector<4x256xf32> to vector<4xf32>
    %95 = vector.shape_cast %94 : vector<4xf32> to vector<4x1xf32>
    %96 = arith.addf %92, %95 : vector<4x1xf32>
    %c0_138 = arith.constant 0 : index
    %c1_139 = arith.constant 1 : index
    %97 = vector.load %arg6[%c0_138, %c1_139] : memref<4x2xf32, #tpu.memory_space<vmem>>, vector<4x1xf32>
    tpu.vector_store %arg6[%c0_138, %c1_139], %96 {strides = array<i32>} : memref<4x2xf32, #tpu.memory_space<vmem>>, vector<4x1xf32>,
    %c0_140 = arith.constant 0 : index
    %c0_141 = arith.constant 0 : index
    %98 = vector.load %arg7[%c0_140, %c0_141] : memref<4x2xf32, #tpu.memory_space<vmem>>, vector<4x1xf32>
    %cst_142 = arith.constant dense<0.000000e+00> : vector<4xf32>
    %99 = vector.multi_reduction <add>, %77, %cst_142 [1] : vector<4x64xf32> to vector<4xf32>
    %100 = vector.shape_cast %99 : vector<4xf32> to vector<4x1xf32>
    %101 = arith.addf %98, %100 : vector<4x1xf32>
    %c0_143 = arith.constant 0 : index
    %c0_144 = arith.constant 0 : index
    %102 = vector.load %arg7[%c0_143, %c0_144] : memref<4x2xf32, #tpu.memory_space<vmem>>, vector<4x1xf32>
    tpu.vector_store %arg7[%c0_143, %c0_144], %101 {strides = array<i32>} : memref<4x2xf32, #tpu.memory_space<vmem>>, vector<4x1xf32>,
    %c0_145 = arith.constant 0 : index
    %c1_146 = arith.constant 1 : index
    %103 = vector.load %arg7[%c0_145, %c1_146] : memref<4x2xf32, #tpu.memory_space<vmem>>, vector<4x1xf32>
    %104 = arith.mulf %77, %77 : vector<4x64xf32>
    %cst_147 = arith.constant dense<0.000000e+00> : vector<4xf32>
    %105 = vector.multi_reduction <add>, %104, %cst_147 [1] : vector<4x64xf32> to vector<4xf32>
    %106 = vector.shape_cast %105 : vector<4xf32> to vector<4x1xf32>
    %107 = arith.addf %103, %106 : vector<4x1xf32>
    %c0_148 = arith.constant 0 : index
    %c1_149 = arith.constant 1 : index
    %108 = vector.load %arg7[%c0_148, %c1_149] : memref<4x2xf32, #tpu.memory_space<vmem>>, vector<4x1xf32>
    tpu.vector_store %arg7[%c0_148, %c1_149], %107 {strides = array<i32>} : memref<4x2xf32, #tpu.memory_space<vmem>>, vector<4x1xf32>,
    return
  }
  func.func @transform_0(%arg0: i32) -> (i32, i32, i32, i32) {
    %c0_i32 = arith.constant 0 : i32
    %c0_i32_0 = arith.constant 0 : i32
    %c0_i32_1 = arith.constant 0 : i32
    %c0_i32_2 = arith.constant 0 : i32
    return %arg0, %c0_i32, %c0_i32_0, %c0_i32_1 : i32, i32, i32, i32
  }
  func.func @transform_1(%arg0: i32) -> (i32, i32) {
    %c0_i32 = arith.constant 0 : i32
    %c0_i32_0 = arith.constant 0 : i32
    %c0_i32_1 = arith.constant 0 : i32
    return %c0_i32, %c0_i32_0 : i32, i32
  }
  func.func @transform_2(%arg0: i32) -> (i32, i32) {
    %c0_i32 = arith.constant 0 : i32
    %c0_i32_0 = arith.constant 0 : i32
    %c0_i32_1 = arith.constant 0 : i32
    return %c0_i32, %c0_i32_0 : i32, i32
  }
  func.func @transform_3(%arg0: i32) -> (i32, i32, i32) {
    %c0_i32 = arith.constant 0 : i32
    %c0_i32_0 = arith.constant 0 : i32
    %c0_i32_1 = arith.constant 0 : i32
    return %arg0, %c0_i32, %c0_i32_0 : i32, i32, i32
  }
  func.func @transform_4(%arg0: i32) -> (i32, i32, i32) {
    %c0_i32 = arith.constant 0 : i32
    %c0_i32_0 = arith.constant 0 : i32
    %c0_i32_1 = arith.constant 0 : i32
    return %arg0, %c0_i32, %c0_i32_0 : i32, i32, i32
  }
  func.func @transform_5(%arg0: i32) -> (i32, i32) {
    %c0_i32 = arith.constant 0 : i32
    %c0_i32_0 = arith.constant 0 : i32
    %c0_i32_1 = arith.constant 0 : i32
    return %c0_i32, %c0_i32_0 : i32, i32
  }
  func.func @transform_6(%arg0: i32) -> (i32, i32) {
    %c0_i32 = arith.constant 0 : i32
    %c0_i32_0 = arith.constant 0 : i32
    %c0_i32_1 = arith.constant 0 : i32
    return %c0_i32, %c0_i32_0 : i32, i32
  }
}

module attributes {stable_mosaic.version = 11 : i64} {
  func.func @_bn_relu_kernel(%arg0: i32, %arg1: memref<1x4x256xf32, #tpu.memory_space<vmem>>, %arg2: memref<1x4x64xf32, #tpu.memory_space<vmem>>, %arg3: memref<4x2xf32, #tpu.memory_space<vmem>>, %arg4: memref<4x2xf32, #tpu.memory_space<vmem>>, %arg5: memref<4x1xf32, #tpu.memory_space<vmem>>, %arg6: memref<4x1xf32, #tpu.memory_space<vmem>>, %arg7: memref<4x1xf32, #tpu.memory_space<vmem>>, %arg8: memref<4x1xf32, #tpu.memory_space<vmem>>, %arg9: memref<1x4x256xf32, #tpu.memory_space<vmem>>, %arg10: memref<1x4x64xf32, #tpu.memory_space<vmem>>) attributes {dimension_semantics = [#tpu.dimension_semantics<parallel>], iteration_bounds = array<i64: 2>, scalar_prefetch = 0 : i64, scratch_operands = 0 : i64, tpu.core_type = #tpu.core_type<tc>, window_params = [{transform_indices = @transform_0, window_bounds = array<i64: 1, 4, 256>}, {transform_indices = @transform_1, window_bounds = array<i64: 1, 4, 64>}, {pipeline_mode = #tpu.pipeline_mode<synchronous>, transform_indices = @transform_2, window_bounds = array<i64: 4, 2>}, {pipeline_mode = #tpu.pipeline_mode<synchronous>, transform_indices = @transform_3, window_bounds = array<i64: 4, 2>}, {pipeline_mode = #tpu.pipeline_mode<synchronous>, transform_indices = @transform_4, window_bounds = array<i64: 4, 1>}, {pipeline_mode = #tpu.pipeline_mode<synchronous>, transform_indices = @transform_5, window_bounds = array<i64: 4, 1>}, {pipeline_mode = #tpu.pipeline_mode<synchronous>, transform_indices = @transform_6, window_bounds = array<i64: 4, 1>}, {pipeline_mode = #tpu.pipeline_mode<synchronous>, transform_indices = @transform_7, window_bounds = array<i64: 4, 1>}, {transform_indices = @transform_8, window_bounds = array<i64: 1, 4, 256>}, {transform_indices = @transform_9, window_bounds = array<i64: 1, 4, 64>}]} {
    %c0 = arith.constant 0 : index
    %c0_0 = arith.constant 0 : index
    %c0_1 = arith.constant 0 : index
    %0 = vector.load %arg1[%c0, %c0_0, %c0_1] : memref<1x4x256xf32, #tpu.memory_space<vmem>>, vector<1x4x256xf32>
    %1 = vector.shape_cast %0 : vector<1x4x256xf32> to vector<4x256xf32>
    %c0_2 = arith.constant 0 : index
    %c0_3 = arith.constant 0 : index
    %2 = vector.load %arg3[%c0_2, %c0_3] : memref<4x2xf32, #tpu.memory_space<vmem>>, vector<4x1xf32>
    %cst = arith.constant 0.001953125 : f32
    %3 = vector.broadcast %cst : f32 to vector<4x1xf32>
    %4 = arith.mulf %2, %3 : vector<4x1xf32>
    %c0_4 = arith.constant 0 : index
    %c1 = arith.constant 1 : index
    %5 = vector.load %arg3[%c0_4, %c1] : memref<4x2xf32, #tpu.memory_space<vmem>>, vector<4x1xf32>
    %cst_5 = arith.constant 0.001953125 : f32
    %6 = vector.broadcast %cst_5 : f32 to vector<4x1xf32>
    %7 = arith.mulf %5, %6 : vector<4x1xf32>
    %8 = arith.mulf %4, %4 : vector<4x1xf32>
    %9 = arith.subf %7, %8 : vector<4x1xf32>
    %c0_6 = arith.constant 0 : index
    %c0_7 = arith.constant 0 : index
    %10 = vector.load %arg5[%c0_6, %c0_7] : memref<4x1xf32, #tpu.memory_space<vmem>>, vector<4x1xf32>
    %cst_8 = arith.constant 9.99999974E-6 : f32
    %11 = vector.broadcast %cst_8 : f32 to vector<4x1xf32>
    %12 = arith.addf %9, %11 : vector<4x1xf32>
    %13 = math.rsqrt %12 : vector<4x1xf32>
    %14 = arith.mulf %10, %13 : vector<4x1xf32>
    %c0_9 = arith.constant 0 : index
    %c0_10 = arith.constant 0 : index
    %15 = vector.load %arg6[%c0_9, %c0_10] : memref<4x1xf32, #tpu.memory_space<vmem>>, vector<4x1xf32>
    %16 = arith.mulf %4, %14 : vector<4x1xf32>
    %17 = arith.subf %15, %16 : vector<4x1xf32>
    %18 = vector.broadcast %14 : vector<4x1xf32> to vector<4x256xf32>
    %19 = arith.mulf %1, %18 : vector<4x256xf32>
    %20 = vector.broadcast %17 : vector<4x1xf32> to vector<4x256xf32>
    %21 = arith.addf %19, %20 : vector<4x256xf32>
    %cst_11 = arith.constant 0.000000e+00 : f32
    %22 = vector.broadcast %cst_11 : f32 to vector<4x256xf32>
    %23 = arith.maximumf %21, %22 : vector<4x256xf32>
    %c0_12 = arith.constant 0 : index
    %c0_13 = arith.constant 0 : index
    %c0_14 = arith.constant 0 : index
    %24 = vector.load %arg9[%c0_12, %c0_13, %c0_14] : memref<1x4x256xf32, #tpu.memory_space<vmem>>, vector<1x4x256xf32>
    %25 = vector.shape_cast %24 : vector<1x4x256xf32> to vector<4x256xf32>
    %26 = vector.shape_cast %23 : vector<4x256xf32> to vector<1x4x256xf32>
    tpu.vector_store %arg9[%c0_12, %c0_13, %c0_14], %26 {strides = array<i32>} : memref<1x4x256xf32, #tpu.memory_space<vmem>>, vector<1x4x256xf32>,
    %c0_15 = arith.constant 0 : index
    %c0_16 = arith.constant 0 : index
    %c0_17 = arith.constant 0 : index
    %27 = vector.load %arg2[%c0_15, %c0_16, %c0_17] : memref<1x4x64xf32, #tpu.memory_space<vmem>>, vector<1x4x64xf32>
    %28 = vector.shape_cast %27 : vector<1x4x64xf32> to vector<4x64xf32>
    %c0_18 = arith.constant 0 : index
    %c0_19 = arith.constant 0 : index
    %29 = vector.load %arg4[%c0_18, %c0_19] : memref<4x2xf32, #tpu.memory_space<vmem>>, vector<4x1xf32>
    %cst_20 = arith.constant 7.812500e-03 : f32
    %30 = vector.broadcast %cst_20 : f32 to vector<4x1xf32>
    %31 = arith.mulf %29, %30 : vector<4x1xf32>
    %c0_21 = arith.constant 0 : index
    %c1_22 = arith.constant 1 : index
    %32 = vector.load %arg4[%c0_21, %c1_22] : memref<4x2xf32, #tpu.memory_space<vmem>>, vector<4x1xf32>
    %cst_23 = arith.constant 7.812500e-03 : f32
    %33 = vector.broadcast %cst_23 : f32 to vector<4x1xf32>
    %34 = arith.mulf %32, %33 : vector<4x1xf32>
    %35 = arith.mulf %31, %31 : vector<4x1xf32>
    %36 = arith.subf %34, %35 : vector<4x1xf32>
    %c0_24 = arith.constant 0 : index
    %c0_25 = arith.constant 0 : index
    %37 = vector.load %arg7[%c0_24, %c0_25] : memref<4x1xf32, #tpu.memory_space<vmem>>, vector<4x1xf32>
    %cst_26 = arith.constant 9.99999974E-6 : f32
    %38 = vector.broadcast %cst_26 : f32 to vector<4x1xf32>
    %39 = arith.addf %36, %38 : vector<4x1xf32>
    %40 = math.rsqrt %39 : vector<4x1xf32>
    %41 = arith.mulf %37, %40 : vector<4x1xf32>
    %c0_27 = arith.constant 0 : index
    %c0_28 = arith.constant 0 : index
    %42 = vector.load %arg8[%c0_27, %c0_28] : memref<4x1xf32, #tpu.memory_space<vmem>>, vector<4x1xf32>
    %43 = arith.mulf %31, %41 : vector<4x1xf32>
    %44 = arith.subf %42, %43 : vector<4x1xf32>
    %45 = vector.broadcast %41 : vector<4x1xf32> to vector<4x64xf32>
    %46 = arith.mulf %28, %45 : vector<4x64xf32>
    %47 = vector.broadcast %44 : vector<4x1xf32> to vector<4x64xf32>
    %48 = arith.addf %46, %47 : vector<4x64xf32>
    %cst_29 = arith.constant 0.000000e+00 : f32
    %49 = vector.broadcast %cst_29 : f32 to vector<4x64xf32>
    %50 = arith.maximumf %48, %49 : vector<4x64xf32>
    %c0_30 = arith.constant 0 : index
    %c0_31 = arith.constant 0 : index
    %c0_32 = arith.constant 0 : index
    %51 = vector.load %arg10[%c0_30, %c0_31, %c0_32] : memref<1x4x64xf32, #tpu.memory_space<vmem>>, vector<1x4x64xf32>
    %52 = vector.shape_cast %51 : vector<1x4x64xf32> to vector<4x64xf32>
    %53 = vector.shape_cast %50 : vector<4x64xf32> to vector<1x4x64xf32>
    tpu.vector_store %arg10[%c0_30, %c0_31, %c0_32], %53 {strides = array<i32>} : memref<1x4x64xf32, #tpu.memory_space<vmem>>, vector<1x4x64xf32>,
    return
  }
  func.func @transform_0(%arg0: i32) -> (i32, i32, i32) {
    %c0_i32 = arith.constant 0 : i32
    %c0_i32_0 = arith.constant 0 : i32
    %c0_i32_1 = arith.constant 0 : i32
    return %arg0, %c0_i32, %c0_i32_0 : i32, i32, i32
  }
  func.func @transform_1(%arg0: i32) -> (i32, i32, i32) {
    %c0_i32 = arith.constant 0 : i32
    %c0_i32_0 = arith.constant 0 : i32
    %c0_i32_1 = arith.constant 0 : i32
    return %arg0, %c0_i32, %c0_i32_0 : i32, i32, i32
  }
  func.func @transform_2(%arg0: i32) -> (i32, i32) {
    %c0_i32 = arith.constant 0 : i32
    %c0_i32_0 = arith.constant 0 : i32
    %c0_i32_1 = arith.constant 0 : i32
    return %c0_i32, %c0_i32_0 : i32, i32
  }
  func.func @transform_3(%arg0: i32) -> (i32, i32) {
    %c0_i32 = arith.constant 0 : i32
    %c0_i32_0 = arith.constant 0 : i32
    %c0_i32_1 = arith.constant 0 : i32
    return %c0_i32, %c0_i32_0 : i32, i32
  }
  func.func @transform_4(%arg0: i32) -> (i32, i32) {
    %c0_i32 = arith.constant 0 : i32
    %c0_i32_0 = arith.constant 0 : i32
    %c0_i32_1 = arith.constant 0 : i32
    return %c0_i32, %c0_i32_0 : i32, i32
  }
  func.func @transform_5(%arg0: i32) -> (i32, i32) {
    %c0_i32 = arith.constant 0 : i32
    %c0_i32_0 = arith.constant 0 : i32
    %c0_i32_1 = arith.constant 0 : i32
    return %c0_i32, %c0_i32_0 : i32, i32
  }
  func.func @transform_6(%arg0: i32) -> (i32, i32) {
    %c0_i32 = arith.constant 0 : i32
    %c0_i32_0 = arith.constant 0 : i32
    %c0_i32_1 = arith.constant 0 : i32
    return %c0_i32, %c0_i32_0 : i32, i32
  }
  func.func @transform_7(%arg0: i32) -> (i32, i32) {
    %c0_i32 = arith.constant 0 : i32
    %c0_i32_0 = arith.constant 0 : i32
    %c0_i32_1 = arith.constant 0 : i32
    return %c0_i32, %c0_i32_0 : i32, i32
  }
  func.func @transform_8(%arg0: i32) -> (i32, i32, i32) {
    %c0_i32 = arith.constant 0 : i32
    %c0_i32_0 = arith.constant 0 : i32
    %c0_i32_1 = arith.constant 0 : i32
    return %arg0, %c0_i32, %c0_i32_0 : i32, i32, i32
  }
  func.func @transform_9(%arg0: i32) -> (i32, i32, i32) {
    %c0_i32 = arith.constant 0 : i32
    %c0_i32_0 = arith.constant 0 : i32
    %c0_i32_1 = arith.constant 0 : i32
    return %arg0, %c0_i32, %c0_i32_0 : i32, i32, i32
  }
}

</mosaic_0001>

<bundles_post_ra>
// kernel: first_octave_cbr.3
= control target key start
LH: loop header
LB: loop body
LE: loop exit
PB: predicated region body
PF: predicated region fallthrough
CT: control target
= control target key end

     0   :  { %s637_s30 = smov 0   ;;  %s682_s0 = inlined_call_operand.vmem [shape: f32[2,4,256], index: 0, kind: input, shape index: {}]   ;;  %s683_s1 = inlined_call_operand.vmem [shape: f32[2,4,64], index: 1, kind: input, shape index: {}]   ;;  %s684_s2 = inlined_call_operand.vmem [shape: f32[4,2], index: 2, kind: input, shape index: {}]   ;;  %s685_s3 = inlined_call_operand.vmem [shape: f32[4,2], index: 3, kind: input, shape index: {}]   ;;  %s686_s4 = inlined_call_operand.vmem [shape: f32[4,1], index: 4, kind: input, shape index: {}]   ;;  %s687_s5 = inlined_call_operand.vmem [shape: f32[4,1], index: 5, kind: input, shape index: {}]   ;;  %s688_s6 = inlined_call_operand.vmem [shape: f32[4,1], index: 6, kind: input, shape index: {}]   ;;  %s689_s7 = inlined_call_operand.vmem [shape: f32[4,1], index: 7, kind: input, shape index: {}]   ;;  %s690_s8 = inlined_call_operand.vmem [shape: f32[2,4,256], index: 8, kind: output, shape index: {0}]   ;;  %s691_s9 = inlined_call_operand.vmem [shape: f32[2,4,64], index: 9, kind: output, shape index: {1}]  }
   0x1 LB: > { %s542_s10 = sadd.s32 4294967295, %s581_s30   ;;  %p546_p0 = scmp.ge.s32.totalorder %s581_s30, 1  ;;  %s581_s30 = sphi %s637_s30, %s20_s30  }
   0x2   : > { %p299_p1 = scmp.lt.s32.totalorder %s581_s30, 3 }
   0x4   : > { %p300_p2 = pnand %p546_p0, %p299_p1 }
   0x5   : > { %v362_v0 = vld [vmem:[%s684_s2] sm:$0xf] (!%p300_p2)  ;;  %s583_s15 = smov (!%p300_p2), 1   ;;  %v584_v10 = vmov (!%p300_p2), 0   ;;  %s585_s16 = smov (!%p300_p2), 127   ;;  %v388_v29 = vlaneseq (!%p300_p2)  ;;  %vm442_vm0 = vcmask (!%p300_p2), 519168  }
   0x6   : > { %303 = sbr.rel (%p300_p2) target bundleno = 400 (0x190), region = 52  ;;  %v410_v1 = vld [vmem:[%s685_s3] sm:$0xf] (!%p300_p2)  ;;  %v363_v2 = vmul.f32 (!%p300_p2), 0.001953125, %v362_v0  ;;  %569 = vset.pattern.permute.xlu0 (!%p300_p2), %v584_v10  ;;  %570 = vset.pattern.permute.xlu1 (!%p300_p2), %v584_v10  ;;  %p343_p3 = scmp.lt.s32.totalorder (!%p300_p2), %s542_s10, 1 }
   0x7   : > { %v411_v3 = vmul.f32 (!%p300_p2), 0.0078125, %v410_v1  ;;  %v370_v15 = vld [vmem:[%s686_s4] sm:$0xf] (!%p300_p2)  ;;  %v586_v27 = vmov (!%p300_p2), 839922192   ;;  %v389_v31 = vshrl.u32 (!%p300_p2), %v388_v29, 7 }
   0x8   : > { %v364_v4 = vmul.f32 (!%p300_p2), %v363_v2, %v363_v2  ;;  %v418_v18 = vld [vmem:[%s688_s6] sm:$0xf] (!%p300_p2)  ;;  %v386_v28 = vunpack.c.l.s4 (!%p300_p2), %v586_v27 }
   0x9   : > { %v412_v5 = vmul.f32 (!%p300_p2), %v411_v3, %v411_v3  ;;  %v378_v19 = vld [vmem:[%s687_s5] sm:$0xf] (!%p300_p2) }
   0xa   : > { %366 = vrot.lane.b32.xlu0 (!%p300_p2), %v364_v4, %s583_s15  ;;  %v426_v24 = vld [vmem:[%s689_s7] sm:$0xf] (!%p300_p2)  ;;  %v387_v30 = vunpack.c.0.s8 (!%p300_p2), %v386_v28 }
   0xc   : > { %v390_v32 = vsub.s32 (!%p300_p2), %v387_v30, %v389_v31 }
   0xd   : > { %s693_s10 = smov (!%p343_p3, %s542_s10), 1 }
   0xe   : > { %414 = vrot.lane.b32.xlu0 %v412_v5, %s583_s15  ;;  %s555_s25 = sshll.u32 %s693_s10, 3  ;;  %s549_s29 = sshll.u32 %s693_s10, 2 }
   0xf   : > { %s347_s28 = scalar_lea.vmem %s682_s0, %s555_s25  ;;  %s351_s13 = scalar_lea.vmem %s683_s1, %s549_s29 }
  0x10   : > { %v361_v35 = vld [vmem:[%s347_s28] sm:$0xff]  ;;  %s360_s18 = scalar_lea.vmem %s691_s9, %s549_s29 }
  0x11   : > { %v409_v39 = vld [vmem:[%s351_s13] sm:$0xf] }
  0x7c   : > { %v367_v6 = vpop.permute.xlu0 %366 }
  0x7d   : > { %v369_v7 = vsub.f32 %v363_v2, %v367_v6 }
  0x7f   : > { %v371_v8 = vadd.f32 1e-05, %v369_v7 }
  0x80   : > { %v415_v9 = vpop.permute.xlu0 %414 }
  0x81   : > { %571 = vrsqrt.f32 %v371_v8  ;;  %v417_v11 = vsub.f32 %v411_v3, %v415_v9 }
  0x83   : > { %v419_v12 = vadd.f32 1e-05, %v417_v11 }
  0x85   : > { %573 = vrsqrt.f32 %v419_v12 }
  0x8b   : > { %v572_v13 = vpop.eup %571 }
  0x8c   : > { %374 = vrot.lane.b32.xlu1 %v572_v13, %s585_s16 }
  0x8f   : > { %v574_v14 = vpop.eup %573 }
  0x90   : > { %422 = vrot.lane.b32.xlu1 %v574_v14, %s585_s16  ;;  %s356_s16 = scalar_lea.vmem %s690_s8, %s555_s25 }
  0xfe   : > { %v375_v16 = vpop.permute.xlu1 %374 }
  0xff   : > { %v377_v17 = vmul.f32 %v375_v16, %v370_v15 }
 0x101   : > { %v379_v20 = vmul.f32 %v377_v17, %v363_v2  ;;  %383 = vperm.xlu0 %569, %v377_v17  }
 0x102   : > { %v423_v21 = vpop.permute.xlu1 %422 }
 0x103   : > { %v425_v22 = vmul.f32 %v423_v21, %v418_v18  ;;  %v380_v23 = vsub.f32 %v378_v19, %v379_v20 }
 0x105   : > { %v427_v25 = vmul.f32 %v425_v22, %v411_v3  ;;  %396 = vperm.xlu1 %570, %v380_v23  }
 0x107   : > { %v428_v26 = vsub.f32 %v426_v24, %v427_v25 }
 0x109   : > { %431 = vperm.xlu1 %570, %v425_v22   ;;  %437 = vperm.xlu0 %569, %v428_v26  }
 0x180   : > { %v384_v33 = vpop.permute.xlu0 %383 }
 0x181   : > { %v391_v34 = vrot.slane %v384_v33, %v390_v32 }
 0x183   : > { %v393_v37 = vmul.f32 %v391_v34, %v361_v35 }
 0x184   : > { %v397_v36 = vpop.permute.xlu1 %396 }
 0x185   : > { %v404_v38 = vrot.slane %v397_v36, %v390_v32 }
 0x187   : > { %v406_v40 = vadd.f32 %v404_v38, %v393_v37 }
 0x188   : > { %v432_v41 = vpop.permute.xlu1 %431  ;;  %v438_v44 = vpop.permute.xlu0 %437 }
 0x189   : > { %v407_v42 = vmax.f32 %v406_v40, 0.0  ;;  %v434_v43 = vmul.f32 %v432_v41, %v409_v39 }
 0x18b   : > { %408 = vst [vmem:[%s356_s16] sm:$0xff] %v407_v42  ;;  %v440_v45 = vadd.f32 %v438_v44, %v434_v43 }
 0x18d   : > { %v441_v46 = vmax.f32 %v440_v45, 0.0 }
 0x18f   : > { %443 = vst.msk [vmem:[%s360_s18] sm:$0xf] %vm442_vm0, %v441_v46 }
 0x190 PF: > { %s20_s30 = sadd.s32 1, %s581_s30  }
 0x191   : > { %p17_p4 = scmp.ge.s32.totalorder %s20_s30, 4  }
 0x193   :  { %19 = sbr.rel (!%p17_p4) target bundleno = 1 (0x1), region = 97 }

// kernel: first_octave_cbr.2
= control target key start
LH: loop header
LB: loop body
LE: loop exit
PB: predicated region body
PF: predicated region fallthrough
CT: control target
= control target key end

     0   :  { %s3272_s21 = smov 0   ;;  %s4639_s0 = inlined_call_operand.vmem [shape: f32[2,16,16,4], index: 0, kind: input, shape index: {}]   ;;  %s4640_s1 = inlined_call_operand.vmem [shape: f32[4,36], index: 1, kind: input, shape index: {}]   ;;  %s4641_s2 = inlined_call_operand.vmem [shape: f32[4,36], index: 2, kind: input, shape index: {}]   ;;  %s4642_s3 = inlined_call_operand.vmem [shape: f32[2,4,256], index: 3, kind: output, shape index: {0}]   ;;  %s4643_s4 = inlined_call_operand.vmem [shape: f32[2,4,64], index: 4, kind: output, shape index: {1}]   ;;  %s4644_s5 = inlined_call_operand.vmem [shape: f32[4,2], index: 5, kind: output, shape index: {2}]   ;;  %s4645_s6 = inlined_call_operand.vmem [shape: f32[4,2], index: 6, kind: output, shape index: {3}]  }
   0x1 LB: > { %s3278_s22 = sadd.s32 4294967295, %s3223_s21   ;;  %p2987_p0 = scmp.ge.s32.totalorder %s3223_s21, 1  ;;  %s3223_s21 = sphi %s3272_s21, %s17_s21  }
   0x2   : > { %p209_p1 = scmp.lt.s32.totalorder %s3223_s21, 3 }
   0x4   : > { %p210_p2 = pnand %p2987_p0, %p209_p1 }
   0x5   : > { %vm257_vm0 = vcmask (!%p210_p2), 31744   ;;  %vm260_vm1 = vcmask (!%p210_p2), 25600   ;;  %p243_p3 = scmp.lt.s32.totalorder (!%p210_p2), %s3278_s22, 1  ;;  %v3225_v0 = vmov (!%p210_p2), 0.0   ;;  %s3226_s28 = smov (!%p210_p2), 4   ;;  %vm742_vm2 = vcmask (!%p210_p2), 64544  }
   0x6   : > { %213 = sbr.rel (%p210_p2) target bundleno = 1195 (0x4ab), region = 32  ;;  %258 = vst.msk [vmem:[#allocation2] sm:$0xff] (!%p210_p2), %vm257_vm0, %v3225_v0  ;;  %259 = vst.msk [vmem:[#allocation2 + $0x8] sm:$0xff] (!%p210_p2), %vm257_vm0, %v3225_v0  ;;  %s3227_s29 = smov (!%p210_p2), 8   ;;  %vm983_vm3 = vcmask (!%p210_p2), 97344   ;;  %vm1224_vm4 = vcmask (!%p210_p2), 130144  }
   0x7   : > { %262 = vst.msk [vmem:[#allocation2 + $0x18] sm:$0xff] (!%p210_p2), %vm257_vm0, %v3225_v0  ;;  %263 = vst.msk [vmem:[#allocation2 + $0x20] sm:$0xff] (!%p210_p2), %vm257_vm0, %v3225_v0  ;;  %s3228_s30 = smov (!%p210_p2), 12   ;;  %s3229_s7 = smov (!%p210_p2), 16   ;;  %vm1465_vm5 = vcmask (!%p210_p2), 162944   ;;  %vm1706_vm6 = vcmask (!%p210_p2), 195744  }
   0x8   : > { %265 = vst.msk [vmem:[#allocation2 + $0x30] sm:$0xff] (!%p210_p2), %vm257_vm0, %v3225_v0  ;;  %266 = vst.msk [vmem:[#allocation2 + $0x38] sm:$0xff] (!%p210_p2), %vm257_vm0, %v3225_v0  ;;  %s3230_s8 = smov (!%p210_p2), 20   ;;  %s3231_s9 = smov (!%p210_p2), 24   ;;  %vm1948_vm7 = vcmask (!%p210_p2), 228544   ;;  %vm2190_vm8 = vcmask (!%p210_p2), 261344  }
   0x9   : > { %268 = vst.msk [vmem:[#allocation2 + $0x48] sm:$0xff] (!%p210_p2), %vm257_vm0, %v3225_v0  ;;  %269 = vst.msk [vmem:[#allocation2 + $0x50] sm:$0xff] (!%p210_p2), %vm257_vm0, %v3225_v0  ;;  %s3232_s10 = smov (!%p210_p2), 28   ;;  %s3233_s11 = smov (!%p210_p2), 32   ;;  %vm2431_vm9 = vcmask (!%p210_p2), 294144   ;;  %vm2545_vm10 = vcmask (!%p210_p2), 293888  }
   0xa   : > { %271 = vst.msk [vmem:[#allocation2 + $0x60] sm:$0xff] (!%p210_p2), %vm257_vm0, %v3225_v0  ;;  %272 = vst.msk [vmem:[#allocation2 + $0x68] sm:$0xff] (!%p210_p2), %vm257_vm0, %v3225_v0  ;;  %vm3235_vm12 = vmmov (!%p210_p2), 0   ;;  %vm2827_vm13 = vcmask (!%p210_p2), 519168   ;;  %p3066_p4 = scmp.ne.s32.totalorder (!%p210_p2), %s3278_s22, 0 }
   0xb   : > { %274 = vst.msk [vmem:[#allocation2 + $0x78] sm:$0xff] (!%p210_p2), %vm257_vm0, %v3225_v0  ;;  %275 = vst.msk [vmem:[#allocation2 + $0x80] sm:$0xff] (!%p210_p2), %vm257_vm0, %v3225_v0  ;;  %3130 = vmatprep.mubr.msk.f32.mxu1 (!%p210_p2), %vm3235_vm12, %v3225_v0 }
   0xc   : > { %277 = vst.msk [vmem:[#allocation2 + $0x90] sm:$0xff] (!%p210_p2), %vm257_vm0, %v3225_v0  ;;  %278 = vst.msk [vmem:[#allocation2 + $0x98] sm:$0xff] (!%p210_p2), %vm257_vm0, %v3225_v0 }
   0xd   : > { %280 = vst.msk [vmem:[#allocation2 + $0xa8] sm:$0xff] %vm257_vm0, %v3225_v0  ;;  %281 = vst.msk [vmem:[#allocation2 + $0xb0] sm:$0xff] %vm257_vm0, %v3225_v0  ;;  %s3434_s23 = scalar_select %p243_p3, %s3278_s22, 1  ;;  %v582_v7 = vld [vmem:[#allocation2 + $0x1] sm:$0xff] }
   0xe   : > { %283 = vst.msk [vmem:[#allocation2 + $0xc0] sm:$0xff] %vm257_vm0, %v3225_v0  ;;  %284 = vst.msk [vmem:[#allocation2 + $0xc8] sm:$0xff] %vm257_vm0, %v3225_v0  ;;  %646 = vrot.lane.b32.xlu0 %v582_v7, %s3226_s28  ;;  %vm2833_vm14 = vcmask (!%p3066_p4), 11264  }
   0xf   : > { %286 = vst.msk [vmem:[#allocation2 + $0xd8] sm:$0xff] %vm257_vm0, %v3225_v0  ;;  %287 = vst.msk [vmem:[#allocation2 + $0xe0] sm:$0xff] %vm257_vm0, %v3225_v0  ;;  %s3069_s24 = sshll.u32 %s3434_s23, 8  ;;  %s3070_s16 = sshll.u32 %s3434_s23, 3 }
  0x10   : > { %289 = vst.msk [vmem:[#allocation2 + $0xf0] sm:$0xff] %vm257_vm0, %v3225_v0  ;;  %290 = vst.msk [vmem:[#allocation2 + $0xf8] sm:$0xff] %vm257_vm0, %v3225_v0  ;;  %s3440_s27 = scalar_lea.vmem %s4639_s0, %s3069_s24  ;;  %s252_s19 = scalar_lea.vmem %s4642_s3, %s3070_s16 }
  0x11   : > { %292 = vst.msk [vmem:[#allocation2 + $0x108] sm:$0xff] %vm257_vm0, %v3225_v0  ;;  %293 = vst.msk [vmem:[#allocation2 + $0x110] sm:$0xff] %vm257_vm0, %v3225_v0  ;;  %v313_v1 = vld [vmem:[%s3440_s27] sm:$0xff]  ;;  %v315_v2 = vld [vmem:[%s3440_s27 + $0x10] sm:$0xff]  ;;  %s2992_s20 = sshll.u32 %s3434_s23, 2 }
  0x12   : > { %295 = vst.msk [vmem:[#allocation2 + $0x120] sm:$0xff] %vm257_vm0, %v3225_v0  ;;  %296 = vst.msk [vmem:[#allocation2 + $0x128] sm:$0xff] %vm257_vm0, %v3225_v0  ;;  %v314_v3 = vld [vmem:[%s3440_s27 + $0x8] sm:$0xff]  ;;  %v317_v4 = vld [vmem:[%s3440_s27 + $0x20] sm:$0xff]  ;;  %s256_s26 = scalar_lea.vmem %s4643_s4, %s2992_s20 }
  0x13   : > { %298 = vst.msk [vmem:[#allocation2 + $0x138] sm:$0xff] %vm257_vm0, %v3225_v0  ;;  %299 = vst.msk [vmem:[#allocation2 + $0x140] sm:$0xff] %vm257_vm0, %v3225_v0  ;;  %v316_v5 = vld [vmem:[%s3440_s27 + $0x18] sm:$0xff]  ;;  %v319_v6 = vld [vmem:[%s3440_s27 + $0x30] sm:$0xff] }
  0x14   : > { %301 = vst.msk [vmem:[#allocation2 + $0x150] sm:$0xff] %vm257_vm0, %v3225_v0  ;;  %302 = vst.msk [vmem:[#allocation2 + $0x158] sm:$0xff] %vm257_vm0, %v3225_v0  ;;  %v318_v9 = vld [vmem:[%s3440_s27 + $0x28] sm:$0xff]  ;;  %v321_v10 = vld [vmem:[%s3440_s27 + $0x40] sm:$0xff] }
  0x15   : > { %304 = vst.msk [vmem:[#allocation2 + $0x168] sm:$0xff] %vm257_vm0, %v3225_v0  ;;  %305 = vst.msk [vmem:[#allocation2 + $0x170] sm:$0xff] %vm257_vm0, %v3225_v0  ;;  %v320_v11 = vld [vmem:[%s3440_s27 + $0x38] sm:$0xff]  ;;  %v323_v12 = vld [vmem:[%s3440_s27 + $0x50] sm:$0xff] }
  0x16   : > { %307 = vst.msk [vmem:[#allocation2 + $0x180] sm:$0xff] %vm257_vm0, %v3225_v0  ;;  %308 = vst.msk [vmem:[#allocation2 + $0x188] sm:$0xff] %vm257_vm0, %v3225_v0  ;;  %v322_v13 = vld [vmem:[%s3440_s27 + $0x48] sm:$0xff]  ;;  %v325_v14 = vld [vmem:[%s3440_s27 + $0x60] sm:$0xff] }
  0x17   : > { %310 = vst.msk [vmem:[#allocation2 + $0x198] sm:$0xff] %vm257_vm0, %v3225_v0  ;;  %311 = vst.msk [vmem:[#allocation2 + $0x1a0] sm:$0xff] %vm257_vm0, %v3225_v0  ;;  %v324_v15 = vld [vmem:[%s3440_s27 + $0x58] sm:$0xff]  ;;  %v327_v16 = vld [vmem:[%s3440_s27 + $0x70] sm:$0xff] }
  0x18   : > { %473 = vst.msk [vmem:[#allocation3] sm:$0xff] %vm257_vm0, %v3225_v0  ;;  %475 = vst.msk [vmem:[#allocation3 + $0x10] sm:$0xff] %vm257_vm0, %v3225_v0  ;;  %v326_v17 = vld [vmem:[%s3440_s27 + $0x68] sm:$0xff]  ;;  %v329_v18 = vld [vmem:[%s3440_s27 + $0x80] sm:$0xff] }
  0x19   : > { %477 = vst.msk [vmem:[#allocation3 + $0x20] sm:$0xff] %vm257_vm0, %v3225_v0  ;;  %479 = vst.msk [vmem:[#allocation3 + $0x30] sm:$0xff] %vm257_vm0, %v3225_v0  ;;  %v328_v19 = vld [vmem:[%s3440_s27 + $0x78] sm:$0xff]  ;;  %v331_v20 = vld [vmem:[%s3440_s27 + $0x90] sm:$0xff] }
  0x1a   : > { %481 = vst.msk [vmem:[#allocation3 + $0x40] sm:$0xff] %vm257_vm0, %v3225_v0  ;;  %483 = vst.msk [vmem:[#allocation3 + $0x50] sm:$0xff] %vm257_vm0, %v3225_v0  ;;  %v330_v21 = vld [vmem:[%s3440_s27 + $0x88] sm:$0xff]  ;;  %v333_v22 = vld [vmem:[%s3440_s27 + $0xa0] sm:$0xff] }
  0x1b   : > { %485 = vst.msk [vmem:[#allocation3 + $0x60] sm:$0xff] %vm257_vm0, %v3225_v0  ;;  %487 = vst.msk [vmem:[#allocation3 + $0x70] sm:$0xff] %vm257_vm0, %v3225_v0  ;;  %v332_v23 = vld [vmem:[%s3440_s27 + $0x98] sm:$0xff]  ;;  %v335_v24 = vld [vmem:[%s3440_s27 + $0xb0] sm:$0xff] }
  0x1c   : > { %489 = vst.msk [vmem:[#allocation3 + $0x80] sm:$0xff] %vm257_vm0, %v3225_v0  ;;  %491 = vst.msk [vmem:[#allocation3 + $0x90] sm:$0xff] %vm257_vm0, %v3225_v0  ;;  %v334_v28 = vld [vmem:[%s3440_s27 + $0xa8] sm:$0xff]  ;;  %v337_v29 = vld [vmem:[%s3440_s27 + $0xc0] sm:$0xff] }
  0x1d   : > { %261 = vst.msk [vmem:[#allocation2 + $0x10] sm:$0x3] %vm260_vm1, %v3225_v0  ;;  %264 = vst.msk [vmem:[#allocation2 + $0x28] sm:$0x3] %vm260_vm1, %v3225_v0  ;;  %v336_v33 = vld [vmem:[%s3440_s27 + $0xb8] sm:$0xff]  ;;  %v339_v34 = vld [vmem:[%s3440_s27 + $0xd0] sm:$0xff] }
  0x1e   : > { %267 = vst.msk [vmem:[#allocation2 + $0x40] sm:$0x3] %vm260_vm1, %v3225_v0  ;;  %270 = vst.msk [vmem:[#allocation2 + $0x58] sm:$0x3] %vm260_vm1, %v3225_v0  ;;  %v338_v35 = vld [vmem:[%s3440_s27 + $0xc8] sm:$0xff]  ;;  %v341_v36 = vld [vmem:[%s3440_s27 + $0xe0] sm:$0xff] }
  0x1f   : > { %273 = vst.msk [vmem:[#allocation2 + $0x70] sm:$0x3] %vm260_vm1, %v3225_v0  ;;  %276 = vst.msk [vmem:[#allocation2 + $0x88] sm:$0x3] %vm260_vm1, %v3225_v0  ;;  %v340_v37 = vld [vmem:[%s3440_s27 + $0xd8] sm:$0xff]  ;;  %v342_v40 = vld [vmem:[%s3440_s27 + $0xe8] sm:$0xff] }
  0x20   : > { %279 = vst.msk [vmem:[#allocation2 + $0xa0] sm:$0x3] %vm260_vm1, %v3225_v0  ;;  %282 = vst.msk [vmem:[#allocation2 + $0xb8] sm:$0x3] %vm260_vm1, %v3225_v0  ;;  %v2993_v41 = vld [vmem:[%s3440_s27 + $0x20] ss:$2 sm:$0xff] }
  0x21   : > { %285 = vst.msk [vmem:[#allocation2 + $0xd0] sm:$0x3] %vm260_vm1, %v3225_v0  ;;  %288 = vst.msk [vmem:[#allocation2 + $0xe8] sm:$0x3] %vm260_vm1, %v3225_v0  ;;  %v3001_v42 = vld [vmem:[%s3440_s27 + $0x21] ss:$2 sm:$0xff] }
  0x22   : > { %291 = vst.msk [vmem:[#allocation2 + $0x100] sm:$0x3] %vm260_vm1, %v3225_v0  ;;  %294 = vst.msk [vmem:[#allocation2 + $0x118] sm:$0x3] %vm260_vm1, %v3225_v0  ;;  %v3009_v43 = vld [vmem:[%s3440_s27 + $0x30] ss:$2 sm:$0xff]  ;;  %v410_v45 = vadd.f32 %v3001_v42, %v2993_v41 }
  0x23   : > { %297 = vst.msk [vmem:[#allocation2 + $0x130] sm:$0x3] %vm260_vm1, %v3225_v0  ;;  %300 = vst.msk [vmem:[#allocation2 + $0x148] sm:$0x3] %vm260_vm1, %v3225_v0  ;;  %v378_v46 = vld [vmem:[%s3440_s27] ss:$2 sm:$0xff] }
  0x24   : > { %303 = vst.msk [vmem:[#allocation2 + $0x160] sm:$0x3] %vm260_vm1, %v3225_v0  ;;  %306 = vst.msk [vmem:[#allocation2 + $0x178] sm:$0x3] %vm260_vm1, %v3225_v0  ;;  %v583_v8 = vld [vmem:[#allocation2 + $0x9] sm:$0xff]  ;;  %v434_v52 = vadd.f32 %v3009_v43, %v410_v45  ;;  %v502_v41 = vld [vmem:[#allocation2] sm:$0xff] }
  0x25   : > { %309 = vst.msk [vmem:[#allocation2 + $0x190] sm:$0x3] %vm260_vm1, %v3225_v0  ;;  %312 = vst.msk [vmem:[#allocation2 + $0x1a8] sm:$0x3] %vm260_vm1, %v3225_v0  ;;  %648 = vrot.lane.b32.xlu0 %v583_v8, %s3226_s28  ;;  %v3000_v47 = vld [vmem:[%s3440_s27 + $0x1] ss:$2 sm:$0xff] }
  0x26   : > { %474 = vst.msk [vmem:[#allocation3 + $0x8] sm:$0x3] %vm260_vm1, %v3225_v0  ;;  %476 = vst.msk [vmem:[#allocation3 + $0x18] sm:$0x3] %vm260_vm1, %v3225_v0  ;;  %v3017_v48 = vld [vmem:[%s3440_s27 + $0x31] ss:$2 sm:$0xff]  ;;  %v409_v49 = vadd.f32 %v3000_v47, %v378_v46 }
  0x27   : > { %478 = vst.msk [vmem:[#allocation3 + $0x28] sm:$0x3] %vm260_vm1, %v3225_v0  ;;  %480 = vst.msk [vmem:[#allocation3 + $0x38] sm:$0x3] %vm260_vm1, %v3225_v0  ;;  %v3008_v50 = vld [vmem:[%s3440_s27 + $0x10] ss:$2 sm:$0xff]  ;;  %v458_v62 = vadd.f32 %v3017_v48, %v434_v52 }
  0x28   : > { %482 = vst.msk [vmem:[#allocation3 + $0x48] sm:$0x3] %vm260_vm1, %v3225_v0  ;;  %484 = vst.msk [vmem:[#allocation3 + $0x58] sm:$0x3] %vm260_vm1, %v3225_v0  ;;  %v2995_v51 = vld [vmem:[%s3440_s27 + $0x60] ss:$2 sm:$0xff]  ;;  %v433_v56 = vadd.f32 %v3008_v50, %v409_v49 }
  0x29   : > { %486 = vst.msk [vmem:[#allocation3 + $0x68] sm:$0x3] %vm260_vm1, %v3225_v0  ;;  %488 = vst.msk [vmem:[#allocation3 + $0x78] sm:$0x3] %vm260_vm1, %v3225_v0  ;;  %v3016_v53 = vld [vmem:[%s3440_s27 + $0x11] ss:$2 sm:$0xff] }
  0x2a   : > { %490 = vst.msk [vmem:[#allocation3 + $0x88] sm:$0x3] %vm260_vm1, %v3225_v0  ;;  %492 = vst.msk [vmem:[#allocation3 + $0x98] sm:$0x3] %vm260_vm1, %v3225_v0  ;;  %v3003_v54 = vld [vmem:[%s3440_s27 + $0x61] ss:$2 sm:$0xff] }
  0x2b   : > { %346 = vst.msk [vmem:[#allocation2 + $0x19] sm:$0xff] %vm257_vm0, %v313_v1  ;;  %348 = vst.msk [vmem:[#allocation2 + $0x31] sm:$0xff] %vm257_vm0, %v315_v2  ;;  %v3011_v55 = vld [vmem:[%s3440_s27 + $0x70] ss:$2 sm:$0xff]  ;;  %v412_v57 = vadd.f32 %v3003_v54, %v2995_v51  ;;  %v2994_v58 = vld [vmem:[%s3440_s27 + $0x40] ss:$2 sm:$0xff]  ;;  %v457_v2 = vadd.f32 %v3016_v53, %v433_v56 }
  0x2c   : > { %347 = vst.msk [vmem:[#allocation2 + $0x21] sm:$0xff] %vm257_vm0, %v314_v3  ;;  %350 = vst.msk [vmem:[#allocation2 + $0x49] sm:$0xff] %vm257_vm0, %v317_v4  ;;  %v3002_v59 = vld [vmem:[%s3440_s27 + $0x41] ss:$2 sm:$0xff]  ;;  %v3010_v60 = vld [vmem:[%s3440_s27 + $0x50] ss:$2 sm:$0xff] }
  0x2d   : > { %349 = vst.msk [vmem:[#allocation2 + $0x39] sm:$0xff] %vm257_vm0, %v316_v5  ;;  %352 = vst.msk [vmem:[#allocation2 + $0x61] sm:$0xff] %vm257_vm0, %v319_v6  ;;  %v3019_v63 = vld [vmem:[%s3440_s27 + $0x71] ss:$2 sm:$0xff]  ;;  %v411_v1 = vadd.f32 %v3002_v59, %v2994_v58  ;;  %v436_v3 = vadd.f32 %v3011_v55, %v412_v57  ;;  %v466_v6 = vmul.f32 0.25, %v458_v62  ;;  %v503_v43 = vld [vmem:[#allocation2 + $0x8] sm:$0xff] }
  0x2e   : > { %351 = vst.msk [vmem:[#allocation2 + $0x51] sm:$0xff] %vm257_vm0, %v318_v9  ;;  %354 = vst.msk [vmem:[#allocation2 + $0x79] sm:$0xff] %vm257_vm0, %v321_v10  ;;  %v3018_v4 = vld [vmem:[%s3440_s27 + $0x51] ss:$2 sm:$0xff]  ;;  %v2997_v8 = vld [vmem:[%s3440_s27 + $0xa0] ss:$2 sm:$0xff] }
  0x2f   : > { %353 = vst.msk [vmem:[#allocation2 + $0x69] sm:$0xff] %vm257_vm0, %v320_v11  ;;  %356 = vst.msk [vmem:[#allocation2 + $0x91] sm:$0xff] %vm257_vm0, %v323_v12  ;;  %v435_v7 = vadd.f32 %v3010_v60, %v411_v1  ;;  %v3005_v9 = vld [vmem:[%s3440_s27 + $0xa1] ss:$2 sm:$0xff]  ;;  %v465_v11 = vmul.f32 0.25, %v457_v2  ;;  %v460_v12 = vadd.f32 %v3019_v63, %v436_v3 }
  0x30   : > { %355 = vst.msk [vmem:[#allocation2 + $0x81] sm:$0xff] %vm257_vm0, %v322_v13  ;;  %358 = vst.msk [vmem:[#allocation2 + $0xa9] sm:$0xff] %vm257_vm0, %v325_v14  ;;  %v414_v13 = vadd.f32 %v3005_v9, %v2997_v8  ;;  %v3013_v14 = vld [vmem:[%s3440_s27 + $0xb0] ss:$2 sm:$0xff] }
  0x31   : > { %357 = vst.msk [vmem:[#allocation2 + $0x99] sm:$0xff] %vm257_vm0, %v324_v15  ;;  %360 = vst.msk [vmem:[#allocation2 + $0xc1] sm:$0xff] %vm257_vm0, %v327_v16  ;;  %v3021_v15 = vld [vmem:[%s3440_s27 + $0xb1] ss:$2 sm:$0xff]  ;;  %v459_v16 = vadd.f32 %v3018_v4, %v435_v7 }
  0x32   : > { %359 = vst.msk [vmem:[#allocation2 + $0xb1] sm:$0xff] %vm257_vm0, %v326_v17  ;;  %362 = vst.msk [vmem:[#allocation2 + $0xd9] sm:$0xff] %vm257_vm0, %v329_v18  ;;  %v584_v25 = vld [vmem:[#allocation2 + $0x19] sm:$0xff]  ;;  %v586_v26 = vld [vmem:[#allocation2 + $0x31] sm:$0xff] }
  0x33   : > { %361 = vst.msk [vmem:[#allocation2 + $0xc9] sm:$0xff] %vm257_vm0, %v328_v19  ;;  %364 = vst.msk [vmem:[#allocation2 + $0xf1] sm:$0xff] %vm257_vm0, %v331_v20  ;;  %650 = vrot.lane.b32.xlu1 %v584_v25, %s3226_s28  ;;  %v585_v27 = vld [vmem:[#allocation2 + $0x21] sm:$0xff]  ;;  %654 = vrot.lane.b32.xlu0 %v586_v26, %s3226_s28  ;;  %v588_v30 = vld [vmem:[#allocation2 + $0x49] sm:$0xff]  ;;  %v468_v20 = vmul.f32 0.25, %v460_v12  ;;  %v467_v26 = vmul.f32 0.25, %v459_v16 }
  0x34   : > { %363 = vst.msk [vmem:[#allocation2 + $0xe1] sm:$0xff] %vm257_vm0, %v330_v21  ;;  %366 = vst.msk [vmem:[#allocation2 + $0x109] sm:$0xff] %vm257_vm0, %v333_v22  ;;  %v587_v31 = vld [vmem:[#allocation2 + $0x39] sm:$0xff]  ;;  %v590_v32 = vld [vmem:[#allocation2 + $0x61] sm:$0xff]  ;;  %v438_v21 = vadd.f32 %v3013_v14, %v414_v13 }
  0x35   : > { %365 = vst.msk [vmem:[#allocation2 + $0xf9] sm:$0xff] %vm257_vm0, %v332_v23  ;;  %368 = vst.msk [vmem:[#allocation2 + $0x121] sm:$0xff] %vm257_vm0, %v335_v24  ;;  %v589_v38 = vld [vmem:[#allocation2 + $0x51] sm:$0xff]  ;;  %v592_v39 = vld [vmem:[#allocation2 + $0x79] sm:$0xff] }
  0x36   : > { %367 = vst.msk [vmem:[#allocation2 + $0x111] sm:$0xff] %vm257_vm0, %v334_v28  ;;  %370 = vst.msk [vmem:[#allocation2 + $0x139] sm:$0xff] %vm257_vm0, %v337_v29  ;;  %v591_v44 = vld [vmem:[#allocation2 + $0x69] sm:$0xff]  ;;  %v594_v61 = vld [vmem:[#allocation2 + $0x91] sm:$0xff]  ;;  %v462_v29 = vadd.f32 %v3021_v15, %v438_v21 }
  0x37   : > { %652 = vrot.lane.b32.xlu1 %v585_v27, %s3226_s28  ;;  %658 = vrot.lane.b32.xlu0 %v588_v30, %s3226_s28  ;;  %369 = vst.msk [vmem:[#allocation2 + $0x129] sm:$0xff] %vm257_vm0, %v336_v33  ;;  %372 = vst.msk [vmem:[#allocation2 + $0x151] sm:$0xff] %vm257_vm0, %v339_v34  ;;  %v593_v5 = vld [vmem:[#allocation2 + $0x81] sm:$0xff]  ;;  %v596_v10 = vld [vmem:[#allocation2 + $0xa9] sm:$0xff] }
  0x38   : > { %371 = vst.msk [vmem:[#allocation2 + $0x141] sm:$0xff] %vm257_vm0, %v338_v35  ;;  %374 = vst.msk [vmem:[#allocation2 + $0x169] sm:$0xff] %vm257_vm0, %v341_v36  ;;  %v2996_v17 = vld [vmem:[%s3440_s27 + $0x80] ss:$2 sm:$0xff]  ;;  %v3004_v18 = vld [vmem:[%s3440_s27 + $0x81] ss:$2 sm:$0xff] }
  0x39   : > { %373 = vst.msk [vmem:[#allocation2 + $0x159] sm:$0xff] %vm257_vm0, %v340_v37  ;;  %375 = vst.msk [vmem:[#allocation2 + $0x171] sm:$0xff] %vm257_vm0, %v342_v40  ;;  %v3012_v19 = vld [vmem:[%s3440_s27 + $0x90] ss:$2 sm:$0xff]  ;;  %v413_v22 = vadd.f32 %v3004_v18, %v2996_v17  ;;  %v3020_v23 = vld [vmem:[%s3440_s27 + $0x91] ss:$2 sm:$0xff] }
  0x3a   : > { %495 = vst.msk [vmem:[#allocation3 + $0x21] sm:$0xff] %vm257_vm0, %v466_v6  ;;  %494 = vst.msk [vmem:[#allocation3 + $0x11] sm:$0xff] %vm257_vm0, %v465_v11  ;;  %v2998_v24 = vld [vmem:[%s3440_s27 + $0xc0] ss:$2 sm:$0xff]  ;;  %v3006_v27 = vld [vmem:[%s3440_s27 + $0xc1] ss:$2 sm:$0xff] }
  0x3b   : > { %656 = vrot.lane.b32.xlu1 %v587_v31, %s3226_s28  ;;  %662 = vrot.lane.b32.xlu0 %v590_v32, %s3226_s28  ;;  %v595_v25 = vld [vmem:[#allocation2 + $0x99] sm:$0xff]  ;;  %497 = vst.msk [vmem:[#allocation3 + $0x41] sm:$0xff] %vm257_vm0, %v468_v20  ;;  %v437_v30 = vadd.f32 %v3012_v19, %v413_v22  ;;  %v415_v31 = vadd.f32 %v3006_v27, %v2998_v24  ;;  %v598_v32 = vld [vmem:[#allocation2 + $0xc1] sm:$0xff]  ;;  %496 = vst.msk [vmem:[#allocation3 + $0x31] sm:$0xff] %vm257_vm0, %v467_v26  ;;  %v470_v34 = vmul.f32 0.25, %v462_v29 }
  0x3c   : > { %v3014_v28 = vld [vmem:[%s3440_s27 + $0xd0] ss:$2 sm:$0xff]  ;;  %v3022_v33 = vld [vmem:[%s3440_s27 + $0xd1] ss:$2 sm:$0xff]  ;;  %534 = vst.msk [vmem:[#allocation4] sm:$0xff] %vm257_vm0, %v502_v41  ;;  %535 = vst.msk [vmem:[#allocation4 + $0x8] sm:$0xff] %vm257_vm0, %v503_v43 }
  0x3d   : > { %v461_v35 = vadd.f32 %v3020_v23, %v437_v30  ;;  %v439_v36 = vadd.f32 %v3014_v28, %v415_v31  ;;  %v597_v37 = vld [vmem:[#allocation2 + $0xb1] sm:$0xff]  ;;  %499 = vst.msk [vmem:[#allocation3 + $0x61] sm:$0xff] %vm257_vm0, %v470_v34  ;;  %v600_v40 = vld [vmem:[#allocation2 + $0xd9] sm:$0xff]  ;;  %v3570_v49 = vld [vmem:[#allocation2 + $0x48] sm:$0xff] }
  0x3e   : > { %v3555_v45 = vld [vmem:[#allocation2 + $0x18] sm:$0xff]  ;;  %v3561_v46 = vld [vmem:[#allocation2 + $0x30] sm:$0xff]  ;;  %v3565_v48 = vld [vmem:[#allocation2 + $0x20] sm:$0xff]  ;;  %540 = vst.msk [vmem:[#allocation4 + $0x30] sm:$0xff] %vm257_vm0, %v3570_v49 }
  0x3f   : > { %660 = vrot.lane.b32.xlu1 %v589_v38, %s3226_s28  ;;  %666 = vrot.lane.b32.xlu0 %v592_v39, %s3226_s28  ;;  %v469_v38 = vmul.f32 0.25, %v461_v35  ;;  %v463_v39 = vadd.f32 %v3022_v33, %v439_v36  ;;  %536 = vst.msk [vmem:[#allocation4 + $0x10] sm:$0xff] %vm257_vm0, %v3555_v45  ;;  %v602_v47 = vld [vmem:[#allocation2 + $0xf1] sm:$0xff]  ;;  %538 = vst.msk [vmem:[#allocation4 + $0x20] sm:$0xff] %vm257_vm0, %v3561_v46  ;;  %v601_v51 = vld [vmem:[#allocation2 + $0xe1] sm:$0xff] }
  0x40   : > { %537 = vst.msk [vmem:[#allocation4 + $0x18] sm:$0xff] %vm257_vm0, %v3565_v48  ;;  %v3572_v50 = vld [vmem:[#allocation2 + $0x38] sm:$0xff]  ;;  %v3578_v52 = vld [vmem:[#allocation2 + $0x60] sm:$0xff]  ;;  %v3583_v53 = vld [vmem:[#allocation2 + $0x50] sm:$0xff] }
  0x41   : > { %498 = vst.msk [vmem:[#allocation3 + $0x51] sm:$0xff] %vm257_vm0, %v469_v38  ;;  %v471_v42 = vmul.f32 0.25, %v463_v39  ;;  %539 = vst.msk [vmem:[#allocation4 + $0x28] sm:$0xff] %vm257_vm0, %v3572_v50  ;;  %v604_v54 = vld [vmem:[#allocation2 + $0x109] sm:$0xff]  ;;  %v3587_v55 = vld [vmem:[#allocation2 + $0x78] sm:$0xff] }
  0x42   : > { %542 = vst.msk [vmem:[#allocation4 + $0x40] sm:$0xff] %vm257_vm0, %v3578_v52  ;;  %541 = vst.msk [vmem:[#allocation4 + $0x38] sm:$0xff] %vm257_vm0, %v3583_v53  ;;  %v3589_v56 = vld [vmem:[#allocation2 + $0x68] sm:$0xff]  ;;  %v3596_v57 = vld [vmem:[#allocation2 + $0x90] sm:$0xff] }
  0x43   : > { %664 = vrot.lane.b32.xlu1 %v591_v44, %s3226_s28  ;;  %670 = vrot.lane.b32.xlu0 %v594_v61, %s3226_s28  ;;  %v599_v44 = vld [vmem:[#allocation2 + $0xc9] sm:$0xff]  ;;  %500 = vst.msk [vmem:[#allocation3 + $0x71] sm:$0xff] %vm257_vm0, %v471_v42  ;;  %544 = vst.msk [vmem:[#allocation4 + $0x50] sm:$0xff] %vm257_vm0, %v3587_v55  ;;  %v603_v58 = vld [vmem:[#allocation2 + $0xf9] sm:$0xff] }
  0x44   : > { %543 = vst.msk [vmem:[#allocation4 + $0x48] sm:$0xff] %vm257_vm0, %v3589_v56  ;;  %546 = vst.msk [vmem:[#allocation4 + $0x60] sm:$0xff] %vm257_vm0, %v3596_v57  ;;  %v3600_v59 = vld [vmem:[#allocation2 + $0x80] sm:$0xff]  ;;  %v3605_v60 = vld [vmem:[#allocation2 + $0xa8] sm:$0xff] }
  0x45   : > { %545 = vst.msk [vmem:[#allocation4 + $0x58] sm:$0xff] %vm257_vm0, %v3600_v59  ;;  %v3607_v61 = vld [vmem:[#allocation2 + $0x98] sm:$0xff]  ;;  %v606_v62 = vld [vmem:[#allocation2 + $0x121] sm:$0xff]  ;;  %548 = vst.msk [vmem:[#allocation4 + $0x70] sm:$0xff] %vm257_vm0, %v3605_v60 }
  0x46   : > { %547 = vst.msk [vmem:[#allocation4 + $0x68] sm:$0xff] %vm257_vm0, %v3607_v61  ;;  %v3613_v63 = vld [vmem:[#allocation2 + $0xc0] sm:$0xff]  ;;  %v3618_v1 = vld [vmem:[#allocation2 + $0xb0] sm:$0xff]  ;;  %v3622_v3 = vld [vmem:[#allocation2 + $0xd8] sm:$0xff] }
  0x47   : > { %668 = vrot.lane.b32.xlu1 %v593_v5, %s3226_s28  ;;  %674 = vrot.lane.b32.xlu0 %v596_v10, %s3226_s28  ;;  %550 = vst.msk [vmem:[#allocation4 + $0x80] sm:$0xff] %vm257_vm0, %v3613_v63  ;;  %v605_v2 = vld [vmem:[#allocation2 + $0x111] sm:$0xff]  ;;  %549 = vst.msk [vmem:[#allocation4 + $0x78] sm:$0xff] %vm257_vm0, %v3618_v1  ;;  %v3624_v4 = vld [vmem:[#allocation2 + $0xc8] sm:$0xff] }
  0x48   : > { %552 = vst.msk [vmem:[#allocation4 + $0x90] sm:$0xff] %vm257_vm0, %v3622_v3  ;;  %551 = vst.msk [vmem:[#allocation4 + $0x88] sm:$0xff] %vm257_vm0, %v3624_v4  ;;  %v3631_v5 = vld [vmem:[#allocation2 + $0xf0] sm:$0xff]  ;;  %v3633_v6 = vld [vmem:[#allocation2 + $0xe0] sm:$0xff] }
  0x49   : > { %v608_v7 = vld [vmem:[#allocation2 + $0x139] sm:$0xff]  ;;  %554 = vst.msk [vmem:[#allocation4 + $0xa0] sm:$0xff] %vm257_vm0, %v3631_v5  ;;  %553 = vst.msk [vmem:[#allocation4 + $0x98] sm:$0xff] %vm257_vm0, %v3633_v6  ;;  %v3639_v8 = vld [vmem:[#allocation2 + $0x108] sm:$0xff] }
  0x4a   : > { %v607_v9 = vld [vmem:[#allocation2 + $0x129] sm:$0xff]  ;;  %556 = vst.msk [vmem:[#allocation4 + $0xb0] sm:$0xff] %vm257_vm0, %v3639_v8  ;;  %v3644_v10 = vld [vmem:[#allocation2 + $0xf8] sm:$0xff]  ;;  %v3646_v11 = vld [vmem:[#allocation2 + $0x120] sm:$0xff] }
  0x4b   : > { %672 = vrot.lane.b32.xlu1 %v595_v25, %s3226_s28  ;;  %678 = vrot.lane.b32.xlu0 %v598_v32, %s3226_s28  ;;  %v610_v12 = vld [vmem:[#allocation2 + $0x151] sm:$0xff]  ;;  %555 = vst.msk [vmem:[#allocation4 + $0xa8] sm:$0xff] %vm257_vm0, %v3644_v10  ;;  %558 = vst.msk [vmem:[#allocation4 + $0xc0] sm:$0xff] %vm257_vm0, %v3646_v11  ;;  %v3656_v15 = vld [vmem:[#allocation2 + $0x128] sm:$0xff] }
  0x4c   : > { %v3652_v13 = vld [vmem:[#allocation2 + $0x110] sm:$0xff]  ;;  %v3654_v14 = vld [vmem:[#allocation2 + $0x138] sm:$0xff]  ;;  %559 = vst.msk [vmem:[#allocation4 + $0xc8] sm:$0xff] %vm257_vm0, %v3656_v15  ;;  %v3667_v17 = vld [vmem:[#allocation2 + $0x140] sm:$0xff] }
  0x4d   : > { %557 = vst.msk [vmem:[#allocation4 + $0xb8] sm:$0xff] %vm257_vm0, %v3652_v13  ;;  %560 = vst.msk [vmem:[#allocation4 + $0xd0] sm:$0xff] %vm257_vm0, %v3654_v14  ;;  %v3665_v16 = vld [vmem:[#allocation2 + $0x150] sm:$0xff]  ;;  %v3669_v18 = vld [vmem:[#allocation2 + $0x168] sm:$0xff] }
  0x4e   : > { %562 = vst.msk [vmem:[#allocation4 + $0xe0] sm:$0xff] %vm257_vm0, %v3665_v16  ;;  %561 = vst.msk [vmem:[#allocation4 + $0xd8] sm:$0xff] %vm257_vm0, %v3667_v17  ;;  %v3677_v19 = vld [vmem:[#allocation2 + $0x158] sm:$0xff]  ;;  %v566_v20 = vld [vmem:[#allocation3] sm:$0xff] }
  0x4f   : > { %676 = vrot.lane.b32.xlu1 %v597_v37, %s3226_s28  ;;  %682 = vrot.lane.b32.xlu0 %v600_v40, %s3226_s28  ;;  %564 = vst.msk [vmem:[#allocation4 + $0xf0] sm:$0xff] %vm257_vm0, %v3669_v18  ;;  %v3679_v21 = vld [vmem:[#allocation2 + $0x170] sm:$0xff]  ;;  %563 = vst.msk [vmem:[#allocation4 + $0xe8] sm:$0xff] %vm257_vm0, %v3677_v19  ;;  %v609_v23 = vld [vmem:[#allocation2 + $0x141] sm:$0xff] }
  0x50   : > { %574 = vst.msk [vmem:[#allocation5] sm:$0xff] %vm257_vm0, %v566_v20  ;;  %565 = vst.msk [vmem:[#allocation4 + $0xf8] sm:$0xff] %vm257_vm0, %v3679_v21  ;;  %v3687_v22 = vld [vmem:[#allocation3 + $0x20] sm:$0xff]  ;;  %v3691_v24 = vld [vmem:[#allocation3 + $0x10] sm:$0xff] }
  0x51   : > { %576 = vst.msk [vmem:[#allocation5 + $0x10] sm:$0xff] %vm257_vm0, %v3687_v22  ;;  %575 = vst.msk [vmem:[#allocation5 + $0x8] sm:$0xff] %vm257_vm0, %v3691_v24  ;;  %v612_v25 = vld [vmem:[#allocation2 + $0x169] sm:$0xff]  ;;  %v611_v27 = vld [vmem:[#allocation2 + $0x159] sm:$0xff] }
  0x52   : > { %v3697_v26 = vld [vmem:[#allocation3 + $0x40] sm:$0xff]  ;;  %v3701_v28 = vld [vmem:[#allocation3 + $0x30] sm:$0xff]  ;;  %vm4226_vm11 = vmpackc.low %vm2545_vm10, %vm2545_vm10 }
  0x53   : > { %680 = vrot.lane.b32.xlu1 %v599_v44, %s3226_s28  ;;  %686 = vrot.lane.b32.xlu0 %v602_v47, %s3226_s28  ;;  %578 = vst.msk [vmem:[#allocation5 + $0x20] sm:$0xff] %vm257_vm0, %v3697_v26  ;;  %577 = vst.msk [vmem:[#allocation5 + $0x18] sm:$0xff] %vm257_vm0, %v3701_v28  ;;  %v775_v29 = vld [vmem:[#allocation3 + $0x1] sm:$0xff]  ;;  %v3711_v32 = vld [vmem:[#allocation3 + $0x50] sm:$0xff] }
  0x54   : > { %v3707_v30 = vld [vmem:[#allocation3 + $0x60] sm:$0xff]  ;;  %579 = vst.msk [vmem:[#allocation5 + $0x28] sm:$0xff] %vm257_vm0, %v3711_v32  ;;  %v776_v34 = vld [vmem:[#allocation3 + $0x11] sm:$0xff] }
  0x55   : > { %v613_v31 = vld [vmem:[#allocation2 + $0x171] sm:$0xff]  ;;  %580 = vst.msk [vmem:[#allocation5 + $0x30] sm:$0xff] %vm257_vm0, %v3707_v30  ;;  %v3717_v35 = vld [vmem:[#allocation3 + $0x70] sm:$0xff] }
  0x56   : > { %v777_v33 = vld [vmem:[#allocation3 + $0x21] sm:$0xff]  ;;  %581 = vst.msk [vmem:[#allocation5 + $0x38] sm:$0xff] %vm257_vm0, %v3717_v35  ;;  %v778_v37 = vld [vmem:[#allocation3 + $0x31] sm:$0xff] }
  0x57   : > { %684 = vrot.lane.b32.xlu1 %v601_v51, %s3226_s28  ;;  %690 = vrot.lane.b32.xlu0 %v604_v54, %s3226_s28  ;;  %v779_v36 = vld [vmem:[#allocation3 + $0x41] sm:$0xff]  ;;  %v780_v39 = vld [vmem:[#allocation3 + $0x51] sm:$0xff] }
  0x58   : > { %v781_v38 = vld [vmem:[#allocation3 + $0x61] sm:$0xff]  ;;  %v823_v40 = vld [vmem:[#allocation2 + $0x2] sm:$0xff]  ;;  %v3728_v42 = vld [vmem:[#allocation2 + $0x1a] sm:$0xff] }
  0x59   : > { %v782_v41 = vld [vmem:[#allocation3 + $0x71] sm:$0xff]  ;;  %v824_v43 = vld [vmem:[#allocation2 + $0xa] sm:$0xff]  ;;  %v827_v44 = vld [vmem:[#allocation2 + $0x32] sm:$0xff] }
  0x5a   : > { %v343_v47 = vld [vmem:[%s3440_s27 + $0xf0] sm:$0xff]  ;;  %v3736_v51 = vld [vmem:[#allocation2 + $0x22] sm:$0xff] }
  0x5b   : > { %688 = vrot.lane.b32.xlu1 %v603_v58, %s3226_s28  ;;  %694 = vrot.lane.b32.xlu0 %v606_v62, %s3226_s28  ;;  %376 = vst.msk [vmem:[#allocation2 + $0x181] sm:$0xff] %vm257_vm0, %v343_v47  ;;  %v829_v54 = vld [vmem:[#allocation2 + $0x4a] sm:$0xff]  ;;  %v344_v58 = vld [vmem:[%s3440_s27 + $0xf8] sm:$0xff] }
  0x5c   : > { %377 = vst.msk [vmem:[#allocation2 + $0x189] sm:$0xff] %vm257_vm0, %v344_v58  ;;  %v828_v62 = vld [vmem:[#allocation2 + $0x3a] sm:$0xff]  ;;  %v840_v47 = vld [vmem:[#allocation2 + $0xca] sm:$0xff] }
  0x5d   : > { %v3007_v20 = vld [vmem:[%s3440_s27 + $0xe1] ss:$2 sm:$0xff] }
  0x5f   : > { %692 = vrot.lane.b32.xlu1 %v605_v2, %s3226_s28  ;;  %698 = vrot.lane.b32.xlu0 %v608_v7, %s3226_s28  ;;  %v831_v2 = vld [vmem:[#allocation2 + $0x62] sm:$0xff]  ;;  %v830_v7 = vld [vmem:[#allocation2 + $0x52] sm:$0xff] }
  0x63   : > { %696 = vrot.lane.b32.xlu1 %v607_v9, %s3226_s28  ;;  %702 = vrot.lane.b32.xlu0 %v610_v12, %s3226_s28  ;;  %v833_v9 = vld [vmem:[#allocation2 + $0x7a] sm:$0xff] }
  0x64   : > { %v2999_v12 = vld [vmem:[%s3440_s27 + $0xe0] ss:$2 sm:$0xff] }
  0x67   : > { %700 = vrot.lane.b32.xlu1 %v609_v23, %s3226_s28  ;;  %706 = vrot.lane.b32.xlu0 %v612_v25, %s3226_s28  ;;  %v416_v23 = vadd.f32 %v3007_v20, %v2999_v12  ;;  %v832_v25 = vld [vmem:[#allocation2 + $0x6a] sm:$0xff]  ;;  %v3777_v12 = vld [vmem:[#allocation2 + $0xfa] sm:$0xff] }
  0x6b   : > { %704 = vrot.lane.b32.xlu1 %v611_v27, %s3226_s28  ;;  %791 = vrot.lane.b32.xlu0 %v775_v29, %s3226_s28  ;;  %v3015_v27 = vld [vmem:[%s3440_s27 + $0xf0] ss:$2 sm:$0xff] }
  0x6c   : > { %v440_v29 = vadd.f32 %v3015_v27, %v416_v23  ;;  %v847_v23 = vld [vmem:[#allocation2 + $0x122] sm:$0xff]  ;;  %v846_v27 = vld [vmem:[#allocation2 + $0x112] sm:$0xff] }
  0x6f   : > { %708 = vrot.lane.b32.xlu1 %v613_v31, %s3226_s28  ;;  %795 = vrot.lane.b32.xlu0 %v777_v33, %s3226_s28  ;;  %v835_v31 = vld [vmem:[#allocation2 + $0x92] sm:$0xff] }
  0x70   : > { %v3023_v33 = vld [vmem:[%s3440_s27 + $0xf1] ss:$2 sm:$0xff] }
  0x73   : > { %793 = vrot.lane.b32.xlu1 %v776_v34, %s3226_s28  ;;  %799 = vrot.lane.b32.xlu0 %v779_v36, %s3226_s28  ;;  %v464_v34 = vadd.f32 %v3023_v33, %v440_v29  ;;  %v834_v36 = vld [vmem:[#allocation2 + $0x82] sm:$0xff] }
  0x77   : > { %797 = vrot.lane.b32.xlu1 %v778_v37, %s3226_s28  ;;  %803 = vrot.lane.b32.xlu0 %v781_v38, %s3226_s28  ;;  %v472_v37 = vmul.f32 0.25, %v464_v34  ;;  %v837_v38 = vld [vmem:[#allocation2 + $0xaa] sm:$0xff] }
  0x78   : > { %v848_v34 = vld [vmem:[#allocation2 + $0x12a] sm:$0xff] }
  0x79   : > { %501 = vst.msk [vmem:[#allocation3 + $0x81] sm:$0xff] %vm257_vm0, %v472_v37  ;;  %v851_v37 = vld [vmem:[#allocation2 + $0x152] sm:$0xff] }
  0x7b   : > { %801 = vrot.lane.b32.xlu1 %v780_v39, %s3226_s28  ;;  %887 = vrot.lane.b32.xlu0 %v823_v40, %s3227_s29  ;;  %v836_v39 = vld [vmem:[#allocation2 + $0x9a] sm:$0xff]  ;;  %v839_v40 = vld [vmem:[#allocation2 + $0xc2] sm:$0xff] }
  0x7f   : > { %805 = vrot.lane.b32.xlu1 %v782_v41, %s3226_s28  ;;  %891 = vrot.lane.b32.xlu0 %v3728_v42, %s3227_s29  ;;  %v838_v41 = vld [vmem:[#allocation2 + $0xb2] sm:$0xff] }
  0x83   : > { %889 = vrot.lane.b32.xlu1 %v824_v43, %s3227_s29  ;;  %895 = vrot.lane.b32.xlu0 %v827_v44, %s3227_s29  ;;  %v3759_v43 = vld [vmem:[#allocation2 + $0xda] sm:$0xff]  ;;  %v647_v44 = vpop.permute.xlu0 %646 }
  0x84   : > { %743 = vst.msk [vmem:[#allocation4] sm:$0xff] %vm742_vm2, %v647_v44 }
  0x87   : > { %893 = vrot.lane.b32.xlu1 %v3736_v51, %s3227_s29  ;;  %899 = vrot.lane.b32.xlu0 %v829_v54, %s3227_s29  ;;  %v3765_v54 = vld [vmem:[#allocation2 + $0xf2] sm:$0xff] }
  0x8b   : > { %897 = vrot.lane.b32.xlu1 %v828_v62, %s3227_s29  ;;  %903 = vrot.lane.b32.xlu0 %v831_v2, %s3227_s29  ;;  %v3769_v62 = vld [vmem:[#allocation2 + $0xe2] sm:$0xff] }
  0x8f   : > { %901 = vrot.lane.b32.xlu1 %v830_v7, %s3227_s29  ;;  %907 = vrot.lane.b32.xlu0 %v833_v9, %s3227_s29  ;;  %v845_v7 = vld [vmem:[#allocation2 + $0x10a] sm:$0xff] }
  0x93   : > { %905 = vrot.lane.b32.xlu1 %v832_v25, %s3227_s29  ;;  %911 = vrot.lane.b32.xlu0 %v835_v31, %s3227_s29  ;;  %v849_v31 = vld [vmem:[#allocation2 + $0x13a] sm:$0xff] }
  0x97   : > { %909 = vrot.lane.b32.xlu1 %v834_v36, %s3227_s29  ;;  %915 = vrot.lane.b32.xlu0 %v837_v38, %s3227_s29  ;;  %v649_v58 = vpop.permute.xlu0 %648 }
  0x98   : > { %744 = vst.msk [vmem:[#allocation4 + $0x8] sm:$0xff] %vm742_vm2, %v649_v58 }
  0x9b   : > { %913 = vrot.lane.b32.xlu1 %v836_v39, %s3227_s29  ;;  %919 = vrot.lane.b32.xlu0 %v839_v40, %s3227_s29  ;;  %v850_v39 = vld [vmem:[#allocation2 + $0x142] sm:$0xff] }
  0x9f   : > { %917 = vrot.lane.b32.xlu1 %v838_v41, %s3227_s29  ;;  %923 = vrot.lane.b32.xlu0 %v3759_v43, %s3227_s29  ;;  %v853_v41 = vld [vmem:[#allocation2 + $0x16a] sm:$0xff] }
  0xa3   : > { %921 = vrot.lane.b32.xlu1 %v840_v47, %s3227_s29  ;;  %927 = vrot.lane.b32.xlu0 %v3765_v54, %s3227_s29  ;;  %v852_v47 = vld [vmem:[#allocation2 + $0x15a] sm:$0xff] }
  0xa5   : > { %v651_v2 = vpop.permute.xlu1 %650  ;;  %v655_v9 = vpop.permute.xlu0 %654 }
  0xa6   : > { %745 = vst.msk [vmem:[#allocation4 + $0x10] sm:$0xff] %vm742_vm2, %v651_v2  ;;  %747 = vst.msk [vmem:[#allocation4 + $0x20] sm:$0xff] %vm742_vm2, %v655_v9  ;;  %v1016_v2 = vld [vmem:[#allocation3 + $0x2] sm:$0xff] }
  0xa7   : > { %925 = vrot.lane.b32.xlu1 %v3769_v62, %s3227_s29  ;;  %931 = vrot.lane.b32.xlu0 %v845_v7, %s3227_s29  ;;  %v854_v9 = vld [vmem:[#allocation2 + $0x172] sm:$0xff] }
  0xa9   : > { %v653_v20 = vpop.permute.xlu1 %652  ;;  %v659_v25 = vpop.permute.xlu0 %658 }
  0xaa   : > { %746 = vst.msk [vmem:[#allocation4 + $0x18] sm:$0xff] %vm742_vm2, %v653_v20  ;;  %749 = vst.msk [vmem:[#allocation4 + $0x30] sm:$0xff] %vm742_vm2, %v659_v25 }
  0xab   : > { %929 = vrot.lane.b32.xlu1 %v3777_v12, %s3227_s29  ;;  %935 = vrot.lane.b32.xlu0 %v847_v23, %s3227_s29  ;;  %v1018_v23 = vld [vmem:[#allocation3 + $0x22] sm:$0xff] }
  0xad   : > { %v657_v29 = vpop.permute.xlu1 %656  ;;  %v663_v33 = vpop.permute.xlu0 %662 }
  0xae   : > { %748 = vst.msk [vmem:[#allocation4 + $0x28] sm:$0xff] %vm742_vm2, %v657_v29  ;;  %751 = vst.msk [vmem:[#allocation4 + $0x40] sm:$0xff] %vm742_vm2, %v663_v33 }
  0xaf   : > { %933 = vrot.lane.b32.xlu1 %v846_v27, %s3227_s29  ;;  %939 = vrot.lane.b32.xlu0 %v849_v31, %s3227_s29  ;;  %v1017_v27 = vld [vmem:[#allocation3 + $0x12] sm:$0xff]  ;;  %v1020_v31 = vld [vmem:[#allocation3 + $0x42] sm:$0xff] }
  0xb1   : > { %v661_v36 = vpop.permute.xlu1 %660  ;;  %v667_v38 = vpop.permute.xlu0 %666 }
  0xb2   : > { %750 = vst.msk [vmem:[#allocation4 + $0x38] sm:$0xff] %vm742_vm2, %v661_v36  ;;  %753 = vst.msk [vmem:[#allocation4 + $0x50] sm:$0xff] %vm742_vm2, %v667_v38 }
  0xb3   : > { %937 = vrot.lane.b32.xlu1 %v848_v34, %s3227_s29  ;;  %943 = vrot.lane.b32.xlu0 %v851_v37, %s3227_s29  ;;  %v1019_v34 = vld [vmem:[#allocation3 + $0x32] sm:$0xff]  ;;  %v1022_v37 = vld [vmem:[#allocation3 + $0x62] sm:$0xff] }
  0xb5   : > { %v665_v40 = vpop.permute.xlu1 %664  ;;  %v671_v44 = vpop.permute.xlu0 %670 }
  0xb6   : > { %752 = vst.msk [vmem:[#allocation4 + $0x48] sm:$0xff] %vm742_vm2, %v665_v40  ;;  %755 = vst.msk [vmem:[#allocation4 + $0x60] sm:$0xff] %vm742_vm2, %v671_v44  ;;  %v1023_v44 = vld [vmem:[#allocation3 + $0x72] sm:$0xff] }
  0xb7   : > { %941 = vrot.lane.b32.xlu1 %v850_v39, %s3227_s29  ;;  %947 = vrot.lane.b32.xlu0 %v853_v41, %s3227_s29  ;;  %v1021_v39 = vld [vmem:[#allocation3 + $0x52] sm:$0xff] }
  0xb9   : > { %v669_v58 = vpop.permute.xlu1 %668  ;;  %v675_v7 = vpop.permute.xlu0 %674 }
  0xba   : > { %754 = vst.msk [vmem:[#allocation4 + $0x58] sm:$0xff] %vm742_vm2, %v669_v58  ;;  %757 = vst.msk [vmem:[#allocation4 + $0x70] sm:$0xff] %vm742_vm2, %v675_v7 }
  0xbb   : > { %945 = vrot.lane.b32.xlu1 %v852_v47, %s3227_s29  ;;  %1032 = vrot.lane.b32.xlu0 %v1016_v2, %s3227_s29 }
  0xbd   : > { %v673_v20 = vpop.permute.xlu1 %672  ;;  %v679_v25 = vpop.permute.xlu0 %678 }
  0xbe   : > { %756 = vst.msk [vmem:[#allocation4 + $0x68] sm:$0xff] %vm742_vm2, %v673_v20  ;;  %759 = vst.msk [vmem:[#allocation4 + $0x80] sm:$0xff] %vm742_vm2, %v679_v25 }
  0xbf   : > { %949 = vrot.lane.b32.xlu1 %v854_v9, %s3227_s29  ;;  %1036 = vrot.lane.b32.xlu0 %v1018_v23, %s3227_s29 }
  0xc1   : > { %v677_v29 = vpop.permute.xlu1 %676  ;;  %v683_v33 = vpop.permute.xlu0 %682 }
  0xc2   : > { %758 = vst.msk [vmem:[#allocation4 + $0x78] sm:$0xff] %vm742_vm2, %v677_v29  ;;  %761 = vst.msk [vmem:[#allocation4 + $0x90] sm:$0xff] %vm742_vm2, %v683_v33 }
  0xc3   : > { %1034 = vrot.lane.b32.xlu1 %v1017_v27, %s3227_s29  ;;  %1040 = vrot.lane.b32.xlu0 %v1020_v31, %s3227_s29 }
  0xc5   : > { %v681_v36 = vpop.permute.xlu1 %680  ;;  %v687_v38 = vpop.permute.xlu0 %686 }
  0xc6   : > { %760 = vst.msk [vmem:[#allocation4 + $0x88] sm:$0xff] %vm742_vm2, %v681_v36  ;;  %763 = vst.msk [vmem:[#allocation4 + $0xa0] sm:$0xff] %vm742_vm2, %v687_v38  ;;  %v1094_v36 = vld [vmem:[#allocation2 + $0x180] sm:$0xff] }
  0xc7   : > { %1038 = vrot.lane.b32.xlu1 %v1019_v34, %s3227_s29  ;;  %1044 = vrot.lane.b32.xlu0 %v1022_v37, %s3227_s29 }
  0xc9   : > { %v685_v40 = vpop.permute.xlu1 %684  ;;  %v691_v41 = vpop.permute.xlu0 %690 }
  0xca   : > { %762 = vst.msk [vmem:[#allocation4 + $0x98] sm:$0xff] %vm742_vm2, %v685_v40  ;;  %765 = vst.msk [vmem:[#allocation4 + $0xb0] sm:$0xff] %vm742_vm2, %v691_v41 }
  0xcb   : > { %1042 = vrot.lane.b32.xlu1 %v1021_v39, %s3227_s29  ;;  %1128 = vrot.lane.b32.xlu0 %v3555_v45, %s3228_s30 }
  0xcd   : > { %v689_v47 = vpop.permute.xlu1 %688  ;;  %v695_v58 = vpop.permute.xlu0 %694 }
  0xce   : > { %764 = vst.msk [vmem:[#allocation4 + $0xa8] sm:$0xff] %vm742_vm2, %v689_v47  ;;  %767 = vst.msk [vmem:[#allocation4 + $0xc0] sm:$0xff] %vm742_vm2, %v695_v58  ;;  %v1306_v58 = vld [vmem:[#allocation2 + $0x21] sm:$0xff] }
  0xcf   : > { %1046 = vrot.lane.b32.xlu1 %v1023_v44, %s3227_s29  ;;  %1132 = vrot.lane.b32.xlu0 %v3561_v46, %s3228_s30 }
  0xd1   : > { %v693_v2 = vpop.permute.xlu1 %692  ;;  %v699_v7 = vpop.permute.xlu0 %698 }
  0xd2   : > { %766 = vst.msk [vmem:[#allocation4 + $0xb8] sm:$0xff] %vm742_vm2, %v693_v2  ;;  %769 = vst.msk [vmem:[#allocation4 + $0xd0] sm:$0xff] %vm742_vm2, %v699_v7 }
  0xd3   : > { %1130 = vrot.lane.b32.xlu1 %v3565_v48, %s3228_s30  ;;  %1136 = vrot.lane.b32.xlu0 %v3570_v49, %s3228_s30 }
  0xd5   : > { %v697_v45 = vpop.permute.xlu1 %696  ;;  %v703_v9 = vpop.permute.xlu0 %702 }
  0xd6   : > { %768 = vst.msk [vmem:[#allocation4 + $0xc8] sm:$0xff] %vm742_vm2, %v697_v45  ;;  %771 = vst.msk [vmem:[#allocation4 + $0xe0] sm:$0xff] %vm742_vm2, %v703_v9  ;;  %v3946_v45 = vld [vmem:[#allocation2 + $0x39] sm:$0xff] }
  0xd7   : > { %1134 = vrot.lane.b32.xlu1 %v3572_v50, %s3228_s30  ;;  %1140 = vrot.lane.b32.xlu0 %v3578_v52, %s3228_s30 }
  0xd9   : > { %v701_v20 = vpop.permute.xlu1 %700  ;;  %v707_v48 = vpop.permute.xlu0 %706 }
  0xda   : > { %770 = vst.msk [vmem:[#allocation4 + $0xd8] sm:$0xff] %vm742_vm2, %v701_v20  ;;  %773 = vst.msk [vmem:[#allocation4 + $0xf0] sm:$0xff] %vm742_vm2, %v707_v48  ;;  %v3951_v20 = vld [vmem:[#allocation2 + $0x61] sm:$0xff] }
  0xdb   : > { %1138 = vrot.lane.b32.xlu1 %v3583_v53, %s3228_s30  ;;  %1144 = vrot.lane.b32.xlu0 %v3587_v55, %s3228_s30 }
  0xdd   : > { %v705_v49 = vpop.permute.xlu1 %704  ;;  %v792_v23 = vpop.permute.xlu0 %791 }
  0xde   : > { %772 = vst.msk [vmem:[#allocation4 + $0xe8] sm:$0xff] %vm742_vm2, %v705_v49  ;;  %815 = vst.msk [vmem:[#allocation5] sm:$0xff] %vm742_vm2, %v792_v23  ;;  %v3956_v49 = vld [vmem:[#allocation2 + $0x51] sm:$0xff] }
  0xdf   : > { %1142 = vrot.lane.b32.xlu1 %v3589_v56, %s3228_s30  ;;  %1148 = vrot.lane.b32.xlu0 %v3596_v57, %s3228_s30 }
  0xe1   : > { %v709_v52 = vpop.permute.xlu1 %708  ;;  %v796_v25 = vpop.permute.xlu0 %795 }
  0xe2   : > { %774 = vst.msk [vmem:[#allocation4 + $0xf8] sm:$0xff] %vm742_vm2, %v709_v52  ;;  %817 = vst.msk [vmem:[#allocation5 + $0x10] sm:$0xff] %vm742_vm2, %v796_v25  ;;  %v3961_v52 = vld [vmem:[#allocation2 + $0x79] sm:$0xff] }
  0xe3   : > { %1146 = vrot.lane.b32.xlu1 %v3600_v59, %s3228_s30  ;;  %1152 = vrot.lane.b32.xlu0 %v3605_v60, %s3228_s30 }
  0xe5   : > { %v794_v55 = vpop.permute.xlu1 %793  ;;  %v800_v56 = vpop.permute.xlu0 %799 }
  0xe6   : > { %816 = vst.msk [vmem:[#allocation5 + $0x8] sm:$0xff] %vm742_vm2, %v794_v55  ;;  %819 = vst.msk [vmem:[#allocation5 + $0x20] sm:$0xff] %vm742_vm2, %v800_v56  ;;  %v3966_v55 = vld [vmem:[#allocation2 + $0x69] sm:$0xff] }
  0xe7   : > { %1150 = vrot.lane.b32.xlu1 %v3607_v61, %s3228_s30  ;;  %1156 = vrot.lane.b32.xlu0 %v3613_v63, %s3228_s30 }
  0xe9   : > { %v798_v57 = vpop.permute.xlu1 %797  ;;  %v804_v59 = vpop.permute.xlu0 %803 }
  0xea   : > { %818 = vst.msk [vmem:[#allocation5 + $0x18] sm:$0xff] %vm742_vm2, %v798_v57  ;;  %821 = vst.msk [vmem:[#allocation5 + $0x30] sm:$0xff] %vm742_vm2, %v804_v59  ;;  %v3971_v57 = vld [vmem:[#allocation2 + $0x91] sm:$0xff] }
  0xeb   : > { %1154 = vrot.lane.b32.xlu1 %v3618_v1, %s3228_s30  ;;  %1160 = vrot.lane.b32.xlu0 %v3622_v3, %s3228_s30 }
  0xed   : > { %v802_v60 = vpop.permute.xlu1 %801  ;;  %v888_v61 = vpop.permute.xlu0 %887 }
  0xee   : > { %820 = vst.msk [vmem:[#allocation5 + $0x28] sm:$0xff] %vm742_vm2, %v802_v60  ;;  %v3976_v60 = vld [vmem:[#allocation2 + $0x81] sm:$0xff] }
  0xef   : > { %1158 = vrot.lane.b32.xlu1 %v3624_v4, %s3228_s30  ;;  %984 = vst.msk [vmem:[#allocation4] sm:$0xff] %vm983_vm3, %v888_v61  ;;  %1164 = vrot.lane.b32.xlu0 %v3631_v5, %s3228_s30 }
  0xf1   : > { %v806_v63 = vpop.permute.xlu1 %805  ;;  %v892_v1 = vpop.permute.xlu0 %891 }
  0xf2   : > { %822 = vst.msk [vmem:[#allocation5 + $0x38] sm:$0xff] %vm742_vm2, %v806_v63  ;;  %v3981_v63 = vld [vmem:[#allocation2 + $0xa9] sm:$0xff] }
  0xf3   : > { %1162 = vrot.lane.b32.xlu1 %v3633_v6, %s3228_s30  ;;  %986 = vst.msk [vmem:[#allocation4 + $0x10] sm:$0xff] %vm983_vm3, %v892_v1  ;;  %1168 = vrot.lane.b32.xlu0 %v3639_v8, %s3228_s30 }
  0xf5   : > { %v890_v3 = vpop.permute.xlu1 %889  ;;  %v896_v4 = vpop.permute.xlu0 %895 }
  0xf6   : > { %985 = vst.msk [vmem:[#allocation4 + $0x8] sm:$0xff] %vm983_vm3, %v890_v3  ;;  %988 = vst.msk [vmem:[#allocation4 + $0x20] sm:$0xff] %vm983_vm3, %v896_v4  ;;  %v3986_v3 = vld [vmem:[#allocation2 + $0x99] sm:$0xff] }
  0xf7   : > { %1166 = vrot.lane.b32.xlu1 %v3644_v10, %s3228_s30  ;;  %1172 = vrot.lane.b32.xlu0 %v3646_v11, %s3228_s30 }
  0xf9   : > { %v894_v27 = vpop.permute.xlu1 %893  ;;  %v900_v6 = vpop.permute.xlu0 %899 }
  0xfa   : > { %987 = vst.msk [vmem:[#allocation4 + $0x18] sm:$0xff] %vm983_vm3, %v894_v27  ;;  %990 = vst.msk [vmem:[#allocation4 + $0x30] sm:$0xff] %vm983_vm3, %v900_v6  ;;  %v1319_v27 = vld [vmem:[#allocation2 + $0xc1] sm:$0xff] }
  0xfb   : > { %1170 = vrot.lane.b32.xlu1 %v3652_v13, %s3228_s30  ;;  %1176 = vrot.lane.b32.xlu0 %v3654_v14, %s3228_s30 }
  0xfd   : > { %v898_v29 = vpop.permute.xlu1 %897  ;;  %v904_v31 = vpop.permute.xlu0 %903 }
  0xfe   : > { %989 = vst.msk [vmem:[#allocation4 + $0x28] sm:$0xff] %vm983_vm3, %v898_v29  ;;  %992 = vst.msk [vmem:[#allocation4 + $0x40] sm:$0xff] %vm983_vm3, %v904_v31  ;;  %v3994_v29 = vld [vmem:[#allocation2 + $0xb1] sm:$0xff] }
  0xff   : > { %1174 = vrot.lane.b32.xlu1 %v3656_v15, %s3228_s30  ;;  %1180 = vrot.lane.b32.xlu0 %v3665_v16, %s3228_s30 }
 0x101   : > { %v902_v33 = vpop.permute.xlu1 %901  ;;  %v908_v34 = vpop.permute.xlu0 %907 }
 0x102   : > { %991 = vst.msk [vmem:[#allocation4 + $0x38] sm:$0xff] %vm983_vm3, %v902_v33  ;;  %994 = vst.msk [vmem:[#allocation4 + $0x50] sm:$0xff] %vm983_vm3, %v908_v34  ;;  %v1321_v33 = vld [vmem:[#allocation2 + $0xd9] sm:$0xff] }
 0x103   : > { %1178 = vrot.lane.b32.xlu1 %v3667_v17, %s3228_s30  ;;  %1184 = vrot.lane.b32.xlu0 %v3669_v18, %s3228_s30  ;;  %v1095_v18 = vld [vmem:[#allocation2 + $0x188] sm:$0xff] }
 0x105   : > { %v906_v14 = vpop.permute.xlu1 %905  ;;  %v912_v37 = vpop.permute.xlu0 %911 }
 0x106   : > { %993 = vst.msk [vmem:[#allocation4 + $0x48] sm:$0xff] %vm983_vm3, %v906_v14  ;;  %996 = vst.msk [vmem:[#allocation4 + $0x60] sm:$0xff] %vm983_vm3, %v912_v37  ;;  %v1320_v14 = vld [vmem:[#allocation2 + $0xc9] sm:$0xff]  ;;  %v4003_v37 = vld [vmem:[#allocation2 + $0xf1] sm:$0xff] }
 0x107   : > { %1182 = vrot.lane.b32.xlu1 %v3677_v19, %s3228_s30  ;;  %1188 = vrot.lane.b32.xlu0 %v1094_v36, %s3228_s30 }
 0x109   : > { %v910_v16 = vpop.permute.xlu1 %909  ;;  %v916_v38 = vpop.permute.xlu0 %915 }
 0x10a   : > { %995 = vst.msk [vmem:[#allocation4 + $0x58] sm:$0xff] %vm983_vm3, %v910_v16  ;;  %998 = vst.msk [vmem:[#allocation4 + $0x70] sm:$0xff] %vm983_vm3, %v916_v38  ;;  %v1322_v38 = vld [vmem:[#allocation2 + $0xe1] sm:$0xff] }
 0x10b   : > { %1186 = vrot.lane.b32.xlu1 %v3679_v21, %s3228_s30  ;;  %1273 = vrot.lane.b32.xlu0 %v3691_v24, %s3228_s30 }
 0x10d   : > { %v914_v39 = vpop.permute.xlu1 %913  ;;  %v920_v19 = vpop.permute.xlu0 %919 }
 0x10e   : > { %997 = vst.msk [vmem:[#allocation4 + $0x68] sm:$0xff] %vm983_vm3, %v914_v39  ;;  %1000 = vst.msk [vmem:[#allocation4 + $0x80] sm:$0xff] %vm983_vm3, %v920_v19  ;;  %v4010_v39 = vld [vmem:[#allocation2 + $0x109] sm:$0xff] }
 0x10f   : > { %1190 = vrot.lane.b32.xlu1 %v1095_v18, %s3228_s30  ;;  %1277 = vrot.lane.b32.xlu0 %v3701_v28, %s3228_s30 }
 0x111   : > { %v918_v40 = vpop.permute.xlu1 %917  ;;  %v924_v21 = vpop.permute.xlu0 %923 }
 0x112   : > { %999 = vst.msk [vmem:[#allocation4 + $0x78] sm:$0xff] %vm983_vm3, %v918_v40  ;;  %1002 = vst.msk [vmem:[#allocation4 + $0x90] sm:$0xff] %vm983_vm3, %v924_v21  ;;  %v1324_v40 = vld [vmem:[#allocation2 + $0xf9] sm:$0xff] }
 0x113   : > { %1275 = vrot.lane.b32.xlu1 %v3687_v22, %s3228_s30  ;;  %1281 = vrot.lane.b32.xlu0 %v3711_v32, %s3228_s30  ;;  %v1305_v22 = vld [vmem:[#allocation2 + $0x19] sm:$0xff]  ;;  %v1264_v32 = vld [vmem:[#allocation3 + $0x80] sm:$0xff] }
 0x115   : > { %v922_v24 = vpop.permute.xlu1 %921  ;;  %v928_v41 = vpop.permute.xlu0 %927 }
 0x116   : > { %1001 = vst.msk [vmem:[#allocation4 + $0x88] sm:$0xff] %vm983_vm3, %v922_v24  ;;  %1004 = vst.msk [vmem:[#allocation4 + $0xa0] sm:$0xff] %vm983_vm3, %v928_v41  ;;  %v4017_v24 = vld [vmem:[#allocation2 + $0x121] sm:$0xff] }
 0x117   : > { %1279 = vrot.lane.b32.xlu1 %v3697_v26, %s3228_s30  ;;  %1285 = vrot.lane.b32.xlu0 %v3717_v35, %s3228_s30  ;;  %v3935_v26 = vld [vmem:[#allocation2 + $0x31] sm:$0xff] }
 0x119   : > { %v926_v28 = vpop.permute.xlu1 %925  ;;  %v932_v44 = vpop.permute.xlu0 %931 }
 0x11a   : > { %1003 = vst.msk [vmem:[#allocation4 + $0x98] sm:$0xff] %vm983_vm3, %v926_v28  ;;  %1006 = vst.msk [vmem:[#allocation4 + $0xb0] sm:$0xff] %vm983_vm3, %v932_v44  ;;  %v4021_v28 = vld [vmem:[#allocation2 + $0x111] sm:$0xff]  ;;  %v4026_v44 = vld [vmem:[#allocation2 + $0x139] sm:$0xff] }
 0x11b   : > { %1283 = vrot.lane.b32.xlu1 %v3707_v30, %s3228_s30  ;;  %1369 = vrot.lane.b32.xlu0 %v1305_v22, %s3229_s7  ;;  %v3942_v30 = vld [vmem:[#allocation2 + $0x49] sm:$0xff] }
 0x11d   : > { %v930_v47 = vpop.permute.xlu1 %929  ;;  %v936_v35 = vpop.permute.xlu0 %935 }
 0x11e   : > { %1005 = vst.msk [vmem:[#allocation4 + $0xa8] sm:$0xff] %vm983_vm3, %v930_v47  ;;  %1008 = vst.msk [vmem:[#allocation4 + $0xc0] sm:$0xff] %vm983_vm3, %v936_v35  ;;  %v4031_v47 = vld [vmem:[#allocation2 + $0x129] sm:$0xff] }
 0x11f   : > { %1287 = vrot.lane.b32.xlu1 %v1264_v32, %s3228_s30  ;;  %1373 = vrot.lane.b32.xlu0 %v3935_v26, %s3229_s7 }
 0x121   : > { %v934_v2 = vpop.permute.xlu1 %933  ;;  %v940_v7 = vpop.permute.xlu0 %939 }
 0x122   : > { %1007 = vst.msk [vmem:[#allocation4 + $0xb8] sm:$0xff] %vm983_vm3, %v934_v2  ;;  %1010 = vst.msk [vmem:[#allocation4 + $0xd0] sm:$0xff] %vm983_vm3, %v940_v7 }
 0x123   : > { %1371 = vrot.lane.b32.xlu1 %v1306_v58, %s3229_s7  ;;  %1377 = vrot.lane.b32.xlu0 %v3942_v30, %s3229_s7 }
 0x125   : > { %v938_v9 = vpop.permute.xlu1 %937  ;;  %v944_v48 = vpop.permute.xlu0 %943 }
 0x126   : > { %1009 = vst.msk [vmem:[#allocation4 + $0xc8] sm:$0xff] %vm983_vm3, %v938_v9  ;;  %1012 = vst.msk [vmem:[#allocation4 + $0xe0] sm:$0xff] %vm983_vm3, %v944_v48 }
 0x127   : > { %1375 = vrot.lane.b32.xlu1 %v3946_v45, %s3229_s7  ;;  %1381 = vrot.lane.b32.xlu0 %v3951_v20, %s3229_s7 }
 0x129   : > { %v942_v23 = vpop.permute.xlu1 %941  ;;  %v948_v25 = vpop.permute.xlu0 %947 }
 0x12a   : > { %1011 = vst.msk [vmem:[#allocation4 + $0xd8] sm:$0xff] %vm983_vm3, %v942_v23  ;;  %1014 = vst.msk [vmem:[#allocation4 + $0xf0] sm:$0xff] %vm983_vm3, %v948_v25  ;;  %v2272_v25 = vld [vmem:[#allocation2 + $0x3a] sm:$0xff] }
 0x12b   : > { %1379 = vrot.lane.b32.xlu1 %v3956_v49, %s3229_s7  ;;  %1385 = vrot.lane.b32.xlu0 %v3961_v52, %s3229_s7 }
 0x12d   : > { %v946_v56 = vpop.permute.xlu1 %945  ;;  %v1033_v59 = vpop.permute.xlu0 %1032 }
 0x12e   : > { %1013 = vst.msk [vmem:[#allocation4 + $0xe8] sm:$0xff] %vm983_vm3, %v946_v56  ;;  %1056 = vst.msk [vmem:[#allocation5] sm:$0xff] %vm983_vm3, %v1033_v59  ;;  %v2271_v56 = vld [vmem:[#allocation2 + $0x32] sm:$0xff] }
 0x12f   : > { %1383 = vrot.lane.b32.xlu1 %v3966_v55, %s3229_s7  ;;  %1389 = vrot.lane.b32.xlu0 %v3971_v57, %s3229_s7 }
 0x131   : > { %v950_v61 = vpop.permute.xlu1 %949  ;;  %v1037_v1 = vpop.permute.xlu0 %1036 }
 0x132   : > { %1015 = vst.msk [vmem:[#allocation4 + $0xf8] sm:$0xff] %vm983_vm3, %v950_v61  ;;  %1058 = vst.msk [vmem:[#allocation5 + $0x10] sm:$0xff] %vm983_vm3, %v1037_v1 }
 0x133   : > { %1387 = vrot.lane.b32.xlu1 %v3976_v60, %s3229_s7  ;;  %1393 = vrot.lane.b32.xlu0 %v3981_v63, %s3229_s7 }
 0x135   : > { %v1035_v4 = vpop.permute.xlu1 %1034  ;;  %v1041_v6 = vpop.permute.xlu0 %1040 }
 0x136   : > { %1057 = vst.msk [vmem:[#allocation5 + $0x8] sm:$0xff] %vm983_vm3, %v1035_v4  ;;  %1060 = vst.msk [vmem:[#allocation5 + $0x20] sm:$0xff] %vm983_vm3, %v1041_v6 }
 0x137   : > { %1391 = vrot.lane.b32.xlu1 %v3986_v3, %s3229_s7  ;;  %1397 = vrot.lane.b32.xlu0 %v1319_v27, %s3229_s7 }
 0x139   : > { %v1039_v31 = vpop.permute.xlu1 %1038  ;;  %v1045_v34 = vpop.permute.xlu0 %1044 }
 0x13a   : > { %1059 = vst.msk [vmem:[#allocation5 + $0x18] sm:$0xff] %vm983_vm3, %v1039_v31  ;;  %1062 = vst.msk [vmem:[#allocation5 + $0x30] sm:$0xff] %vm983_vm3, %v1045_v34  ;;  %v2290_v34 = vld [vmem:[#allocation2 + $0x112] sm:$0xff] }
 0x13b   : > { %1395 = vrot.lane.b32.xlu1 %v3994_v29, %s3229_s7  ;;  %1401 = vrot.lane.b32.xlu0 %v1321_v33, %s3229_s7 }
 0x13d   : > { %v1043_v36 = vpop.permute.xlu1 %1042  ;;  %v1129_v16 = vpop.permute.xlu0 %1128 }
 0x13e   : > { %1061 = vst.msk [vmem:[#allocation5 + $0x28] sm:$0xff] %vm983_vm3, %v1043_v36  ;;  %v2289_v36 = vld [vmem:[#allocation2 + $0x10a] sm:$0xff] }
 0x13f   : > { %1399 = vrot.lane.b32.xlu1 %v1320_v14, %s3229_s7  ;;  %1225 = vst.msk [vmem:[#allocation4] sm:$0xff] %vm1224_vm4, %v1129_v16  ;;  %1405 = vrot.lane.b32.xlu0 %v4003_v37, %s3229_s7  ;;  %v2274_v16 = vld [vmem:[#allocation2 + $0x52] sm:$0xff] }
 0x141   : > { %v1047_v18 = vpop.permute.xlu1 %1046  ;;  %v1133_v19 = vpop.permute.xlu0 %1132 }
 0x142   : > { %1063 = vst.msk [vmem:[#allocation5 + $0x38] sm:$0xff] %vm983_vm3, %v1047_v18 }
 0x143   : > { %1403 = vrot.lane.b32.xlu1 %v1322_v38, %s3229_s7  ;;  %1227 = vst.msk [vmem:[#allocation4 + $0x10] sm:$0xff] %vm1224_vm4, %v1133_v19  ;;  %1409 = vrot.lane.b32.xlu0 %v4010_v39, %s3229_s7 }
 0x145   : > { %v1131_v21 = vpop.permute.xlu1 %1130  ;;  %v1137_v41 = vpop.permute.xlu0 %1136 }
 0x146   : > { %1226 = vst.msk [vmem:[#allocation4 + $0x8] sm:$0xff] %vm1224_vm4, %v1131_v21  ;;  %1229 = vst.msk [vmem:[#allocation4 + $0x20] sm:$0xff] %vm1224_vm4, %v1137_v41 }
 0x147   : > { %1407 = vrot.lane.b32.xlu1 %v1324_v40, %s3229_s7  ;;  %1413 = vrot.lane.b32.xlu0 %v4017_v24, %s3229_s7 }
 0x149   : > { %v1135_v22 = vpop.permute.xlu1 %1134  ;;  %v1141_v32 = vpop.permute.xlu0 %1140 }
 0x14a   : > { %1228 = vst.msk [vmem:[#allocation4 + $0x18] sm:$0xff] %vm1224_vm4, %v1135_v22  ;;  %1231 = vst.msk [vmem:[#allocation4 + $0x30] sm:$0xff] %vm1224_vm4, %v1141_v32  ;;  %v1792_v32 = vld [vmem:[#allocation2 + $0x60] sm:$0xff] }
 0x14b   : > { %1411 = vrot.lane.b32.xlu1 %v4021_v28, %s3229_s7  ;;  %1417 = vrot.lane.b32.xlu0 %v4026_v44, %s3229_s7 }
 0x14d   : > { %v1139_v35 = vpop.permute.xlu1 %1138  ;;  %v1145_v58 = vpop.permute.xlu0 %1144 }
 0x14e   : > { %1230 = vst.msk [vmem:[#allocation4 + $0x28] sm:$0xff] %vm1224_vm4, %v1139_v35  ;;  %1233 = vst.msk [vmem:[#allocation4 + $0x40] sm:$0xff] %vm1224_vm4, %v1145_v58 }
 0x14f   : > { %1415 = vrot.lane.b32.xlu1 %v4031_v47, %s3229_s7  ;;  %1644 = vrot.lane.b32.xlu0 %v3769_v62, %s3230_s8 }
 0x151   : > { %v1143_v2 = vpop.permute.xlu1 %1142  ;;  %v1149_v7 = vpop.permute.xlu0 %1148 }
 0x152   : > { %1232 = vst.msk [vmem:[#allocation4 + $0x38] sm:$0xff] %vm1224_vm4, %v1143_v2  ;;  %1235 = vst.msk [vmem:[#allocation4 + $0x50] sm:$0xff] %vm1224_vm4, %v1149_v7  ;;  %v2292_v7 = vld [vmem:[#allocation2 + $0x12a] sm:$0xff] }
 0x153   : > { %1642 = vrot.lane.b32.xlu1 %v3759_v43, %s3230_s8  ;;  %1612 = vrot.lane.b32.xlu0 %v3736_v51, %s3230_s8 }
 0x155   : > { %v1147_v9 = vpop.permute.xlu1 %1146  ;;  %v1153_v48 = vpop.permute.xlu0 %1152 }
 0x156   : > { %1234 = vst.msk [vmem:[#allocation4 + $0x48] sm:$0xff] %vm1224_vm4, %v1147_v9  ;;  %1237 = vst.msk [vmem:[#allocation4 + $0x60] sm:$0xff] %vm1224_vm4, %v1153_v48 }
 0x157   : > { %1610 = vrot.lane.b32.xlu1 %v3728_v42, %s3230_s8  ;;  %1886 = vrot.lane.b32.xlu0 %v3644_v10, %s3231_s9 }
 0x159   : > { %v1151_v62 = vpop.permute.xlu1 %1150  ;;  %v1157_v43 = vpop.permute.xlu0 %1156 }
 0x15a   : > { %1236 = vst.msk [vmem:[#allocation4 + $0x58] sm:$0xff] %vm1224_vm4, %v1151_v62  ;;  %1239 = vst.msk [vmem:[#allocation4 + $0x70] sm:$0xff] %vm1224_vm4, %v1157_v43 }
 0x15b   : > { %1884 = vrot.lane.b32.xlu1 %v3631_v5, %s3231_s9  ;;  %1854 = vrot.lane.b32.xlu0 %v3572_v50, %s3231_s9 }
 0x15d   : > { %v1155_v51 = vpop.permute.xlu1 %1154  ;;  %v1161_v42 = vpop.permute.xlu0 %1160 }
 0x15e   : > { %1238 = vst.msk [vmem:[#allocation4 + $0x68] sm:$0xff] %vm1224_vm4, %v1155_v51  ;;  %1241 = vst.msk [vmem:[#allocation4 + $0x80] sm:$0xff] %vm1224_vm4, %v1161_v42 }
 0x15f   : > { %1852 = vrot.lane.b32.xlu1 %v3561_v46, %s3231_s9  ;;  %2128 = vrot.lane.b32.xlu0 %v1324_v40, %s3232_s10 }
 0x161   : > { %v1159_v10 = vpop.permute.xlu1 %1158  ;;  %v1165_v5 = vpop.permute.xlu0 %1164 }
 0x162   : > { %1240 = vst.msk [vmem:[#allocation4 + $0x78] sm:$0xff] %vm1224_vm4, %v1159_v10  ;;  %1243 = vst.msk [vmem:[#allocation4 + $0x90] sm:$0xff] %vm1224_vm4, %v1165_v5 }
 0x163   : > { %2126 = vrot.lane.b32.xlu1 %v4003_v37, %s3232_s10  ;;  %2096 = vrot.lane.b32.xlu0 %v3946_v45, %s3232_s10 }
 0x165   : > { %v1163_v50 = vpop.permute.xlu1 %1162  ;;  %v1169_v46 = vpop.permute.xlu0 %1168 }
 0x166   : > { %1242 = vst.msk [vmem:[#allocation4 + $0x88] sm:$0xff] %vm1224_vm4, %v1163_v50  ;;  %1245 = vst.msk [vmem:[#allocation4 + $0xa0] sm:$0xff] %vm1224_vm4, %v1169_v46  ;;  %v1810_v50 = vld [vmem:[#allocation2 + $0x138] sm:$0xff] }
 0x167   : > { %2094 = vrot.lane.b32.xlu1 %v3935_v26, %s3232_s10  ;;  %2369 = vrot.lane.b32.xlu0 %v3777_v12, %s3233_s11 }
 0x169   : > { %v1167_v23 = vpop.permute.xlu1 %1166  ;;  %v1173_v45 = vpop.permute.xlu0 %1172 }
 0x16a   : > { %1244 = vst.msk [vmem:[#allocation4 + $0x98] sm:$0xff] %vm1224_vm4, %v1167_v23  ;;  %1247 = vst.msk [vmem:[#allocation4 + $0xb0] sm:$0xff] %vm1224_vm4, %v1173_v45  ;;  %v1795_v23 = vld [vmem:[#allocation2 + $0x80] sm:$0xff]  ;;  %v1794_v45 = vld [vmem:[#allocation2 + $0x78] sm:$0xff] }
 0x16b   : > { %2367 = vrot.lane.b32.xlu1 %v3765_v54, %s3233_s11  ;;  %2337 = vrot.lane.b32.xlu0 %v2272_v25, %s3233_s11 }
 0x16d   : > { %v1171_v59 = vpop.permute.xlu1 %1170  ;;  %v1177_v26 = vpop.permute.xlu0 %1176 }
 0x16e   : > { %1246 = vst.msk [vmem:[#allocation4 + $0xa8] sm:$0xff] %vm1224_vm4, %v1171_v59  ;;  %1249 = vst.msk [vmem:[#allocation4 + $0xc0] sm:$0xff] %vm1224_vm4, %v1177_v26  ;;  %v2053_v59 = vld [vmem:[#allocation2 + $0x141] sm:$0xff] }
 0x16f   : > { %2335 = vrot.lane.b32.xlu1 %v2271_v56, %s3233_s11  ;;  %1648 = vrot.lane.b32.xlu0 %v3777_v12, %s3230_s8  ;;  %v1790_v12 = vld [vmem:[#allocation2 + $0x48] sm:$0xff] }
 0x171   : > { %v1175_v61 = vpop.permute.xlu1 %1174  ;;  %v1181_v1 = vpop.permute.xlu0 %1180 }
 0x172   : > { %1248 = vst.msk [vmem:[#allocation4 + $0xb8] sm:$0xff] %vm1224_vm4, %v1175_v61  ;;  %1251 = vst.msk [vmem:[#allocation4 + $0xd0] sm:$0xff] %vm1224_vm4, %v1181_v1 }
 0x173   : > { %1646 = vrot.lane.b32.xlu1 %v3765_v54, %s3230_s8  ;;  %1616 = vrot.lane.b32.xlu0 %v2272_v25, %s3230_s8 }
 0x175   : > { %v1179_v4 = vpop.permute.xlu1 %1178  ;;  %v1185_v27 = vpop.permute.xlu0 %1184 }
 0x176   : > { %1250 = vst.msk [vmem:[#allocation4 + $0xc8] sm:$0xff] %vm1224_vm4, %v1179_v4  ;;  %1253 = vst.msk [vmem:[#allocation4 + $0xe0] sm:$0xff] %vm1224_vm4, %v1185_v27  ;;  %v2294_v4 = vld [vmem:[#allocation2 + $0x142] sm:$0xff] }
 0x177   : > { %1614 = vrot.lane.b32.xlu1 %v2271_v56, %s3230_s8  ;;  %1890 = vrot.lane.b32.xlu0 %v3652_v13, %s3231_s9 }
 0x179   : > { %v1183_v6 = vpop.permute.xlu1 %1182  ;;  %v1189_v54 = vpop.permute.xlu0 %1188 }
 0x17a   : > { %1252 = vst.msk [vmem:[#allocation4 + $0xd8] sm:$0xff] %vm1224_vm4, %v1183_v6  ;;  %1255 = vst.msk [vmem:[#allocation4 + $0xf0] sm:$0xff] %vm1224_vm4, %v1189_v54  ;;  %v2293_v6 = vld [vmem:[#allocation2 + $0x13a] sm:$0xff] }
 0x17b   : > { %1888 = vrot.lane.b32.xlu1 %v3639_v8, %s3231_s9  ;;  %1858 = vrot.lane.b32.xlu0 %v3583_v53, %s3231_s9 }
 0x17d   : > { %v1187_v31 = vpop.permute.xlu1 %1186  ;;  %v1274_v33 = vpop.permute.xlu0 %1273 }
 0x17e   : > { %1254 = vst.msk [vmem:[#allocation4 + $0xe8] sm:$0xff] %vm1224_vm4, %v1187_v31  ;;  %1297 = vst.msk [vmem:[#allocation5] sm:$0xff] %vm1224_vm4, %v1274_v33 }
 0x17f   : > { %1856 = vrot.lane.b32.xlu1 %v1790_v12, %s3231_s9  ;;  %2132 = vrot.lane.b32.xlu0 %v4021_v28, %s3232_s10  ;;  %v1793_v28 = vld [vmem:[#allocation2 + $0x68] sm:$0xff]  ;;  %v2277_v12 = vld [vmem:[#allocation2 + $0x7a] sm:$0xff] }
 0x181   : > { %v1191_v13 = vpop.permute.xlu1 %1190  ;;  %v1278_v8 = vpop.permute.xlu0 %1277 }
 0x182   : > { %1256 = vst.msk [vmem:[#allocation4 + $0xf8] sm:$0xff] %vm1224_vm4, %v1191_v13  ;;  %1299 = vst.msk [vmem:[#allocation5 + $0x10] sm:$0xff] %vm1224_vm4, %v1278_v8 }
 0x183   : > { %2130 = vrot.lane.b32.xlu1 %v4010_v39, %s3232_s10  ;;  %2100 = vrot.lane.b32.xlu0 %v3956_v49, %s3232_s10  ;;  %v2273_v49 = vld [vmem:[#allocation2 + $0x4a] sm:$0xff] }
 0x185   : > { %v1276_v53 = vpop.permute.xlu1 %1275  ;;  %v1282_v14 = vpop.permute.xlu0 %1281 }
 0x186   : > { %1298 = vst.msk [vmem:[#allocation5 + $0x8] sm:$0xff] %vm1224_vm4, %v1276_v53  ;;  %1301 = vst.msk [vmem:[#allocation5 + $0x20] sm:$0xff] %vm1224_vm4, %v1282_v14  ;;  %v1812_v53 = vld [vmem:[#allocation2 + $0x150] sm:$0xff] }
 0x187   : > { %2098 = vrot.lane.b32.xlu1 %v3942_v30, %s3232_s10  ;;  %2373 = vrot.lane.b32.xlu0 %v2290_v34, %s3233_s11 }
 0x189   : > { %v1280_v37 = vpop.permute.xlu1 %1279  ;;  %v1286_v38 = vpop.permute.xlu0 %1285 }
 0x18a   : > { %1300 = vst.msk [vmem:[#allocation5 + $0x18] sm:$0xff] %vm1224_vm4, %v1280_v37  ;;  %1303 = vst.msk [vmem:[#allocation5 + $0x30] sm:$0xff] %vm1224_vm4, %v1286_v38 }
 0x18b   : > { %2371 = vrot.lane.b32.xlu1 %v2289_v36, %s3233_s11  ;;  %2341 = vrot.lane.b32.xlu0 %v2274_v16, %s3233_s11 }
 0x18d   : > { %v1284_v18 = vpop.permute.xlu1 %1283  ;;  %v1370_v30 = vpop.permute.xlu0 %1369 }
 0x18e   : > { %1302 = vst.msk [vmem:[#allocation5 + $0x28] sm:$0xff] %vm1224_vm4, %v1284_v18 }
 0x18f   : > { %2339 = vrot.lane.b32.xlu1 %v2273_v49, %s3233_s11  ;;  %1466 = vst.msk [vmem:[#allocation4] sm:$0xff] %vm1465_vm5, %v1370_v30  ;;  %1652 = vrot.lane.b32.xlu0 %v2290_v34, %s3230_s8  ;;  %v1797_v30 = vld [vmem:[#allocation2 + $0x98] sm:$0xff] }
 0x191   : > { %v1288_v39 = vpop.permute.xlu1 %1287  ;;  %v1374_v19 = vpop.permute.xlu0 %1373 }
 0x192   : > { %1304 = vst.msk [vmem:[#allocation5 + $0x38] sm:$0xff] %vm1224_vm4, %v1288_v39 }
 0x193   : > { %1650 = vrot.lane.b32.xlu1 %v2289_v36, %s3230_s8  ;;  %1468 = vst.msk [vmem:[#allocation4 + $0x10] sm:$0xff] %vm1465_vm5, %v1374_v19  ;;  %1620 = vrot.lane.b32.xlu0 %v2274_v16, %s3230_s8  ;;  %v1796_v36 = vld [vmem:[#allocation2 + $0x90] sm:$0xff]  ;;  %v1813_v16 = vld [vmem:[#allocation2 + $0x158] sm:$0xff]  ;;  %v1498_v19 = vld [vmem:[#allocation3 + $0x11] sm:$0xff] }
 0x195   : > { %v1372_v40 = vpop.permute.xlu1 %1371  ;;  %v1378_v21 = vpop.permute.xlu0 %1377 }
 0x196   : > { %1467 = vst.msk [vmem:[#allocation4 + $0x8] sm:$0xff] %vm1465_vm5, %v1372_v40  ;;  %1470 = vst.msk [vmem:[#allocation4 + $0x20] sm:$0xff] %vm1465_vm5, %v1378_v21 }
 0x197   : > { %1618 = vrot.lane.b32.xlu1 %v2273_v49, %s3230_s8  ;;  %1894 = vrot.lane.b32.xlu0 %v3656_v15, %s3231_s9  ;;  %v4213_v49 = vld [vmem:[#allocation2 + $0x151] sm:$0xff] }
 0x199   : > { %v1376_v41 = vpop.permute.xlu1 %1375  ;;  %v1382_v22 = vpop.permute.xlu0 %1381 }
 0x19a   : > { %1469 = vst.msk [vmem:[#allocation4 + $0x18] sm:$0xff] %vm1465_vm5, %v1376_v41  ;;  %1472 = vst.msk [vmem:[#allocation4 + $0x30] sm:$0xff] %vm1465_vm5, %v1382_v22  ;;  %v4222_v41 = vld [vmem:[#allocation2 + $0x159] sm:$0xff] }
 0x19b   : > { %1892 = vrot.lane.b32.xlu1 %v3646_v11, %s3231_s9  ;;  %1862 = vrot.lane.b32.xlu0 %v1793_v28, %s3231_s9 }
 0x19d   : > { %v1380_v35 = vpop.permute.xlu1 %1379  ;;  %v1386_v58 = vpop.permute.xlu0 %1385 }
 0x19e   : > { %1471 = vst.msk [vmem:[#allocation4 + $0x28] sm:$0xff] %vm1465_vm5, %v1380_v35  ;;  %1474 = vst.msk [vmem:[#allocation4 + $0x40] sm:$0xff] %vm1465_vm5, %v1386_v58 }
 0x19f   : > { %1860 = vrot.lane.b32.xlu1 %v1792_v32, %s3231_s9  ;;  %2136 = vrot.lane.b32.xlu0 %v4031_v47, %s3232_s10  ;;  %v2291_v47 = vld [vmem:[#allocation2 + $0x122] sm:$0xff] }
 0x1a1   : > { %v1384_v15 = vpop.permute.xlu1 %1383  ;;  %v1390_v11 = vpop.permute.xlu0 %1389 }
 0x1a2   : > { %1473 = vst.msk [vmem:[#allocation4 + $0x38] sm:$0xff] %vm1465_vm5, %v1384_v15  ;;  %1476 = vst.msk [vmem:[#allocation4 + $0x50] sm:$0xff] %vm1465_vm5, %v1390_v11  ;;  %v1499_v11 = vld [vmem:[#allocation3 + $0x21] sm:$0xff] }
 0x1a3   : > { %2134 = vrot.lane.b32.xlu1 %v4017_v24, %s3232_s10  ;;  %2104 = vrot.lane.b32.xlu0 %v3966_v55, %s3232_s10  ;;  %v2276_v24 = vld [vmem:[#allocation2 + $0x6a] sm:$0xff]  ;;  %v2275_v55 = vld [vmem:[#allocation2 + $0x62] sm:$0xff] }
 0x1a5   : > { %v1388_v2 = vpop.permute.xlu1 %1387  ;;  %v1394_v9 = vpop.permute.xlu0 %1393 }
 0x1a6   : > { %1475 = vst.msk [vmem:[#allocation4 + $0x48] sm:$0xff] %vm1465_vm5, %v1388_v2  ;;  %1478 = vst.msk [vmem:[#allocation4 + $0x60] sm:$0xff] %vm1465_vm5, %v1394_v9 }
 0x1a7   : > { %2102 = vrot.lane.b32.xlu1 %v3951_v20, %s3232_s10  ;;  %2377 = vrot.lane.b32.xlu0 %v2292_v7, %s3233_s11 }
 0x1a9   : > { %v1392_v48 = vpop.permute.xlu1 %1391  ;;  %v1398_v62 = vpop.permute.xlu0 %1397 }
 0x1aa   : > { %1477 = vst.msk [vmem:[#allocation4 + $0x58] sm:$0xff] %vm1465_vm5, %v1392_v48  ;;  %1480 = vst.msk [vmem:[#allocation4 + $0x70] sm:$0xff] %vm1465_vm5, %v1398_v62 }
 0x1ab   : > { %2375 = vrot.lane.b32.xlu1 %v2291_v47, %s3233_s11  ;;  %2345 = vrot.lane.b32.xlu0 %v2276_v24, %s3233_s11 }
 0x1ad   : > { %v1396_v43 = vpop.permute.xlu1 %1395  ;;  %v1402_v20 = vpop.permute.xlu0 %1401 }
 0x1ae   : > { %1479 = vst.msk [vmem:[#allocation4 + $0x68] sm:$0xff] %vm1465_vm5, %v1396_v43  ;;  %1482 = vst.msk [vmem:[#allocation4 + $0x80] sm:$0xff] %vm1465_vm5, %v1402_v20  ;;  %v2279_v20 = vld [vmem:[#allocation2 + $0x92] sm:$0xff] }
 0x1af   : > { %2343 = vrot.lane.b32.xlu1 %v2275_v55, %s3233_s11  ;;  %1656 = vrot.lane.b32.xlu0 %v2292_v7, %s3230_s8 }
 0x1b1   : > { %v1400_v51 = vpop.permute.xlu1 %1399  ;;  %v1406_v42 = vpop.permute.xlu0 %1405 }
 0x1b2   : > { %1481 = vst.msk [vmem:[#allocation4 + $0x78] sm:$0xff] %vm1465_vm5, %v1400_v51  ;;  %1484 = vst.msk [vmem:[#allocation4 + $0x90] sm:$0xff] %vm1465_vm5, %v1406_v42  ;;  %v1740_v42 = vld [vmem:[#allocation3 + $0x22] sm:$0xff] }
 0x1b3   : > { %1654 = vrot.lane.b32.xlu1 %v2291_v47, %s3230_s8  ;;  %1624 = vrot.lane.b32.xlu0 %v2276_v24, %s3230_s8  ;;  %v4240_v47 = vld [vmem:[#allocation2 + $0x152] sm:$0xff] }
 0x1b5   : > { %v1404_v10 = vpop.permute.xlu1 %1403  ;;  %v1410_v5 = vpop.permute.xlu0 %1409 }
 0x1b6   : > { %1483 = vst.msk [vmem:[#allocation4 + $0x88] sm:$0xff] %vm1465_vm5, %v1404_v10  ;;  %1486 = vst.msk [vmem:[#allocation4 + $0xa0] sm:$0xff] %vm1465_vm5, %v1410_v5 }
 0x1b7   : > { %1622 = vrot.lane.b32.xlu1 %v2275_v55, %s3230_s8  ;;  %1898 = vrot.lane.b32.xlu0 %v3667_v17, %s3231_s9  ;;  %v4252_v55 = vld [vmem:[#allocation2 + $0x15a] sm:$0xff] }
 0x1b9   : > { %v1408_v46 = vpop.permute.xlu1 %1407  ;;  %v1414_v25 = vpop.permute.xlu0 %1413 }
 0x1ba   : > { %1485 = vst.msk [vmem:[#allocation4 + $0x98] sm:$0xff] %vm1465_vm5, %v1408_v46  ;;  %1488 = vst.msk [vmem:[#allocation4 + $0xb0] sm:$0xff] %vm1465_vm5, %v1414_v25  ;;  %v1983_v25 = vld [vmem:[#allocation3 + $0x30] sm:$0xff] }
 0x1bb   : > { %1896 = vrot.lane.b32.xlu1 %v1810_v50, %s3231_s9  ;;  %1866 = vrot.lane.b32.xlu0 %v1795_v23, %s3231_s9  ;;  %v2280_v50 = vld [vmem:[#allocation2 + $0x9a] sm:$0xff] }
 0x1bd   : > { %v1412_v56 = vpop.permute.xlu1 %1411  ;;  %v1418_v26 = vpop.permute.xlu0 %1417 }
 0x1be   : > { %1487 = vst.msk [vmem:[#allocation4 + $0xa8] sm:$0xff] %vm1465_vm5, %v1412_v56  ;;  %1490 = vst.msk [vmem:[#allocation4 + $0xc0] sm:$0xff] %vm1465_vm5, %v1418_v26 }
 0x1bf   : > { %1864 = vrot.lane.b32.xlu1 %v1794_v45, %s3231_s9  ;;  %2140 = vrot.lane.b32.xlu0 %v2053_v59, %s3232_s10 }
 0x1c1   : > { %v1416_v17 = vpop.permute.xlu1 %1415  ;;  %v1645_v61 = vpop.permute.xlu0 %1644 }
 0x1c2   : > { %1489 = vst.msk [vmem:[#allocation4 + $0xb8] sm:$0xff] %vm1465_vm5, %v1416_v17 }
 0x1c3   : > { %2138 = vrot.lane.b32.xlu1 %v4026_v44, %s3232_s10  ;;  %1724 = vst.msk [vmem:[#allocation4 + $0x88] sm:$0xff] %vm1706_vm6, %v1645_v61  ;;  %2108 = vrot.lane.b32.xlu0 %v3976_v60, %s3232_s10  ;;  %v2278_v44 = vld [vmem:[#allocation2 + $0x82] sm:$0xff] }
 0x1c5   : > { %v1643_v1 = vpop.permute.xlu1 %1642  ;;  %v1613_v27 = vpop.permute.xlu0 %1612 }
 0x1c6   : > { %1723 = vst.msk [vmem:[#allocation4 + $0x80] sm:$0xff] %vm1706_vm6, %v1643_v1  ;;  %1708 = vst.msk [vmem:[#allocation4 + $0x8] sm:$0xff] %vm1706_vm6, %v1613_v27 }
 0x1c7   : > { %2106 = vrot.lane.b32.xlu1 %v3961_v52, %s3232_s10  ;;  %2381 = vrot.lane.b32.xlu0 %v2294_v4, %s3233_s11 }
 0x1c9   : > { %v1611_v54 = vpop.permute.xlu1 %1610  ;;  %v1887_v60 = vpop.permute.xlu0 %1886 }
 0x1ca   : > { %1707 = vst.msk [vmem:[#allocation4] sm:$0xff] %vm1706_vm6, %v1611_v54 }
 0x1cb   : > { %2379 = vrot.lane.b32.xlu1 %v2293_v6, %s3233_s11  ;;  %1966 = vst.msk [vmem:[#allocation4 + $0x88] sm:$0xff] %vm1948_vm7, %v1887_v60  ;;  %2349 = vrot.lane.b32.xlu0 %v2278_v44, %s3233_s11  ;;  %v4284_v60 = vld [vmem:[#allocation3 + $0x32] sm:$0xff] }
 0x1cd   : > { %v1885_v31 = vpop.permute.xlu1 %1884  ;;  %v1855_v52 = vpop.permute.xlu0 %1854 }
 0x1ce   : > { %1965 = vst.msk [vmem:[#allocation4 + $0x80] sm:$0xff] %vm1948_vm7, %v1885_v31  ;;  %1950 = vst.msk [vmem:[#allocation4 + $0x8] sm:$0xff] %vm1948_vm7, %v1855_v52 }
 0x1cf   : > { %2347 = vrot.lane.b32.xlu1 %v2277_v12, %s3233_s11  ;;  %1658 = vrot.lane.b32.xlu0 %v2293_v6, %s3230_s8 }
 0x1d1   : > { %v1853_v33 = vpop.permute.xlu1 %1852  ;;  %v2129_v13 = vpop.permute.xlu0 %2128 }
 0x1d2   : > { %1949 = vst.msk [vmem:[#allocation4] sm:$0xff] %vm1948_vm7, %v1853_v33 }
 0x1d3   : > { %1419 = vrot.lane.b32.xlu1 %v2053_v59, %s3229_s7  ;;  %2208 = vst.msk [vmem:[#allocation4 + $0x88] sm:$0xff] %vm2190_vm8, %v2129_v13  ;;  %1626 = vrot.lane.b32.xlu0 %v2277_v12, %s3230_s8  ;;  %v2224_v59 = vld [vmem:[#allocation3 + $0x31] sm:$0xff] }
 0x1d5   : > { %v2127_v8 = vpop.permute.xlu1 %2126  ;;  %v2097_v34 = vpop.permute.xlu0 %2096 }
 0x1d6   : > { %2207 = vst.msk [vmem:[#allocation4 + $0x80] sm:$0xff] %vm2190_vm8, %v2127_v8  ;;  %2192 = vst.msk [vmem:[#allocation4 + $0x8] sm:$0xff] %vm2190_vm8, %v2097_v34  ;;  %v1814_v8 = vld [vmem:[#allocation2 + $0x168] sm:$0xff] }
 0x1d7   : > { %1660 = vrot.lane.b32.xlu1 %v2294_v4, %s3230_s8  ;;  %1900 = vrot.lane.b32.xlu0 %v1812_v53, %s3231_s9 }
 0x1d9   : > { %v2095_v14 = vpop.permute.xlu1 %2094  ;;  %v2370_v37 = vpop.permute.xlu0 %2369 }
 0x1da   : > { %2191 = vst.msk [vmem:[#allocation4] sm:$0xff] %vm2190_vm8, %v2095_v14  ;;  %v1798_v14 = vld [vmem:[#allocation2 + $0xa8] sm:$0xff] }
 0x1db   : > { %1628 = vrot.lane.b32.xlu1 %v2278_v44, %s3230_s8  ;;  %2449 = vst.msk [vmem:[#allocation4 + $0x88] sm:$0xff] %vm2431_vm9, %v2370_v37  ;;  %1868 = vrot.lane.b32.xlu0 %v1796_v36, %s3231_s9  ;;  %v3234_v44 = vmov 0.0|0.0   ;;  %v1815_v37 = vld [vmem:[#allocation2 + $0x170] sm:$0xff] }
 0x1dc   : > { %3181 = vmatprep.subr.bf16.mxu1 %v3234_v44 }
 0x1dd   : > { %v2368_v38 = vpop.permute.xlu1 %2367  ;;  %v2338_v18 = vpop.permute.xlu0 %2337 }
 0x1de   : > { %2448 = vst.msk [vmem:[#allocation4 + $0x80] sm:$0xff] %vm2431_vm9, %v2368_v38  ;;  %2433 = vst.msk [vmem:[#allocation4 + $0x8] sm:$0xff] %vm2431_vm9, %v2338_v18  ;;  %v4305_v38 = vld [vmem:[#allocation2 + $0x169] sm:$0xff] }
 0x1df   : > { %1902 = vrot.lane.b32.xlu1 %v1813_v16, %s3231_s9  ;;  %2142 = vrot.lane.b32.xlu0 %v4213_v49, %s3232_s10  ;;  %v1799_v18 = vld [vmem:[#allocation2 + $0xb0] sm:$0xff] }
 0x1e1   : > { %v2336_v39 = vpop.permute.xlu1 %2335  ;;  %v1649_v40 = vpop.permute.xlu0 %1648 }
 0x1e2   : > { %2432 = vst.msk [vmem:[#allocation4] sm:$0xff] %vm2431_vm9, %v2336_v39  ;;  %v2530_v21 = vld [vmem:[#allocation4 + $0x88] sm:$0xff] }
 0x1e3   : > { %1870 = vrot.lane.b32.xlu1 %v1797_v30, %s3231_s9  ;;  %1726 = vst.msk [vmem:[#allocation4 + $0x98] sm:$0xff] %vm1706_vm6, %v1649_v40  ;;  %1514 = vrot.lane.b32.xlu0 %v1498_v19, %s3229_s7  ;;  %v4314_v19 = vld [vmem:[#allocation2 + $0x171] sm:$0xff] }
 0x1e5   : > { %v1647_v28 = vpop.permute.xlu1 %1646  ;;  %v2529_v22 = vld [vmem:[#allocation4 + $0x80] sm:$0xff]  ;;  %v1617_v58 = vpop.permute.xlu0 %1616  ;;  %v2514_v15 = vld [vmem:[#allocation4 + $0x8] sm:$0xff] }
 0x1e6   : > { %1725 = vst.msk [vmem:[#allocation4 + $0x90] sm:$0xff] %vm1706_vm6, %v1647_v28  ;;  %v3133_v35 = vpack.c.bf16 %v2530_v21, %v2529_v22  ;;  %1710 = vst.msk [vmem:[#allocation4 + $0x18] sm:$0xff] %vm1706_vm6, %v1617_v58  ;;  %v2297_v22 = vld [vmem:[#allocation2 + $0x16a] sm:$0xff] }
 0x1e7   : > { %2144 = vrot.lane.b32.xlu1 %v4222_v41, %s3232_s10  ;;  %2110 = vrot.lane.b32.xlu0 %v3971_v57, %s3232_s10  ;;  %v1739_v57 = vld [vmem:[#allocation3 + $0x12] sm:$0xff] }
 0x1e8   : > { %3135 = vmatprep.subr.msk.bf16.mxu0 %vm4226_vm11, %v3133_v35 }
 0x1e9   : > { %v1615_v2 = vpop.permute.xlu1 %1614  ;;  %v2513_v7 = vld [vmem:[#allocation4] sm:$0xff]  ;;  %v1891_v48 = vpop.permute.xlu0 %1890 }
 0x1ea   : > { %1709 = vst.msk [vmem:[#allocation4 + $0x10] sm:$0xff] %vm1706_vm6, %v1615_v2  ;;  %v3136_v9 = vpack.c.bf16 %v2514_v15, %v2513_v7 }
 0x1eb   : > { %1516 = vrot.lane.b32.xlu1 %v1499_v11, %s3229_s7  ;;  %1968 = vst.msk [vmem:[#allocation4 + $0x98] sm:$0xff] %vm1948_vm7, %v1891_v48  ;;  %2383 = vrot.lane.b32.xlu0 %v4240_v47, %s3233_s11 }
 0x1ec   : > { %3138 = vmatpush3.bf16.xpose.msk.msra.mxu0 %vm4226_vm11, %v3136_v9  ;;  %v2298_v9 = vld [vmem:[#allocation2 + $0x172] sm:$0xff] }
 0x1ed   : > { %v1889_v24 = vpop.permute.xlu1 %1888  ;;  %v1859_v62 = vpop.permute.xlu0 %1858 }
 0x1ee   : > { %1967 = vst.msk [vmem:[#allocation4 + $0x90] sm:$0xff] %vm1948_vm7, %v1889_v24  ;;  %1952 = vst.msk [vmem:[#allocation4 + $0x18] sm:$0xff] %vm1948_vm7, %v1859_v62  ;;  %v1742_v62 = vld [vmem:[#allocation3 + $0x42] sm:$0xff] }
 0x1ef   : > { %2112 = vrot.lane.b32.xlu1 %v3986_v3, %s3232_s10  ;;  %1755 = vrot.lane.b32.xlu0 %v1739_v57, %s3230_s8  ;;  %v1982_v3 = vld [vmem:[#allocation3 + $0x20] sm:$0xff] }
 0x1f0   : > { %v2281_v57 = vld [vmem:[#allocation2 + $0xaa] sm:$0xff] }
 0x1f1   : > { %v1857_v43 = vpop.permute.xlu1 %1856  ;;  %v2133_v51 = vpop.permute.xlu0 %2132 }
 0x1f2   : > { %1951 = vst.msk [vmem:[#allocation4 + $0x10] sm:$0xff] %vm1948_vm7, %v1857_v43  ;;  %v1984_v43 = vld [vmem:[#allocation3 + $0x40] sm:$0xff] }
 0x1f3   : > { %2385 = vrot.lane.b32.xlu1 %v4252_v55, %s3233_s11  ;;  %2210 = vst.msk [vmem:[#allocation4 + $0x98] sm:$0xff] %vm2190_vm8, %v2133_v51  ;;  %2351 = vrot.lane.b32.xlu0 %v2279_v20, %s3233_s11  ;;  %v2282_v51 = vld [vmem:[#allocation2 + $0xb2] sm:$0xff] }
 0x1f5   : > { %v2131_v10 = vpop.permute.xlu1 %2130  ;;  %v2101_v5 = vpop.permute.xlu0 %2100 }
 0x1f6   : > { %2209 = vst.msk [vmem:[#allocation4 + $0x90] sm:$0xff] %vm2190_vm8, %v2131_v10  ;;  %2194 = vst.msk [vmem:[#allocation4 + $0x18] sm:$0xff] %vm2190_vm8, %v2101_v5 }
 0x1f7   : > { %1757 = vrot.lane.b32.xlu1 %v1740_v42, %s3230_s8  ;;  %1998 = vrot.lane.b32.xlu0 %v1982_v3, %s3231_s9  ;;  %v1985_v3 = vld [vmem:[#allocation3 + $0x50] sm:$0xff] }
 0x1f9   : > { %v2099_v46 = vpop.permute.xlu1 %2098  ;;  %v2374_v23 = vpop.permute.xlu0 %2373 }
 0x1fa   : > { %2193 = vst.msk [vmem:[#allocation4 + $0x10] sm:$0xff] %vm2190_vm8, %v2099_v46  ;;  %v2226_v46 = vld [vmem:[#allocation3 + $0x51] sm:$0xff] }
 0x1fb   : > { %2353 = vrot.lane.b32.xlu1 %v2280_v50, %s3233_s11  ;;  %2451 = vst.msk [vmem:[#allocation4 + $0x98] sm:$0xff] %vm2431_vm9, %v2374_v23  ;;  %2239 = vrot.lane.b32.xlu0 %v1499_v11, %s3232_s10 }
 0x1fd   : > { %v2372_v45 = vpop.permute.xlu1 %2371  ;;  %v2342_v56 = vpop.permute.xlu0 %2341 }
 0x1fe   : > { %2450 = vst.msk [vmem:[#allocation4 + $0x90] sm:$0xff] %vm2431_vm9, %v2372_v45  ;;  %2435 = vst.msk [vmem:[#allocation4 + $0x18] sm:$0xff] %vm2431_vm9, %v2342_v56 }
 0x1ff   : > { %2000 = vrot.lane.b32.xlu1 %v1983_v25, %s3231_s9  ;;  %1421 = vrot.lane.b32.xlu0 %v4213_v49, %s3229_s7 }
 0x201   : > { %v2340_v26 = vpop.permute.xlu1 %2339  ;;  %v1653_v17 = vpop.permute.xlu0 %1652 }
 0x202   : > { %2434 = vst.msk [vmem:[#allocation4 + $0x10] sm:$0xff] %vm2431_vm9, %v2340_v26  ;;  %v2532_v61 = vld [vmem:[#allocation4 + $0x98] sm:$0xff] }
 0x203   : > { %2241 = vrot.lane.b32.xlu1 %v2224_v59, %s3232_s10  ;;  %1728 = vst.msk [vmem:[#allocation4 + $0xa8] sm:$0xff] %vm1706_vm6, %v1653_v17  ;;  %2480 = vrot.lane.b32.xlu0 %v1740_v42, %s3233_s11 }
 0x205   : > { %v1651_v1 = vpop.permute.xlu1 %1650  ;;  %v2531_v4 = vld [vmem:[#allocation4 + $0x90] sm:$0xff]  ;;  %v1621_v6 = vpop.permute.xlu0 %1620  ;;  %v2516_v54 = vld [vmem:[#allocation4 + $0x18] sm:$0xff] }
 0x206   : > { %1727 = vst.msk [vmem:[#allocation4 + $0xa0] sm:$0xff] %vm1706_vm6, %v1651_v1  ;;  %v3139_v27 = vpack.c.bf16 %v2532_v61, %v2531_v4  ;;  %1712 = vst.msk [vmem:[#allocation4 + $0x28] sm:$0xff] %vm1706_vm6, %v1621_v6  ;;  %v1816_v6 = vld [vmem:[#allocation2 + $0x180] sm:$0xff] }
 0x207   : > { %1423 = vrot.lane.b32.xlu1 %v4222_v41, %s3229_s7  ;;  %1662 = vrot.lane.b32.xlu0 %v4240_v47, %s3230_s8  ;;  %v1501_v41 = vld [vmem:[#allocation3 + $0x41] sm:$0xff] }
 0x208   : > { %3141 = vmatprep.subr.msk.bf16.mxu0 %vm4226_vm11, %v3139_v27 }
 0x209   : > { %v1619_v12 = vpop.permute.xlu1 %1618  ;;  %v2515_v31 = vld [vmem:[#allocation4 + $0x10] sm:$0xff]  ;;  %v1895_v33 = vpop.permute.xlu0 %1894 }
 0x20a   : > { %1711 = vst.msk [vmem:[#allocation4 + $0x20] sm:$0xff] %vm1706_vm6, %v1619_v12  ;;  %v3142_v52 = vpack.c.bf16 %v2516_v54, %v2515_v31 }
 0x20b   : > { %2482 = vrot.lane.b32.xlu1 %v4284_v60, %s3233_s11  ;;  %1970 = vst.msk [vmem:[#allocation4 + $0xa8] sm:$0xff] %vm1948_vm7, %v1895_v33  ;;  %1630 = vrot.lane.b32.xlu0 %v2279_v20, %s3230_s8  ;;  %v1800_v33 = vld [vmem:[#allocation2 + $0xc0] sm:$0xff] }
 0x20c   : > { %3144 = vmatpush3.bf16.xpose.msk.msra.mxu0 %vm4226_vm11, %v3142_v52 }
 0x20d   : > { %v1893_v13 = vpop.permute.xlu1 %1892  ;;  %v1863_v53 = vpop.permute.xlu0 %1862 }
 0x20e   : > { %1969 = vst.msk [vmem:[#allocation4 + $0xa0] sm:$0xff] %vm1948_vm7, %v1893_v13  ;;  %1954 = vst.msk [vmem:[#allocation4 + $0x28] sm:$0xff] %vm1948_vm7, %v1863_v53 }
 0x20f   : > { %1664 = vrot.lane.b32.xlu1 %v4252_v55, %s3230_s8  ;;  %1904 = vrot.lane.b32.xlu0 %v1814_v8, %s3231_s9  ;;  %v1817_v8 = vld [vmem:[#allocation2 + $0x188] sm:$0xff] }
 0x211   : > { %v1861_v34 = vpop.permute.xlu1 %1860  ;;  %v2137_v36 = vpop.permute.xlu0 %2136 }
 0x212   : > { %1953 = vst.msk [vmem:[#allocation4 + $0x20] sm:$0xff] %vm1948_vm7, %v1861_v34  ;;  %v4383_v34 = vld [vmem:[#allocation2 + $0x181] sm:$0xff] }
 0x213   : > { %1632 = vrot.lane.b32.xlu1 %v2280_v50, %s3230_s8  ;;  %2212 = vst.msk [vmem:[#allocation4 + $0xa8] sm:$0xff] %vm2190_vm8, %v2137_v36  ;;  %1872 = vrot.lane.b32.xlu0 %v1798_v14, %s3231_s9  ;;  %v1801_v36 = vld [vmem:[#allocation2 + $0xc8] sm:$0xff] }
 0x215   : > { %v2135_v16 = vpop.permute.xlu1 %2134  ;;  %v2105_v49 = vpop.permute.xlu0 %2104 }
 0x216   : > { %2211 = vst.msk [vmem:[#allocation4 + $0xa0] sm:$0xff] %vm2190_vm8, %v2135_v16  ;;  %2196 = vst.msk [vmem:[#allocation4 + $0x28] sm:$0xff] %vm2190_vm8, %v2105_v49 }
 0x217   : > { %1906 = vrot.lane.b32.xlu1 %v1815_v37, %s3231_s9  ;;  %2146 = vrot.lane.b32.xlu0 %v4305_v38, %s3232_s10 }
 0x219   : > { %v2103_v30 = vpop.permute.xlu1 %2102  ;;  %v2378_v39 = vpop.permute.xlu0 %2377 }
 0x21a   : > { %2195 = vst.msk [vmem:[#allocation4 + $0x20] sm:$0xff] %vm2190_vm8, %v2103_v30 }
 0x21b   : > { %1874 = vrot.lane.b32.xlu1 %v1799_v18, %s3231_s9  ;;  %2453 = vst.msk [vmem:[#allocation4 + $0xa8] sm:$0xff] %vm2431_vm9, %v2378_v39  ;;  %1518 = vrot.lane.b32.xlu0 %v2224_v59, %s3229_s7  ;;  %v4362_v59 = vld [vmem:[#allocation3 + $0x52] sm:$0xff]  ;;  %v1503_v39 = vld [vmem:[#allocation3 + $0x61] sm:$0xff] }
 0x21c   : > { %v2042_v18 = vld [vmem:[#allocation2 + $0xc1] sm:$0xff] }
 0x21d   : > { %v2376_v40 = vpop.permute.xlu1 %2375  ;;  %v2346_v21 = vpop.permute.xlu0 %2345 }
 0x21e   : > { %2452 = vst.msk [vmem:[#allocation4 + $0xa0] sm:$0xff] %vm2431_vm9, %v2376_v40  ;;  %2437 = vst.msk [vmem:[#allocation4 + $0x28] sm:$0xff] %vm2431_vm9, %v2346_v21  ;;  %v4401_v40 = vld [vmem:[#allocation2 + $0x182] sm:$0xff] }
 0x21f   : > { %2148 = vrot.lane.b32.xlu1 %v4314_v19, %s3232_s10  ;;  %2114 = vrot.lane.b32.xlu0 %v3981_v63, %s3232_s10 }
 0x221   : > { %v2344_v28 = vpop.permute.xlu1 %2343  ;;  %v1657_v35 = vpop.permute.xlu0 %1656 }
 0x222   : > { %2436 = vst.msk [vmem:[#allocation4 + $0x20] sm:$0xff] %vm2431_vm9, %v2344_v28  ;;  %v2534_v58 = vld [vmem:[#allocation4 + $0xa8] sm:$0xff] }
 0x223   : > { %1520 = vrot.lane.b32.xlu1 %v1501_v41, %s3229_s7  ;;  %1730 = vst.msk [vmem:[#allocation4 + $0xb8] sm:$0xff] %vm1706_vm6, %v1657_v35  ;;  %2387 = vrot.lane.b32.xlu0 %v2297_v22, %s3233_s11  ;;  %v2300_v35 = vld [vmem:[#allocation2 + $0x18a] sm:$0xff] }
 0x225   : > { %v1655_v15 = vpop.permute.xlu1 %1654  ;;  %v2533_v11 = vld [vmem:[#allocation4 + $0xa0] sm:$0xff]  ;;  %v1625_v63 = vpop.permute.xlu0 %1624  ;;  %v2518_v7 = vld [vmem:[#allocation4 + $0x28] sm:$0xff] }
 0x226   : > { %1729 = vst.msk [vmem:[#allocation4 + $0xb0] sm:$0xff] %vm1706_vm6, %v1655_v15  ;;  %v3145_v2 = vpack.c.bf16 %v2534_v58, %v2533_v11  ;;  %1714 = vst.msk [vmem:[#allocation4 + $0x38] sm:$0xff] %vm1706_vm6, %v1625_v63  ;;  %v2283_v15 = vld [vmem:[#allocation2 + $0xc2] sm:$0xff] }
 0x227   : > { %2116 = vrot.lane.b32.xlu1 %v3994_v29, %s3232_s10  ;;  %1759 = vrot.lane.b32.xlu0 %v4284_v60, %s3230_s8 }
 0x228   : > { %3147 = vmatprep.subr.msk.bf16.mxu0 %vm4226_vm11, %v3145_v2  ;;  %v1744_v2 = vld [vmem:[#allocation3 + $0x62] sm:$0xff] }
 0x229   : > { %v1623_v47 = vpop.permute.xlu1 %1622  ;;  %v2517_v48 = vld [vmem:[#allocation4 + $0x20] sm:$0xff]  ;;  %v1899_v29 = vpop.permute.xlu0 %1898 }
 0x22a   : > { %1713 = vst.msk [vmem:[#allocation4 + $0x30] sm:$0xff] %vm1706_vm6, %v1623_v47  ;;  %v3148_v24 = vpack.c.bf16 %v2518_v7, %v2517_v48  ;;  %v1986_v7 = vld [vmem:[#allocation3 + $0x60] sm:$0xff] }
 0x22b   : > { %2389 = vrot.lane.b32.xlu1 %v2298_v9, %s3233_s11  ;;  %1972 = vst.msk [vmem:[#allocation4 + $0xb8] sm:$0xff] %vm1948_vm7, %v1899_v29  ;;  %2355 = vrot.lane.b32.xlu0 %v2281_v57, %s3233_s11  ;;  %v2284_v47 = vld [vmem:[#allocation2 + $0xca] sm:$0xff]  ;;  %v1987_v29 = vld [vmem:[#allocation3 + $0x70] sm:$0xff] }
 0x22c   : > { %3150 = vmatpush3.bf16.xpose.msk.msra.mxu0 %vm4226_vm11, %v3148_v24 }
 0x22d   : > { %v1897_v55 = vpop.permute.xlu1 %1896  ;;  %v1867_v20 = vpop.permute.xlu0 %1866 }
 0x22e   : > { %1971 = vst.msk [vmem:[#allocation4 + $0xb0] sm:$0xff] %vm1948_vm7, %v1897_v55  ;;  %1956 = vst.msk [vmem:[#allocation4 + $0x38] sm:$0xff] %vm1948_vm7, %v1867_v20 }
 0x22f   : > { %1761 = vrot.lane.b32.xlu1 %v1742_v62, %s3230_s8  ;;  %2002 = vrot.lane.b32.xlu0 %v1984_v43, %s3231_s9 }
 0x231   : > { %v1865_v42 = vpop.permute.xlu1 %1864  ;;  %v2141_v10 = vpop.permute.xlu0 %2140 }
 0x232   : > { %1955 = vst.msk [vmem:[#allocation4 + $0x30] sm:$0xff] %vm1948_vm7, %v1865_v42 }
 0x233   : > { %2357 = vrot.lane.b32.xlu1 %v2282_v51, %s3233_s11  ;;  %2214 = vst.msk [vmem:[#allocation4 + $0xb8] sm:$0xff] %vm2190_vm8, %v2141_v10  ;;  %2243 = vrot.lane.b32.xlu0 %v1501_v41, %s3232_s10  ;;  %v2043_v41 = vld [vmem:[#allocation2 + $0xc9] sm:$0xff] }
 0x235   : > { %v2139_v5 = vpop.permute.xlu1 %2138  ;;  %v2109_v50 = vpop.permute.xlu0 %2108 }
 0x236   : > { %2213 = vst.msk [vmem:[#allocation4 + $0xb0] sm:$0xff] %vm2190_vm8, %v2139_v5  ;;  %2198 = vst.msk [vmem:[#allocation4 + $0x38] sm:$0xff] %vm2190_vm8, %v2109_v50 }
 0x237   : > { %2004 = vrot.lane.b32.xlu1 %v1985_v3, %s3231_s9  ;;  %1425 = vrot.lane.b32.xlu0 %v4305_v38, %s3229_s7  ;;  %v4391_v38 = vld [vmem:[#allocation2 + $0x189] sm:$0xff] }
 0x239   : > { %v2107_v23 = vpop.permute.xlu1 %2106  ;;  %v2382_v25 = vpop.permute.xlu0 %2381 }
 0x23a   : > { %2197 = vst.msk [vmem:[#allocation4 + $0x30] sm:$0xff] %vm2190_vm8, %v2107_v23 }
 0x23b   : > { %2245 = vrot.lane.b32.xlu1 %v2226_v46, %s3232_s10  ;;  %2455 = vst.msk [vmem:[#allocation4 + $0xb8] sm:$0xff] %vm2431_vm9, %v2382_v25  ;;  %2484 = vrot.lane.b32.xlu0 %v1742_v62, %s3233_s11  ;;  %v4440_v25 = vld [vmem:[#allocation3 + $0x72] sm:$0xff] }
 0x23d   : > { %v2380_v45 = vpop.permute.xlu1 %2379  ;;  %v2350_v56 = vpop.permute.xlu0 %2349 }
 0x23e   : > { %2454 = vst.msk [vmem:[#allocation4 + $0xb0] sm:$0xff] %vm2431_vm9, %v2380_v45  ;;  %2439 = vst.msk [vmem:[#allocation4 + $0x38] sm:$0xff] %vm2431_vm9, %v2350_v56 }
 0x23f   : > { %1427 = vrot.lane.b32.xlu1 %v4314_v19, %s3229_s7  ;;  %1666 = vrot.lane.b32.xlu0 %v2297_v22, %s3230_s8 }
 0x241   : > { %v2348_v26 = vpop.permute.xlu1 %2347  ;;  %v1659_v61 = vpop.permute.xlu0 %1658 }
 0x242   : > { %2438 = vst.msk [vmem:[#allocation4 + $0x30] sm:$0xff] %vm2431_vm9, %v2348_v26  ;;  %v2536_v17 = vld [vmem:[#allocation4 + $0xb8] sm:$0xff]  ;;  %v1818_v26 = vld [vmem:[#allocation2 + $0x198] sm:$0xff] }
 0x243   : > { %2486 = vrot.lane.b32.xlu1 %v4362_v59, %s3233_s11  ;;  %1731 = vst.msk [vmem:[#allocation4 + $0xc0] sm:$0xff] %vm1706_vm6, %v1659_v61  ;;  %1634 = vrot.lane.b32.xlu0 %v2281_v57, %s3230_s8 }
 0x245   : > { %v1420_v1 = vpop.permute.xlu1 %1419  ;;  %v2535_v4 = vld [vmem:[#allocation4 + $0xb0] sm:$0xff]  ;;  %v2520_v54 = vld [vmem:[#allocation4 + $0x38] sm:$0xff]  ;;  %v1627_v60 = vpop.permute.xlu0 %1626 }
 0x246   : > { %1491 = vst.msk [vmem:[#allocation4 + $0xc8] sm:$0xff] %vm1465_vm5, %v1420_v1  ;;  %v3151_v27 = vpack.c.bf16 %v2536_v17, %v2535_v4  ;;  %v1802_v1 = vld [vmem:[#allocation2 + $0xd8] sm:$0xff] }
 0x247   : > { %1668 = vrot.lane.b32.xlu1 %v2298_v9, %s3230_s8  ;;  %1715 = vst.msk [vmem:[#allocation4 + $0x40] sm:$0xff] %vm1706_vm6, %v1627_v60  ;;  %1908 = vrot.lane.b32.xlu0 %v1816_v6, %s3231_s9  ;;  %v1819_v6 = vld [vmem:[#allocation2 + $0x1a0] sm:$0xff] }
 0x248   : > { %3153 = vmatprep.subr.msk.bf16.mxu0 %vm4226_vm11, %v3151_v27 }
 0x249   : > { %v1661_v12 = vpop.permute.xlu1 %1660  ;;  %v2519_v31 = vld [vmem:[#allocation4 + $0x30] sm:$0xff]  ;;  %v1901_v13 = vpop.permute.xlu0 %1900 }
 0x24a   : > { %1732 = vst.msk [vmem:[#allocation4 + $0xc8] sm:$0xff] %vm1706_vm6, %v1661_v12  ;;  %v3154_v52 = vpack.c.bf16 %v2520_v54, %v2519_v31  ;;  %v2060_v31 = vld [vmem:[#allocation2 + $0x199] sm:$0xff] }
 0x24b   : > { %1636 = vrot.lane.b32.xlu1 %v2282_v51, %s3230_s8  ;;  %1973 = vst.msk [vmem:[#allocation4 + $0xc0] sm:$0xff] %vm1948_vm7, %v1901_v13  ;;  %1876 = vrot.lane.b32.xlu0 %v1800_v33, %s3231_s9  ;;  %v2228_v51 = vld [vmem:[#allocation3 + $0x71] sm:$0xff] }
 0x24c   : > { %3156 = vmatpush3.bf16.xpose.msk.msra.mxu0 %vm4226_vm11, %v3154_v52  ;;  %v1803_v33 = vld [vmem:[#allocation2 + $0xe0] sm:$0xff] }
 0x24d   : > { %v1629_v53 = vpop.permute.xlu1 %1628  ;;  %v1869_v14 = vpop.permute.xlu0 %1868 }
 0x24e   : > { %1716 = vst.msk [vmem:[#allocation4 + $0x48] sm:$0xff] %vm1706_vm6, %v1629_v53  ;;  %v2061_v53 = vld [vmem:[#allocation2 + $0x1a1] sm:$0xff] }
 0x24f   : > { %1910 = vrot.lane.b32.xlu1 %v1817_v8, %s3231_s9  ;;  %1957 = vst.msk [vmem:[#allocation4 + $0x40] sm:$0xff] %vm1948_vm7, %v1869_v14  ;;  %2150 = vrot.lane.b32.xlu0 %v4383_v34, %s3232_s10  ;;  %v2044_v14 = vld [vmem:[#allocation2 + $0xd9] sm:$0xff] }
 0x251   : > { %v1903_v37 = vpop.permute.xlu1 %1902  ;;  %v2143_v16 = vpop.permute.xlu0 %2142 }
 0x252   : > { %1974 = vst.msk [vmem:[#allocation4 + $0xc8] sm:$0xff] %vm1948_vm7, %v1903_v37  ;;  %v1505_v37 = vld [vmem:[#allocation3 + $0x81] sm:$0xff] }
 0x253   : > { %1878 = vrot.lane.b32.xlu1 %v1801_v36, %s3231_s9  ;;  %2215 = vst.msk [vmem:[#allocation4 + $0xc0] sm:$0xff] %vm2190_vm8, %v2143_v16  ;;  %1522 = vrot.lane.b32.xlu0 %v2226_v46, %s3229_s7 }
 0x255   : > { %v1871_v49 = vpop.permute.xlu1 %1870  ;;  %v1515_v30 = vpop.permute.xlu0 %1514 }
 0x256   : > { %1958 = vst.msk [vmem:[#allocation4 + $0x48] sm:$0xff] %vm1948_vm7, %v1871_v49 }
 0x257   : > { %2152 = vrot.lane.b32.xlu1 %v4391_v38, %s3232_s10  ;;  %1538 = vst.msk [vmem:[#allocation5] sm:$0xff] %vm1465_vm5, %v1515_v30  ;;  %2118 = vrot.lane.b32.xlu0 %v2042_v18, %s3232_s10  ;;  %v2045_v18 = vld [vmem:[#allocation2 + $0xe1] sm:$0xff] }
 0x259   : > { %v2145_v19 = vpop.permute.xlu1 %2144  ;;  %v2111_v21 = vpop.permute.xlu0 %2110 }
 0x25a   : > { %2216 = vst.msk [vmem:[#allocation4 + $0xc8] sm:$0xff] %vm2190_vm8, %v2145_v19  ;;  %2199 = vst.msk [vmem:[#allocation4 + $0x40] sm:$0xff] %vm2190_vm8, %v2111_v21  ;;  %v2302_v19 = vld [vmem:[#allocation2 + $0x1a2] sm:$0xff]  ;;  %v2285_v21 = vld [vmem:[#allocation2 + $0xda] sm:$0xff] }
 0x25b   : > { %1524 = vrot.lane.b32.xlu1 %v1503_v39, %s3229_s7  ;;  %2391 = vrot.lane.b32.xlu0 %v4401_v40, %s3233_s11 }
 0x25d   : > { %v1517_v28 = vpop.permute.xlu1 %1516  ;;  %v2384_v22 = vpop.permute.xlu0 %2383 }
 0x25e   : > { %1539 = vst.msk [vmem:[#allocation5 + $0x8] sm:$0xff] %vm1465_vm5, %v1517_v28  ;;  %v1746_v28 = vld [vmem:[#allocation3 + $0x82] sm:$0xff] }
 0x25f   : > { %2120 = vrot.lane.b32.xlu1 %v2043_v41, %s3232_s10  ;;  %2456 = vst.msk [vmem:[#allocation4 + $0xc0] sm:$0xff] %vm2431_vm9, %v2384_v22  ;;  %1763 = vrot.lane.b32.xlu0 %v4362_v59, %s3230_s8 }
 0x261   : > { %v2113_v58 = vpop.permute.xlu1 %2112  ;;  %v1756_v11 = vpop.permute.xlu0 %1755 }
 0x262   : > { %2200 = vst.msk [vmem:[#allocation4 + $0x48] sm:$0xff] %vm2190_vm8, %v2113_v58 }
 0x263   : > { %2393 = vrot.lane.b32.xlu1 %v2300_v35, %s3233_s11  ;;  %1779 = vst.msk [vmem:[#allocation5] sm:$0xff] %vm1706_vm6, %v1756_v11  ;;  %2359 = vrot.lane.b32.xlu0 %v2283_v15, %s3233_s11 }
 0x265   : > { %v2386_v63 = vpop.permute.xlu1 %2385  ;;  %v2352_v9 = vpop.permute.xlu0 %2351 }
 0x266   : > { %2457 = vst.msk [vmem:[#allocation4 + $0xc8] sm:$0xff] %vm2431_vm9, %v2386_v63  ;;  %2440 = vst.msk [vmem:[#allocation4 + $0x40] sm:$0xff] %vm2431_vm9, %v2352_v9  ;;  %v2537_v24 = vld [vmem:[#allocation4 + $0xc0] sm:$0xff] }
 0x267   : > { %1765 = vrot.lane.b32.xlu1 %v1744_v2, %s3230_s8  ;;  %2006 = vrot.lane.b32.xlu0 %v1986_v7, %s3231_s9  ;;  %v1989_v7 = vld [vmem:[#allocation3 + $0x90] sm:$0xff] }
 0x269   : > { %v1758_v48 = vpop.permute.xlu1 %1757  ;;  %v1999_v57 = vpop.permute.xlu0 %1998 }
 0x26a   : > { %1780 = vst.msk [vmem:[#allocation5 + $0x8] sm:$0xff] %vm1706_vm6, %v1758_v48 }
 0x26b   : > { %2361 = vrot.lane.b32.xlu1 %v2284_v47, %s3233_s11  ;;  %2022 = vst.msk [vmem:[#allocation5] sm:$0xff] %vm1948_vm7, %v1999_v57  ;;  %2247 = vrot.lane.b32.xlu0 %v1503_v39, %s3232_s10  ;;  %v2230_v57 = vld [vmem:[#allocation3 + $0x91] sm:$0xff] }
 0x26d   : > { %v2354_v62 = vpop.permute.xlu1 %2353  ;;  %v2538_v55 = vld [vmem:[#allocation4 + $0xc8] sm:$0xff]  ;;  %v2240_v20 = vpop.permute.xlu0 %2239  ;;  %v2521_v10 = vld [vmem:[#allocation4 + $0x40] sm:$0xff] }
 0x26e   : > { %2441 = vst.msk [vmem:[#allocation4 + $0x48] sm:$0xff] %vm2431_vm9, %v2354_v62  ;;  %v3157_v43 = vpack.c.bf16 %v2538_v55, %v2537_v24 }
 0x26f   : > { %2008 = vrot.lane.b32.xlu1 %v1987_v29, %s3231_s9  ;;  %2263 = vst.msk [vmem:[#allocation5] sm:$0xff] %vm2190_vm8, %v2240_v20  ;;  %1429 = vrot.lane.b32.xlu0 %v4383_v34, %s3229_s7  ;;  %v4506_v20 = vld [vmem:[%s4640_s1] sm:$0xf] }
 0x270   : > { %3159 = vmatprep.subr.msk.bf16.mxu0 %vm4226_vm11, %v3157_v43  ;;  %v2471_v43 = vld [vmem:[#allocation3 + $0x92] sm:$0xff]  ;;  %3103 = vmatprep.mubr.msk.f32.mxu0 %vm2545_vm10, %v4506_v20 }
 0x271   : > { %v2001_v42 = vpop.permute.xlu1 %2000  ;;  %v1422_v3 = vpop.permute.xlu0 %1421 }
 0x272   : > { %2023 = vst.msk [vmem:[#allocation5 + $0x8] sm:$0xff] %vm1948_vm7, %v2001_v42 }
 0x273   : > { %2249 = vrot.lane.b32.xlu1 %v2228_v51, %s3232_s10  ;;  %1492 = vst.msk [vmem:[#allocation4 + $0xd0] sm:$0xff] %vm1465_vm5, %v1422_v3  ;;  %2488 = vrot.lane.b32.xlu0 %v1744_v2, %s3233_s11 }
 0x275   : > { %v2242_v5 = vpop.permute.xlu1 %2241  ;;  %v2522_v50 = vld [vmem:[#allocation4 + $0x48] sm:$0xff]  ;;  %v2481_v23 = vpop.permute.xlu0 %2480 }
 0x276   : > { %2264 = vst.msk [vmem:[#allocation5 + $0x8] sm:$0xff] %vm2190_vm8, %v2242_v5  ;;  %v3160_v46 = vpack.c.bf16 %v2522_v50, %v2521_v10 }
 0x277   : > { %1431 = vrot.lane.b32.xlu1 %v4391_v38, %s3229_s7  ;;  %2504 = vst.msk [vmem:[#allocation5] sm:$0xff] %vm2431_vm9, %v2481_v23  ;;  %1670 = vrot.lane.b32.xlu0 %v4401_v40, %s3230_s8  ;;  %v2301_v38 = vld [vmem:[#allocation2 + $0x19a] sm:$0xff] }
 0x278   : > { %3162 = vmatpush3.bf16.xpose.msk.msra.mxu0 %vm4226_vm11, %v3160_v46 }
 0x279   : > { %v1424_v45 = vpop.permute.xlu1 %1423  ;;  %v1663_v56 = vpop.permute.xlu0 %1662 }
 0x27a   : > { %1493 = vst.msk [vmem:[#allocation4 + $0xd8] sm:$0xff] %vm1465_vm5, %v1424_v45 }
 0x27b   : > { %2490 = vrot.lane.b32.xlu1 %v4440_v25, %s3233_s11  ;;  %1733 = vst.msk [vmem:[#allocation4 + $0xd0] sm:$0xff] %vm1706_vm6, %v1663_v56  ;;  %1638 = vrot.lane.b32.xlu0 %v2283_v15, %s3230_s8  ;;  %v2286_v15 = vld [vmem:[#allocation2 + $0xe2] sm:$0xff] }
 0x27d   : > { %v2483_v59 = vpop.permute.xlu1 %2482  ;;  %v1631_v17 = vpop.permute.xlu0 %1630 }
 0x27e   : > { %2505 = vst.msk [vmem:[#allocation5 + $0x8] sm:$0xff] %vm2431_vm9, %v2483_v59  ;;  %v2717_v4 = vld [vmem:[#allocation5] sm:$0xff] }
 0x27f   : > { %1672 = vrot.lane.b32.xlu1 %v2300_v35, %s3230_s8  ;;  %1717 = vst.msk [vmem:[#allocation4 + $0x50] sm:$0xff] %vm1706_vm6, %v1631_v17  ;;  %1912 = vrot.lane.b32.xlu0 %v1818_v26, %s3231_s9  ;;  %v1988_v35 = vld [vmem:[#allocation3 + $0x80] sm:$0xff] }
 0x281   : > { %v1665_v61 = vpop.permute.xlu1 %1664  ;;  %v1905_v27 = vpop.permute.xlu0 %1904 }
 0x282   : > { %1734 = vst.msk [vmem:[#allocation4 + $0xd8] sm:$0xff] %vm1706_vm6, %v1665_v61 }
 0x283   : > { %1640 = vrot.lane.b32.xlu1 %v2284_v47, %s3230_s8  ;;  %1975 = vst.msk [vmem:[#allocation4 + $0xd0] sm:$0xff] %vm1948_vm7, %v1905_v27  ;;  %1880 = vrot.lane.b32.xlu0 %v1802_v1, %s3231_s9 }
 0x285   : > { %v1633_v54 = vpop.permute.xlu1 %1632  ;;  %v2718_v60 = vld [vmem:[#allocation5 + $0x8] sm:$0xff]  ;;  %v1873_v52 = vpop.permute.xlu0 %1872 }
 0x286   : > { %1718 = vst.msk [vmem:[#allocation4 + $0x58] sm:$0xff] %vm1706_vm6, %v1633_v54  ;;  %v3182_v12 = vpack.c.bf16 %v2718_v60, %v2717_v4 }
 0x287   : > { %1914 = vrot.lane.b32.xlu1 %v1819_v6, %s3231_s9  ;;  %1959 = vst.msk [vmem:[#allocation4 + $0x50] sm:$0xff] %vm1948_vm7, %v1873_v52  ;;  %2154 = vrot.lane.b32.xlu0 %v2060_v31, %s3232_s10 }
 0x288   : > { %3184 = vmatpush3.bf16.xpose.msk.msra.mxu1 %vm4226_vm11, %v3182_v12 }
 0x289   : > { %v1907_v13 = vpop.permute.xlu1 %1906  ;;  %3185 = vmatprep.subr.bf16.mxu1 %v3234_v44  ;;  %v2147_v8 = vpop.permute.xlu0 %2146 }
 0x28a   : > { %1976 = vst.msk [vmem:[#allocation4 + $0xd8] sm:$0xff] %vm1948_vm7, %v1907_v13 }
 0x28b   : > { %1882 = vrot.lane.b32.xlu1 %v1803_v33, %s3231_s9  ;;  %2217 = vst.msk [vmem:[#allocation4 + $0xd0] sm:$0xff] %vm2190_vm8, %v2147_v8  ;;  %1526 = vrot.lane.b32.xlu0 %v2228_v51, %s3229_s7 }
 0x28d   : > { %v1875_v34 = vpop.permute.xlu1 %1874  ;;  %v1519_v36 = vpop.permute.xlu0 %1518 }
 0x28e   : > { %1960 = vst.msk [vmem:[#allocation4 + $0x58] sm:$0xff] %vm1948_vm7, %v1875_v34 }
 0x28f   : > { %2156 = vrot.lane.b32.xlu1 %v2061_v53, %s3232_s10  ;;  %1540 = vst.msk [vmem:[#allocation5 + $0x10] sm:$0xff] %vm1465_vm5, %v1519_v36  ;;  %2122 = vrot.lane.b32.xlu0 %v2044_v14, %s3232_s10 }
 0x291   : > { %v2149_v16 = vpop.permute.xlu1 %2148  ;;  %v2115_v49 = vpop.permute.xlu0 %2114 }
 0x292   : > { %2218 = vst.msk [vmem:[#allocation4 + $0xd8] sm:$0xff] %vm2190_vm8, %v2149_v16  ;;  %2201 = vst.msk [vmem:[#allocation4 + $0x50] sm:$0xff] %vm2190_vm8, %v2115_v49 }
 0x293   : > { %1528 = vrot.lane.b32.xlu1 %v1505_v37, %s3229_s7  ;;  %2395 = vrot.lane.b32.xlu0 %v2301_v38, %s3233_s11 }
 0x295   : > { %v1521_v30 = vpop.permute.xlu1 %1520  ;;  %v2388_v39 = vpop.permute.xlu0 %2387 }
 0x296   : > { %1541 = vst.msk [vmem:[#allocation5 + $0x18] sm:$0xff] %vm1465_vm5, %v1521_v30 }
 0x297   : > { %2124 = vrot.lane.b32.xlu1 %v2045_v18, %s3232_s10  ;;  %2458 = vst.msk [vmem:[#allocation4 + $0xd0] sm:$0xff] %vm2431_vm9, %v2388_v39  ;;  %1767 = vrot.lane.b32.xlu0 %v4440_v25, %s3230_s8 }
 0x299   : > { %v2117_v40 = vpop.permute.xlu1 %2116  ;;  %v1760_v41 = vpop.permute.xlu0 %1759 }
 0x29a   : > { %2202 = vst.msk [vmem:[#allocation4 + $0x58] sm:$0xff] %vm2190_vm8, %v2117_v40 }
 0x29b   : > { %2397 = vrot.lane.b32.xlu1 %v2302_v19, %s3233_s11  ;;  %1781 = vst.msk [vmem:[#allocation5 + $0x10] sm:$0xff] %vm1706_vm6, %v1760_v41  ;;  %2363 = vrot.lane.b32.xlu0 %v2285_v21, %s3233_s11 }
 0x29d   : > { %v2390_v22 = vpop.permute.xlu1 %2389  ;;  %v2356_v58 = vpop.permute.xlu0 %2355 }
 0x29e   : > { %2459 = vst.msk [vmem:[#allocation4 + $0xd8] sm:$0xff] %vm2431_vm9, %v2390_v22  ;;  %2442 = vst.msk [vmem:[#allocation4 + $0x50] sm:$0xff] %vm2431_vm9, %v2356_v58  ;;  %v2539_v2 = vld [vmem:[#allocation4 + $0xd0] sm:$0xff] }
 0x29f   : > { %1769 = vrot.lane.b32.xlu1 %v1746_v28, %s3230_s8  ;;  %2010 = vrot.lane.b32.xlu0 %v1988_v35, %s3231_s9 }
 0x2a1   : > { %v1762_v11 = vpop.permute.xlu1 %1761  ;;  %v2003_v63 = vpop.permute.xlu0 %2002 }
 0x2a2   : > { %1782 = vst.msk [vmem:[#allocation5 + $0x18] sm:$0xff] %vm1706_vm6, %v1762_v11 }
 0x2a3   : > { %2365 = vrot.lane.b32.xlu1 %v2286_v15, %s3233_s11  ;;  %2024 = vst.msk [vmem:[#allocation5 + $0x10] sm:$0xff] %vm1948_vm7, %v2003_v63  ;;  %2251 = vrot.lane.b32.xlu0 %v1505_v37, %s3232_s10 }
 0x2a5   : > { %v2358_v9 = vpop.permute.xlu1 %2357  ;;  %v2540_v47 = vld [vmem:[#allocation4 + $0xd8] sm:$0xff]  ;;  %v2244_v24 = vpop.permute.xlu0 %2243  ;;  %v2523_v62 = vld [vmem:[#allocation4 + $0x50] sm:$0xff] }
 0x2a6   : > { %2443 = vst.msk [vmem:[#allocation4 + $0x58] sm:$0xff] %vm2431_vm9, %v2358_v9  ;;  %v3163_v48 = vpack.c.bf16 %v2540_v47, %v2539_v2 }
 0x2a7   : > { %2012 = vrot.lane.b32.xlu1 %v1989_v7, %s3231_s9  ;;  %2265 = vst.msk [vmem:[#allocation5 + $0x10] sm:$0xff] %vm2190_vm8, %v2244_v24  ;;  %2492 = vrot.lane.b32.xlu0 %v1746_v28, %s3233_s11 }
 0x2a8   : > { %3165 = vmatprep.subr.msk.bf16.mxu0 %vm4226_vm11, %v3163_v48 }
 0x2a9   : > { %v2005_v29 = vpop.permute.xlu1 %2004  ;;  %v1426_v55 = vpop.permute.xlu0 %1425 }
 0x2aa   : > { %2025 = vst.msk [vmem:[#allocation5 + $0x18] sm:$0xff] %vm1948_vm7, %v2005_v29 }
 0x2ab   : > { %2253 = vrot.lane.b32.xlu1 %v2230_v57, %s3232_s10  ;;  %1494 = vst.msk [vmem:[#allocation4 + $0xe0] sm:$0xff] %vm1465_vm5, %v1426_v55 }
 0x2ad   : > { %v2246_v51 = vpop.permute.xlu1 %2245  ;;  %v2524_v42 = vld [vmem:[#allocation4 + $0x58] sm:$0xff]  ;;  %v2485_v3 = vpop.permute.xlu0 %2484 }
 0x2ae   : > { %2266 = vst.msk [vmem:[#allocation5 + $0x18] sm:$0xff] %vm2190_vm8, %v2246_v51  ;;  %v3166_v10 = vpack.c.bf16 %v2524_v42, %v2523_v62 }
 0x2af   : > { %2494 = vrot.lane.b32.xlu1 %v2471_v43, %s3233_s11  ;;  %2506 = vst.msk [vmem:[#allocation5 + $0x10] sm:$0xff] %vm2431_vm9, %v2485_v3 }
 0x2b0   : > { %3168 = vmatpush3.bf16.xpose.msk.msra.mxu0 %vm4226_vm11, %v3166_v10 }
 0x2b1   : > { %v1428_v5 = vpop.permute.xlu1 %1427  ;;  %v1667_v50 = vpop.permute.xlu0 %1666 }
 0x2b2   : > { %1495 = vst.msk [vmem:[#allocation4 + $0xe8] sm:$0xff] %vm1465_vm5, %v1428_v5 }
 0x2b3   : > { %1735 = vst.msk [vmem:[#allocation4 + $0xe0] sm:$0xff] %vm1706_vm6, %v1667_v50 }
 0x2b5   : > { %v2487_v46 = vpop.permute.xlu1 %2486  ;;  %v1635_v0 = vpop.permute.xlu0 %1634 }
 0x2b6   : > { %2507 = vst.msk [vmem:[#allocation5 + $0x18] sm:$0xff] %vm2431_vm9, %v2487_v46  ;;  %v2719_v25 = vld [vmem:[#allocation5 + $0x10] sm:$0xff] }
 0x2b7   : > { %1719 = vst.msk [vmem:[#allocation4 + $0x60] sm:$0xff] %vm1706_vm6, %v1635_v0 }
 0x2b9   : > { %v1669_v23 = vpop.permute.xlu1 %1668  ;;  %v1909_v45 = vpop.permute.xlu0 %1908 }
 0x2ba   : > { %1736 = vst.msk [vmem:[#allocation4 + $0xe8] sm:$0xff] %vm1706_vm6, %v1669_v23 }
 0x2bb   : > { %1977 = vst.msk [vmem:[#allocation4 + $0xe0] sm:$0xff] %vm1948_vm7, %v1909_v45 }
 0x2bd   : > { %v1637_v56 = vpop.permute.xlu1 %1636  ;;  %v2720_v59 = vld [vmem:[#allocation5 + $0x18] sm:$0xff]  ;;  %v1877_v17 = vpop.permute.xlu0 %1876 }
 0x2be   : > { %1720 = vst.msk [vmem:[#allocation4 + $0x68] sm:$0xff] %vm1706_vm6, %v1637_v56  ;;  %v3186_v26 = vpack.c.bf16 %v2720_v59, %v2719_v25 }
 0x2bf   : > { %1961 = vst.msk [vmem:[#allocation4 + $0x60] sm:$0xff] %vm1948_vm7, %v1877_v17 }
 0x2c0   : > { %3188 = vmatpush3.bf16.xpose.msk.msra.mxu1 %vm4226_vm11, %v3186_v26 }
 0x2c1   : > { %v1911_v61 = vpop.permute.xlu1 %1910  ;;  %3189 = vmatprep.subr.bf16.mxu1 %v3234_v44  ;;  %v2151_v1 = vpop.permute.xlu0 %2150 }
 0x2c2   : > { %1978 = vst.msk [vmem:[#allocation4 + $0xe8] sm:$0xff] %vm1948_vm7, %v1911_v61 }
 0x2c3   : > { %2219 = vst.msk [vmem:[#allocation4 + $0xe0] sm:$0xff] %vm2190_vm8, %v2151_v1 }
 0x2c5   : > { %v1879_v4 = vpop.permute.xlu1 %1878  ;;  %v1523_v27 = vpop.permute.xlu0 %1522 }
 0x2c6   : > { %1962 = vst.msk [vmem:[#allocation4 + $0x68] sm:$0xff] %vm1948_vm7, %v1879_v4 }
 0x2c7   : > { %1542 = vst.msk [vmem:[#allocation5 + $0x20] sm:$0xff] %vm1465_vm5, %v1523_v27 }
 0x2c9   : > { %v2153_v6 = vpop.permute.xlu1 %2152  ;;  %v2119_v54 = vpop.permute.xlu0 %2118 }
 0x2ca   : > { %2220 = vst.msk [vmem:[#allocation4 + $0xe8] sm:$0xff] %vm2190_vm8, %v2153_v6  ;;  %2203 = vst.msk [vmem:[#allocation4 + $0x60] sm:$0xff] %vm2190_vm8, %v2119_v54  ;;  %v2716_v6 = vld [vmem:[%s4641_s2] sm:$0xf] }
 0x2cd   : > { %v1525_v60 = vpop.permute.xlu1 %1524  ;;  %v2392_v12 = vpop.permute.xlu0 %2391 }
 0x2ce   : > { %1543 = vst.msk [vmem:[#allocation5 + $0x28] sm:$0xff] %vm1465_vm5, %v1525_v60 }
 0x2cf   : > { %2460 = vst.msk [vmem:[#allocation4 + $0xe0] sm:$0xff] %vm2431_vm9, %v2392_v12 }
 0x2d1   : > { %v2121_v31 = vpop.permute.xlu1 %2120  ;;  %v1764_v52 = vpop.permute.xlu0 %1763 }
 0x2d2   : > { %2204 = vst.msk [vmem:[#allocation4 + $0x68] sm:$0xff] %vm2190_vm8, %v2121_v31  ;;  %v3236_v31 = vmov (!%p3066_p4), 0.0  }
 0x2d3   : > { %1783 = vst.msk [vmem:[#allocation5 + $0x20] sm:$0xff] %vm1706_vm6, %v1764_v52 }
 0x2d4   : > { %2834 = vst.msk [vmem:[%s4644_s5] sm:$0xf] (!%p3066_p4), %vm2833_vm14, %v3236_v31  ;;  %2835 = vst.msk [vmem:[%s4645_s6] sm:$0xf] (!%p3066_p4), %vm2833_vm14, %v3236_v31 }
 0x2d5   : > { %v2394_v33 = vpop.permute.xlu1 %2393  ;;  %v2360_v13 = vpop.permute.xlu0 %2359 }
 0x2d6   : > { %2461 = vst.msk [vmem:[#allocation4 + $0xe8] sm:$0xff] %vm2431_vm9, %v2394_v33  ;;  %2444 = vst.msk [vmem:[#allocation4 + $0x60] sm:$0xff] %vm2431_vm9, %v2360_v13  ;;  %v2541_v53 = vld [vmem:[#allocation4 + $0xe0] sm:$0xff] }
 0x2d9   : > { %v1766_v8 = vpop.permute.xlu1 %1765  ;;  %v2007_v34 = vpop.permute.xlu0 %2006 }
 0x2da   : > { %1784 = vst.msk [vmem:[#allocation5 + $0x28] sm:$0xff] %vm1706_vm6, %v1766_v8 }
 0x2db   : > { %2026 = vst.msk [vmem:[#allocation5 + $0x20] sm:$0xff] %vm1948_vm7, %v2007_v34 }
 0x2dd   : > { %v2362_v14 = vpop.permute.xlu1 %2361  ;;  %v2542_v36 = vld [vmem:[#allocation4 + $0xe8] sm:$0xff]  ;;  %v2248_v16 = vpop.permute.xlu0 %2247  ;;  %v2525_v49 = vld [vmem:[#allocation4 + $0x60] sm:$0xff] }
 0x2de   : > { %2445 = vst.msk [vmem:[#allocation4 + $0x68] sm:$0xff] %vm2431_vm9, %v2362_v14  ;;  %v3169_v37 = vpack.c.bf16 %v2542_v36, %v2541_v53 }
 0x2df   : > { %2267 = vst.msk [vmem:[#allocation5 + $0x20] sm:$0xff] %vm2190_vm8, %v2248_v16 }
 0x2e0   : > { %3171 = vmatprep.subr.msk.bf16.mxu0 %vm4226_vm11, %v3169_v37 }
 0x2e1   : > { %v2009_v38 = vpop.permute.xlu1 %2008  ;;  %v1430_v18 = vpop.permute.xlu0 %1429 }
 0x2e2   : > { %2027 = vst.msk [vmem:[#allocation5 + $0x28] sm:$0xff] %vm1948_vm7, %v2009_v38 }
 0x2e3   : > { %1496 = vst.msk [vmem:[#allocation4 + $0xf0] sm:$0xff] %vm1465_vm5, %v1430_v18 }
 0x2e5   : > { %v2250_v30 = vpop.permute.xlu1 %2249  ;;  %v2526_v39 = vld [vmem:[#allocation4 + $0x68] sm:$0xff]  ;;  %v2489_v40 = vpop.permute.xlu0 %2488 }
 0x2e6   : > { %2268 = vst.msk [vmem:[#allocation5 + $0x28] sm:$0xff] %vm2190_vm8, %v2250_v30  ;;  %v3172_v19 = vpack.c.bf16 %v2526_v39, %v2525_v49 }
 0x2e7   : > { %2508 = vst.msk [vmem:[#allocation5 + $0x20] sm:$0xff] %vm2431_vm9, %v2489_v40 }
 0x2e8   : > { %3174 = vmatpush3.bf16.xpose.msk.msra.mxu0 %vm4226_vm11, %v3172_v19 }
 0x2e9   : > { %v1432_v21 = vpop.permute.xlu1 %1431  ;;  %v1671_v41 = vpop.permute.xlu0 %1670 }
 0x2ea   : > { %1497 = vst.msk [vmem:[#allocation4 + $0xf8] sm:$0xff] %vm1465_vm5, %v1432_v21 }
 0x2eb   : > { %1737 = vst.msk [vmem:[#allocation4 + $0xf0] sm:$0xff] %vm1706_vm6, %v1671_v41 }
 0x2ed   : > { %v2491_v28 = vpop.permute.xlu1 %2490  ;;  %v1639_v22 = vpop.permute.xlu0 %1638 }
 0x2ee   : > { %2509 = vst.msk [vmem:[#allocation5 + $0x28] sm:$0xff] %vm2431_vm9, %v2491_v28  ;;  %v2721_v58 = vld [vmem:[#allocation5 + $0x20] sm:$0xff] }
 0x2ef   : > { %1721 = vst.msk [vmem:[#allocation4 + $0x70] sm:$0xff] %vm1706_vm6, %v1639_v22 }
 0x2f1   : > { %v1673_v35 = vpop.permute.xlu1 %1672  ;;  %v1913_v15 = vpop.permute.xlu0 %1912 }
 0x2f2   : > { %1738 = vst.msk [vmem:[#allocation4 + $0xf8] sm:$0xff] %vm1706_vm6, %v1673_v35 }
 0x2f3   : > { %1979 = vst.msk [vmem:[#allocation4 + $0xf0] sm:$0xff] %vm1948_vm7, %v1913_v15 }
 0x2f5   : > { %v1641_v11 = vpop.permute.xlu1 %1640  ;;  %v2722_v2 = vld [vmem:[#allocation5 + $0x28] sm:$0xff]  ;;  %v1881_v7 = vpop.permute.xlu0 %1880 }
 0x2f6   : > { %1722 = vst.msk [vmem:[#allocation4 + $0x78] sm:$0xff] %vm1706_vm6, %v1641_v11  ;;  %v3190_v63 = vpack.c.bf16 %v2722_v2, %v2721_v58 }
 0x2f7   : > { %1963 = vst.msk [vmem:[#allocation4 + $0x70] sm:$0xff] %vm1948_vm7, %v1881_v7 }
 0x2f8   : > { %3192 = vmatpush3.bf16.xpose.msk.msra.mxu1 %vm4226_vm11, %v3190_v63 }
 0x2f9   : > { %v1915_v9 = vpop.permute.xlu1 %1914  ;;  %3193 = vmatprep.subr.bf16.mxu1 %v3234_v44  ;;  %v2155_v47 = vpop.permute.xlu0 %2154 }
 0x2fa   : > { %1980 = vst.msk [vmem:[#allocation4 + $0xf8] sm:$0xff] %vm1948_vm7, %v1915_v9 }
 0x2fb   : > { %2221 = vst.msk [vmem:[#allocation4 + $0xf0] sm:$0xff] %vm2190_vm8, %v2155_v47 }
 0x2fd   : > { %v1883_v48 = vpop.permute.xlu1 %1882  ;;  %v1527_v24 = vpop.permute.xlu0 %1526 }
 0x2fe   : > { %1964 = vst.msk [vmem:[#allocation4 + $0x78] sm:$0xff] %vm1948_vm7, %v1883_v48 }
 0x2ff   : > { %1544 = vst.msk [vmem:[#allocation5 + $0x30] sm:$0xff] %vm1465_vm5, %v1527_v24 }
 0x301   : > { %v2157_v57 = vpop.permute.xlu1 %2156  ;;  %v2123_v29 = vpop.permute.xlu0 %2122 }
 0x302   : > { %2222 = vst.msk [vmem:[#allocation4 + $0xf8] sm:$0xff] %vm2190_vm8, %v2157_v57  ;;  %2205 = vst.msk [vmem:[#allocation4 + $0x70] sm:$0xff] %vm2190_vm8, %v2123_v29 }
 0x305   : > { %v1529_v62 = vpop.permute.xlu1 %1528  ;;  %v2396_v44 = vpop.permute.xlu0 %2395 }
 0x306   : > { %1545 = vst.msk [vmem:[#allocation5 + $0x38] sm:$0xff] %vm1465_vm5, %v1529_v62 }
 0x307   : > { %2462 = vst.msk [vmem:[#allocation4 + $0xf0] sm:$0xff] %vm2431_vm9, %v2396_v44 }
 0x309   : > { %v2125_v55 = vpop.permute.xlu1 %2124  ;;  %v1768_v43 = vpop.permute.xlu0 %1767 }
 0x30a   : > { %2206 = vst.msk [vmem:[#allocation4 + $0x78] sm:$0xff] %vm2190_vm8, %v2125_v55 }
 0x30b   : > { %1785 = vst.msk [vmem:[#allocation5 + $0x30] sm:$0xff] %vm1706_vm6, %v1768_v43 }
 0x30d   : > { %v2398_v51 = vpop.permute.xlu1 %2397  ;;  %v2364_v42 = vpop.permute.xlu0 %2363 }
 0x30e   : > { %2463 = vst.msk [vmem:[#allocation4 + $0xf8] sm:$0xff] %vm2431_vm9, %v2398_v51  ;;  %2446 = vst.msk [vmem:[#allocation4 + $0x70] sm:$0xff] %vm2431_vm9, %v2364_v42  ;;  %v2543_v3 = vld [vmem:[#allocation4 + $0xf0] sm:$0xff] }
 0x311   : > { %v1770_v10 = vpop.permute.xlu1 %1769  ;;  %v2011_v5 = vpop.permute.xlu0 %2010 }
 0x312   : > { %1786 = vst.msk [vmem:[#allocation5 + $0x38] sm:$0xff] %vm1706_vm6, %v1770_v10 }
 0x313   : > { %2028 = vst.msk [vmem:[#allocation5 + $0x30] sm:$0xff] %vm1948_vm7, %v2011_v5 }
 0x315   : > { %v2366_v50 = vpop.permute.xlu1 %2365  ;;  %v2544_v46 = vld [vmem:[#allocation4 + $0xf8] sm:$0xff]  ;;  %v2252_v23 = vpop.permute.xlu0 %2251  ;;  %v2527_v45 = vld [vmem:[#allocation4 + $0x70] sm:$0xff] }
 0x316   : > { %2447 = vst.msk [vmem:[#allocation4 + $0x78] sm:$0xff] %vm2431_vm9, %v2366_v50  ;;  %v3175_v0 = vpack.c.bf16 %v2544_v46, %v2543_v3 }
 0x317   : > { %2269 = vst.msk [vmem:[#allocation5 + $0x30] sm:$0xff] %vm2190_vm8, %v2252_v23 }
 0x318   : > { %3177 = vmatprep.subr.msk.bf16.mxu0 %vm4226_vm11, %v3175_v0 }
 0x319   : > { %v2013_v25 = vpop.permute.xlu1 %2012  ;;  %v2493_v56 = vpop.permute.xlu0 %2492 }
 0x31a   : > { %2029 = vst.msk [vmem:[#allocation5 + $0x38] sm:$0xff] %vm1948_vm7, %v2013_v25 }
 0x31b   : > { %2510 = vst.msk [vmem:[#allocation5 + $0x30] sm:$0xff] %vm2431_vm9, %v2493_v56 }
 0x31d   : > { %v2254_v59 = vpop.permute.xlu1 %2253  ;;  %v2528_v26 = vld [vmem:[#allocation4 + $0x78] sm:$0xff] }
 0x31e   : > { %2270 = vst.msk [vmem:[#allocation5 + $0x38] sm:$0xff] %vm2190_vm8, %v2254_v59  ;;  %v3178_v17 = vpack.c.bf16 %v2528_v26, %v2527_v45 }
 0x320   : > { %3180 = vmatpush3.bf16.xpose.msk.msra.mxu0 %vm4226_vm11, %v3178_v17 }
 0x321   : > { %v2495_v61 = vpop.permute.xlu1 %2494 }
 0x322   : > { %2511 = vst.msk [vmem:[#allocation5 + $0x38] sm:$0xff] %vm2431_vm9, %v2495_v61  ;;  %v2723_v1 = vld [vmem:[#allocation5 + $0x30] sm:$0xff] }
 0x327   : > { %3104 = vmatmul.mubr.msk.f32.vlgmr.msra.gmra.mrb[0].mxu0 %vm2545_vm10, %v4506_v20 }
 0x329   : > { %v2724_v4 = vld [vmem:[#allocation5 + $0x38] sm:$0xff] }
 0x32a   : > { %v3194_v27 = vpack.c.bf16 %v2724_v4, %v2723_v1 }
 0x32c   : > { %3196 = vmatpush3.bf16.xpose.msk.msra.mxu1 %vm4226_vm11, %v3194_v27 }
 0x333   : > { %3131 = vmatmul.mubr.msk.f32.vlgmr.msra.gmra.mrb[0].mxu1 %vm2545_vm10, %v2716_v6 }
 0x3fa   : > { %v2711_v54 = vpop.f32.mrb[0].mxu0 }
 0x3fb   : > { %v2713_v60 = vpop.f32.mrb[1].mxu0 }
 0x3fc   : > { %v2824_v12 = vcombine.low %v2711_v54, %v2713_v60 }
 0x3fe   : > { %2826 = vst [vmem:[%s252_s19] sm:$0xff] %v2824_v12 }
 0x401   : > { %2832 = sbr.rel (%p3066_p4) target bundleno = 1032 (0x408), region = 36 }
 0x406   : > { %v2818_v32 = vpop.f32.mrb[0].mxu1 }
 0x407   : > { %2828 = vst.msk [vmem:[%s256_s26] sm:$0xf] %vm2827_vm13, %v2818_v32  ;;  %v3132_v20 = vpop.f32.mrb[1].mxu1 }
 0x408 PF: > { %vm2837_vm15 = vcmask 1043456   ;;  %v2847_v52 = vmul.f32 %v2711_v54, %v2711_v54  ;;  %v2848_v33 = vmul.f32 %v2713_v60, %v2713_v60  ;;  %v2864_v36 = vmul.f32 %v2818_v32, %v2818_v32  ;;  %v2836_v49 = vld [vmem:[%s4644_s5] sm:$0xf] }
 0x409   : > { %v2838_v13 = vsel %vm2837_vm15, %v2711_v54, 0.0  ;;  %v2839_v8 = vsel %vm2837_vm15, %v2713_v60, 0.0  ;;  %v2858_v16 = vsel %vm2827_vm13, %v2818_v32, 0.0  ;;  %vm2844_vm0 = vcmask 3072   ;;  %v2857_v39 = vld [vmem:[%s4645_s6] sm:$0xf] }
 0x40a   : > { %v2840_v53 = vadd.f32 %v2839_v8, %v2838_v13  ;;  %v2849_v34 = vsel %vm2837_vm15, %v2847_v52, 0.0  ;;  %v2850_v14 = vsel %vm2837_vm15, %v2848_v33, 0.0  ;;  %v2865_v38 = vsel %vm2827_vm13, %v2864_v36, 0.0 }
 0x40b   : > { %v2851_v37 = vadd.f32 %v2850_v14, %v2849_v34  ;;  %vm2855_vm1 = vcmask 11272  }
 0x40c   : > { %2841 = vadd.xlane.f32.xlu0 %v2840_v53 }
 0x40d   : > { %2852 = vadd.xlane.f32.xlu1 %v2851_v37 }
 0x410   : > { %2859 = vadd.xlane.f32.xlu0 %v2858_v16 }
 0x411   : > { %2866 = vadd.xlane.f32.xlu1 %v2865_v38 }
 0x499   : > { %v2842_v18 = vpop.xlane.xlu0 %2841 }
 0x49a   : > { %v2843_v30 = vadd.f32 %v2842_v18, %v2836_v49  ;;  %v2853_v21 = vpop.xlane.xlu1 %2852 }
 0x49c   : > { %2845 = vst.msk [vmem:[%s4644_s5] sm:$0xf] %vm2844_vm0, %v2843_v30 }
 0x49d   : > { %v2860_v19 = vpop.xlane.xlu0 %2859 }
 0x49e   : > { %v2861_v40 = vadd.f32 %v2860_v19, %v2857_v39  ;;  %v2867_v22 = vpop.xlane.xlu1 %2866 }
 0x4a0   : > { %2862 = vst.msk [vmem:[%s4645_s6] sm:$0xf] %vm2844_vm0, %v2861_v40 }
 0x4a3   : > { %v2846_v41 = vld [vmem:[%s4644_s5] sm:$0xf] }
 0x4a4   : > { %v2854_v28 = vadd.f32 %v2853_v21, %v2846_v41 }
 0x4a6   : > { %2856 = vst.msk [vmem:[%s4644_s5] sm:$0xf] %vm2855_vm1, %v2854_v28 }
 0x4a7   : > { %v2863_v35 = vld [vmem:[%s4645_s6] sm:$0xf] }
 0x4a8   : > { %v2868_v58 = vadd.f32 %v2867_v22, %v2863_v35 }
 0x4aa   : > { %2869 = vst.msk [vmem:[%s4645_s6] sm:$0xf] %vm2855_vm1, %v2868_v58 }
 0x4ab PF: > { %s17_s21 = sadd.s32 1, %s3223_s21  }
 0x4ac   : > { %p14_p5 = scmp.ge.s32.totalorder %s17_s21, 4  }
 0x4ae   :  { %16 = sbr.rel (!%p14_p5) target bundleno = 1 (0x1), region = 129 }

</bundles_post_ra>
